<compile_context>
chip_gen: v6e
topology: v6e:2x2x1
jax: 0.10.0
libtpu: 0.0.40
codegen_flags: <defaults>
</compile_context>

<pallas_src>
import jax
import jax.numpy as jnp
from jax.experimental import pallas as pl
from jax.experimental.pallas import tpu as pltpu


def conv2d_pallas(x_nchw, weight_oihw, bias):
    """PyTorch Conv2d(3, 6, 3, stride=1, padding=0) forward.

    x_nchw      : (N, 3, H, W)  float32
    weight_oihw : (6, 3, 3, 3)  float32 (PyTorch OIHW layout)
    bias        : (6,)          float32
    returns     : (N, 6, H-2, W-2) float32 (NCHW)
    """
    N, Cin, H, W = x_nchw.shape
    Cout, Cin_w, KH, KW = weight_oihw.shape
    assert Cin == Cin_w
    # NOTE: stride=1 / padding=0 ("valid") only -- the tap indexing below assumes it.
    OH = H - KH + 1
    OW = W - KW + 1

    # ---- lane packing: NB images side-by-side along W, padded to 128 lanes ----
    LANES = 128
    NB = max(1, min(N, LANES // W)) if W < LANES else 1
    G = -(-N // NB)                    # image groups
    Wt = NB * W                        # packed width
    Wp = -(-Wt // LANES) * LANES       # lane-padded width (multiple of 128)

    xp = x_nchw
    if G * NB != N:
        xp = jnp.pad(xp, ((0, G * NB - N), (0, 0), (0, 0), (0, 0)))
    # (G, NB, Cin, H, W) -> (G, Cin, H, NB, W) -> (G, Cin, H, Wt)  [+ lane pad]
    x_wide = (xp.reshape(G, NB, Cin, H, W)
                .transpose(0, 2, 3, 1, 4)
                .reshape(G, Cin, H, Wt))
    if Wp != Wt:
        x_wide = jnp.pad(x_wide, ((0, 0), (0, 0), (0, 0), (0, Wp - Wt)))

    # ---- several groups per grid step: amortize step overhead / DMA descriptors,
    # capped so the static unroll keeps live vregs low. ----
    bytes_per_group = (Cin * H + Cout * OH) * Wp * 4
    GPS = int(max(1, min(G, (1 << 20) // bytes_per_group, 4)))
    Gp = -(-G // GPS) * GPS
    if Gp != G:
        x_wide = jnp.pad(x_wide, ((0, Gp - G), (0, 0), (0, 0), (0, 0)))

    # Params pre-laid-out once: flat OIHW weights + bias -> SMEM (scalar prefetch).
    w_flat = weight_oihw.reshape(Cout * Cin * KH * KW).astype(jnp.float32)
    b_flat = bias.astype(jnp.float32)

    def kernel(w_ref, b_ref, x_ref, o_ref):
        # w_ref : (Cout*Cin*KH*KW,) f32 SMEM   b_ref : (Cout,) f32 SMEM
        # x_ref : (GPS, Cin, H, Wp)  VMEM      o_ref : (GPS, Cout, OH, Wp) VMEM
        gps = x_ref.shape[0]
        for g in range(gps):
            accs = [None] * Cout           # Cout live accumulators, (OH, Wp) each
            for ci in range(Cin):
                plane = x_ref[g, ci]       # (H, Wp)
                # kw shifts as XLU lane rolls (one per kw, shared across kh & co).
                # Valid output lanes never see the wrap-around columns.
                rolled = [plane if kw == 0 else pltpu.roll(plane, Wp - kw, axis=1)
                          for kw in range(KW)]
                for kh in range(KH):
                    for kw in range(KW):
                        tap = rolled[kw][kh:kh + OH, :]   # sublane slice, (OH, Wp)
                        for co in range(Cout):
                            wv = w_ref[((co * Cin + ci) * KH + kh) * KW + kw]
                            if accs[co] is None:
                                # bias fused into the first FMA (no zeros init).
                                accs[co] = tap * wv + b_ref[co]
                            else:
                                accs[co] = accs[co] + tap * wv
            for co in range(Cout):
                # full 128-lane-multiple store: unmasked vst.
                o_ref[g, co, :, :] = accs[co].astype(o_ref.dtype)

    grid_spec = pltpu.PrefetchScalarGridSpec(
        num_scalar_prefetch=2,
        grid=(Gp // GPS,),
        in_specs=[
            pl.BlockSpec((GPS, Cin, H, Wp), lambda t, w_s, b_s: (t, 0, 0, 0)),
        ],
        out_specs=pl.BlockSpec((GPS, Cout, OH, Wp), lambda t, w_s, b_s: (t, 0, 0, 0)),
    )

    out_wide = pl.pallas_call(
        kernel,
        out_shape=jax.ShapeDtypeStruct((Gp, Cout, OH, Wp), x_nchw.dtype),
        grid_spec=grid_spec,
        compiler_params=pltpu.CompilerParams(
            dimension_semantics=("parallel",)),
    )(w_flat, b_flat, x_wide)

    # ---- unpack (layout plumbing only): drop lane padding, split image bands,
    # drop the KW-1 garbage columns per band, back to NCHW. ----
    out = out_wide[:G, :, :, :Wt].reshape(G, Cout, OH, NB, W)[..., :OW]
    out = out.transpose(0, 3, 1, 2, 4).reshape(G * NB, Cout, OH, OW)[:N]
    return out


def init_params(key):
    """Deterministic Conv2d(3, 6, 3) params, PyTorch-style kaiming-uniform bounds."""
    cout, cin, kh, kw = 6, 3, 3, 3
    fan_in = cin * kh * kw
    bound = 1.0 / jnp.sqrt(jnp.float32(fan_in))
    k_w, k_b = jax.random.split(key)
    weight = jax.random.uniform(k_w, (cout, cin, kh, kw), jnp.float32, -bound, bound)
    bias = jax.random.uniform(k_b, (cout,), jnp.float32, -bound, bound)
    return weight, bias


if __name__ == "__main__":
    key = jax.random.PRNGKey(0)
    k_x, k_p = jax.random.split(key)

    # Small shapes consistent with Conv2d(3, 6, 3, 1, 0): N=2, C=3, H=W=16.
    x = jax.random.normal(k_x, (2, 3, 16, 16), dtype=jnp.float32)
    weight, bias = init_params(k_p)

    out = jax.block_until_ready(conv2d_pallas(x, weight, bias))

    # Reference: full-precision conv + bias (matches torch Conv2d forward).
    ref = jax.lax.conv_general_dilated(
        x, weight, window_strides=(1, 1), padding="VALID",
        dimension_numbers=("NCHW", "OIHW", "NCHW"),
        precision=jax.lax.Precision.HIGHEST)
    ref = ref + bias[None, :, None, None]
    ref = jax.block_until_ready(ref)

    assert out.shape == (2, 6, 14, 14), out.shape
    max_err = jnp.max(jnp.abs(out - ref))
    assert jnp.allclose(out, ref, atol=1e-4, rtol=1e-4), (
        f"mismatch vs reference conv, max abs err = {max_err:.3e}")

    print("KERNEL_OK")
</pallas_src>

<mosaic_0001>
module attributes {stable_mosaic.version = 11 : i64} {
  func.func @kernel(%arg0: i32, %arg1: memref<162xf32, #tpu.memory_space<smem>>, %arg2: memref<6xf32, #tpu.memory_space<smem>>, %arg3: memref<1x3x16x128xf32, #tpu.memory_space<vmem>>, %arg4: memref<1x6x14x128xf32, #tpu.memory_space<vmem>>) attributes {dimension_semantics = [#tpu.dimension_semantics<parallel>], iteration_bounds = array<i64: 1>, scalar_prefetch = 2 : i64, scratch_operands = 0 : i64, tpu.core_type = #tpu.core_type<tc>, window_params = [{transform_indices = @transform_0, window_bounds = array<i64: 1, 3, 16, 128>}, {transform_indices = @transform_1, window_bounds = array<i64: 1, 6, 14, 128>}]} {
    %c0 = arith.constant 0 : index
    %c0_0 = arith.constant 0 : index
    %c0_1 = arith.constant 0 : index
    %c0_2 = arith.constant 0 : index
    %0 = vector.load %arg3[%c0, %c0_0, %c0_1, %c0_2] : memref<1x3x16x128xf32, #tpu.memory_space<vmem>>, vector<1x1x16x128xf32>
    %1 = vector.shape_cast %0 : vector<1x1x16x128xf32> to vector<16x128xf32>
    %c127_i32 = arith.constant 127 : i32
    %2 = tpu.dynamic_rotate %1 by %c127_i32 dim 1 : vector<16x128xf32>, i32 -> vector<16x128xf32>
    %c126_i32 = arith.constant 126 : i32
    %3 = tpu.dynamic_rotate %1 by %c126_i32 dim 1 : vector<16x128xf32>, i32 -> vector<16x128xf32>
    %4 = vector.extract_strided_slice %1 {offsets = [0, 0], sizes = [14, 128], strides = [1, 1]} : vector<16x128xf32> to vector<14x128xf32>
    %c0_3 = arith.constant 0 : index
    %5 = memref.load %arg1[%c0_3] : memref<162xf32, #tpu.memory_space<smem>>
    %6 = vector.broadcast %5 : f32 to vector<14x128xf32>
    %7 = arith.mulf %4, %6 : vector<14x128xf32>
    %c0_4 = arith.constant 0 : index
    %8 = memref.load %arg2[%c0_4] : memref<6xf32, #tpu.memory_space<smem>>
    %9 = vector.broadcast %8 : f32 to vector<14x128xf32>
    %10 = arith.addf %7, %9 : vector<14x128xf32>
    %c27 = arith.constant 27 : index
    %11 = memref.load %arg1[%c27] : memref<162xf32, #tpu.memory_space<smem>>
    %12 = vector.broadcast %11 : f32 to vector<14x128xf32>
    %13 = arith.mulf %4, %12 : vector<14x128xf32>
    %c1 = arith.constant 1 : index
    %14 = memref.load %arg2[%c1] : memref<6xf32, #tpu.memory_space<smem>>
    %15 = vector.broadcast %14 : f32 to vector<14x128xf32>
    %16 = arith.addf %13, %15 : vector<14x128xf32>
    %c54 = arith.constant 54 : index
    %17 = memref.load %arg1[%c54] : memref<162xf32, #tpu.memory_space<smem>>
    %18 = vector.broadcast %17 : f32 to vector<14x128xf32>
    %19 = arith.mulf %4, %18 : vector<14x128xf32>
    %c2 = arith.constant 2 : index
    %20 = memref.load %arg2[%c2] : memref<6xf32, #tpu.memory_space<smem>>
    %21 = vector.broadcast %20 : f32 to vector<14x128xf32>
    %22 = arith.addf %19, %21 : vector<14x128xf32>
    %c81 = arith.constant 81 : index
    %23 = memref.load %arg1[%c81] : memref<162xf32, #tpu.memory_space<smem>>
    %24 = vector.broadcast %23 : f32 to vector<14x128xf32>
    %25 = arith.mulf %4, %24 : vector<14x128xf32>
    %c3 = arith.constant 3 : index
    %26 = memref.load %arg2[%c3] : memref<6xf32, #tpu.memory_space<smem>>
    %27 = vector.broadcast %26 : f32 to vector<14x128xf32>
    %28 = arith.addf %25, %27 : vector<14x128xf32>
    %c108 = arith.constant 108 : index
    %29 = memref.load %arg1[%c108] : memref<162xf32, #tpu.memory_space<smem>>
    %30 = vector.broadcast %29 : f32 to vector<14x128xf32>
    %31 = arith.mulf %4, %30 : vector<14x128xf32>
    %c4 = arith.constant 4 : index
    %32 = memref.load %arg2[%c4] : memref<6xf32, #tpu.memory_space<smem>>
    %33 = vector.broadcast %32 : f32 to vector<14x128xf32>
    %34 = arith.addf %31, %33 : vector<14x128xf32>
    %c135 = arith.constant 135 : index
    %35 = memref.load %arg1[%c135] : memref<162xf32, #tpu.memory_space<smem>>
    %36 = vector.broadcast %35 : f32 to vector<14x128xf32>
    %37 = arith.mulf %4, %36 : vector<14x128xf32>
    %c5 = arith.constant 5 : index
    %38 = memref.load %arg2[%c5] : memref<6xf32, #tpu.memory_space<smem>>
    %39 = vector.broadcast %38 : f32 to vector<14x128xf32>
    %40 = arith.addf %37, %39 : vector<14x128xf32>
    %41 = vector.extract_strided_slice %2 {offsets = [0, 0], sizes = [14, 128], strides = [1, 1]} : vector<16x128xf32> to vector<14x128xf32>
    %c1_5 = arith.constant 1 : index
    %42 = memref.load %arg1[%c1_5] : memref<162xf32, #tpu.memory_space<smem>>
    %43 = vector.broadcast %42 : f32 to vector<14x128xf32>
    %44 = arith.mulf %41, %43 : vector<14x128xf32>
    %45 = arith.addf %10, %44 : vector<14x128xf32>
    %c28 = arith.constant 28 : index
    %46 = memref.load %arg1[%c28] : memref<162xf32, #tpu.memory_space<smem>>
    %47 = vector.broadcast %46 : f32 to vector<14x128xf32>
    %48 = arith.mulf %41, %47 : vector<14x128xf32>
    %49 = arith.addf %16, %48 : vector<14x128xf32>
    %c55 = arith.constant 55 : index
    %50 = memref.load %arg1[%c55] : memref<162xf32, #tpu.memory_space<smem>>
    %51 = vector.broadcast %50 : f32 to vector<14x128xf32>
    %52 = arith.mulf %41, %51 : vector<14x128xf32>
    %53 = arith.addf %22, %52 : vector<14x128xf32>
    %c82 = arith.constant 82 : index
    %54 = memref.load %arg1[%c82] : memref<162xf32, #tpu.memory_space<smem>>
    %55 = vector.broadcast %54 : f32 to vector<14x128xf32>
    %56 = arith.mulf %41, %55 : vector<14x128xf32>
    %57 = arith.addf %28, %56 : vector<14x128xf32>
    %c109 = arith.constant 109 : index
    %58 = memref.load %arg1[%c109] : memref<162xf32, #tpu.memory_space<smem>>
    %59 = vector.broadcast %58 : f32 to vector<14x128xf32>
    %60 = arith.mulf %41, %59 : vector<14x128xf32>
    %61 = arith.addf %34, %60 : vector<14x128xf32>
    %c136 = arith.constant 136 : index
    %62 = memref.load %arg1[%c136] : memref<162xf32, #tpu.memory_space<smem>>
    %63 = vector.broadcast %62 : f32 to vector<14x128xf32>
    %64 = arith.mulf %41, %63 : vector<14x128xf32>
    %65 = arith.addf %40, %64 : vector<14x128xf32>
    %66 = vector.extract_strided_slice %3 {offsets = [0, 0], sizes = [14, 128], strides = [1, 1]} : vector<16x128xf32> to vector<14x128xf32>
    %c2_6 = arith.constant 2 : index
    %67 = memref.load %arg1[%c2_6] : memref<162xf32, #tpu.memory_space<smem>>
    %68 = vector.broadcast %67 : f32 to vector<14x128xf32>
    %69 = arith.mulf %66, %68 : vector<14x128xf32>
    %70 = arith.addf %45, %69 : vector<14x128xf32>
    %c29 = arith.constant 29 : index
    %71 = memref.load %arg1[%c29] : memref<162xf32, #tpu.memory_space<smem>>
    %72 = vector.broadcast %71 : f32 to vector<14x128xf32>
    %73 = arith.mulf %66, %72 : vector<14x128xf32>
    %74 = arith.addf %49, %73 : vector<14x128xf32>
    %c56 = arith.constant 56 : index
    %75 = memref.load %arg1[%c56] : memref<162xf32, #tpu.memory_space<smem>>
    %76 = vector.broadcast %75 : f32 to vector<14x128xf32>
    %77 = arith.mulf %66, %76 : vector<14x128xf32>
    %78 = arith.addf %53, %77 : vector<14x128xf32>
    %c83 = arith.constant 83 : index
    %79 = memref.load %arg1[%c83] : memref<162xf32, #tpu.memory_space<smem>>
    %80 = vector.broadcast %79 : f32 to vector<14x128xf32>
    %81 = arith.mulf %66, %80 : vector<14x128xf32>
    %82 = arith.addf %57, %81 : vector<14x128xf32>
    %c110 = arith.constant 110 : index
    %83 = memref.load %arg1[%c110] : memref<162xf32, #tpu.memory_space<smem>>
    %84 = vector.broadcast %83 : f32 to vector<14x128xf32>
    %85 = arith.mulf %66, %84 : vector<14x128xf32>
    %86 = arith.addf %61, %85 : vector<14x128xf32>
    %c137 = arith.constant 137 : index
    %87 = memref.load %arg1[%c137] : memref<162xf32, #tpu.memory_space<smem>>
    %88 = vector.broadcast %87 : f32 to vector<14x128xf32>
    %89 = arith.mulf %66, %88 : vector<14x128xf32>
    %90 = arith.addf %65, %89 : vector<14x128xf32>
    %91 = vector.extract_strided_slice %1 {offsets = [1, 0], sizes = [14, 128], strides = [1, 1]} : vector<16x128xf32> to vector<14x128xf32>
    %c3_7 = arith.constant 3 : index
    %92 = memref.load %arg1[%c3_7] : memref<162xf32, #tpu.memory_space<smem>>
    %93 = vector.broadcast %92 : f32 to vector<14x128xf32>
    %94 = arith.mulf %91, %93 : vector<14x128xf32>
    %95 = arith.addf %70, %94 : vector<14x128xf32>
    %c30 = arith.constant 30 : index
    %96 = memref.load %arg1[%c30] : memref<162xf32, #tpu.memory_space<smem>>
    %97 = vector.broadcast %96 : f32 to vector<14x128xf32>
    %98 = arith.mulf %91, %97 : vector<14x128xf32>
    %99 = arith.addf %74, %98 : vector<14x128xf32>
    %c57 = arith.constant 57 : index
    %100 = memref.load %arg1[%c57] : memref<162xf32, #tpu.memory_space<smem>>
    %101 = vector.broadcast %100 : f32 to vector<14x128xf32>
    %102 = arith.mulf %91, %101 : vector<14x128xf32>
    %103 = arith.addf %78, %102 : vector<14x128xf32>
    %c84 = arith.constant 84 : index
    %104 = memref.load %arg1[%c84] : memref<162xf32, #tpu.memory_space<smem>>
    %105 = vector.broadcast %104 : f32 to vector<14x128xf32>
    %106 = arith.mulf %91, %105 : vector<14x128xf32>
    %107 = arith.addf %82, %106 : vector<14x128xf32>
    %c111 = arith.constant 111 : index
    %108 = memref.load %arg1[%c111] : memref<162xf32, #tpu.memory_space<smem>>
    %109 = vector.broadcast %108 : f32 to vector<14x128xf32>
    %110 = arith.mulf %91, %109 : vector<14x128xf32>
    %111 = arith.addf %86, %110 : vector<14x128xf32>
    %c138 = arith.constant 138 : index
    %112 = memref.load %arg1[%c138] : memref<162xf32, #tpu.memory_space<smem>>
    %113 = vector.broadcast %112 : f32 to vector<14x128xf32>
    %114 = arith.mulf %91, %113 : vector<14x128xf32>
    %115 = arith.addf %90, %114 : vector<14x128xf32>
    %116 = vector.extract_strided_slice %2 {offsets = [1, 0], sizes = [14, 128], strides = [1, 1]} : vector<16x128xf32> to vector<14x128xf32>
    %c4_8 = arith.constant 4 : index
    %117 = memref.load %arg1[%c4_8] : memref<162xf32, #tpu.memory_space<smem>>
    %118 = vector.broadcast %117 : f32 to vector<14x128xf32>
    %119 = arith.mulf %116, %118 : vector<14x128xf32>
    %120 = arith.addf %95, %119 : vector<14x128xf32>
    %c31 = arith.constant 31 : index
    %121 = memref.load %arg1[%c31] : memref<162xf32, #tpu.memory_space<smem>>
    %122 = vector.broadcast %121 : f32 to vector<14x128xf32>
    %123 = arith.mulf %116, %122 : vector<14x128xf32>
    %124 = arith.addf %99, %123 : vector<14x128xf32>
    %c58 = arith.constant 58 : index
    %125 = memref.load %arg1[%c58] : memref<162xf32, #tpu.memory_space<smem>>
    %126 = vector.broadcast %125 : f32 to vector<14x128xf32>
    %127 = arith.mulf %116, %126 : vector<14x128xf32>
    %128 = arith.addf %103, %127 : vector<14x128xf32>
    %c85 = arith.constant 85 : index
    %129 = memref.load %arg1[%c85] : memref<162xf32, #tpu.memory_space<smem>>
    %130 = vector.broadcast %129 : f32 to vector<14x128xf32>
    %131 = arith.mulf %116, %130 : vector<14x128xf32>
    %132 = arith.addf %107, %131 : vector<14x128xf32>
    %c112 = arith.constant 112 : index
    %133 = memref.load %arg1[%c112] : memref<162xf32, #tpu.memory_space<smem>>
    %134 = vector.broadcast %133 : f32 to vector<14x128xf32>
    %135 = arith.mulf %116, %134 : vector<14x128xf32>
    %136 = arith.addf %111, %135 : vector<14x128xf32>
    %c139 = arith.constant 139 : index
    %137 = memref.load %arg1[%c139] : memref<162xf32, #tpu.memory_space<smem>>
    %138 = vector.broadcast %137 : f32 to vector<14x128xf32>
    %139 = arith.mulf %116, %138 : vector<14x128xf32>
    %140 = arith.addf %115, %139 : vector<14x128xf32>
    %141 = vector.extract_strided_slice %3 {offsets = [1, 0], sizes = [14, 128], strides = [1, 1]} : vector<16x128xf32> to vector<14x128xf32>
    %c5_9 = arith.constant 5 : index
    %142 = memref.load %arg1[%c5_9] : memref<162xf32, #tpu.memory_space<smem>>
    %143 = vector.broadcast %142 : f32 to vector<14x128xf32>
    %144 = arith.mulf %141, %143 : vector<14x128xf32>
    %145 = arith.addf %120, %144 : vector<14x128xf32>
    %c32 = arith.constant 32 : index
    %146 = memref.load %arg1[%c32] : memref<162xf32, #tpu.memory_space<smem>>
    %147 = vector.broadcast %146 : f32 to vector<14x128xf32>
    %148 = arith.mulf %141, %147 : vector<14x128xf32>
    %149 = arith.addf %124, %148 : vector<14x128xf32>
    %c59 = arith.constant 59 : index
    %150 = memref.load %arg1[%c59] : memref<162xf32, #tpu.memory_space<smem>>
    %151 = vector.broadcast %150 : f32 to vector<14x128xf32>
    %152 = arith.mulf %141, %151 : vector<14x128xf32>
    %153 = arith.addf %128, %152 : vector<14x128xf32>
    %c86 = arith.constant 86 : index
    %154 = memref.load %arg1[%c86] : memref<162xf32, #tpu.memory_space<smem>>
    %155 = vector.broadcast %154 : f32 to vector<14x128xf32>
    %156 = arith.mulf %141, %155 : vector<14x128xf32>
    %157 = arith.addf %132, %156 : vector<14x128xf32>
    %c113 = arith.constant 113 : index
    %158 = memref.load %arg1[%c113] : memref<162xf32, #tpu.memory_space<smem>>
    %159 = vector.broadcast %158 : f32 to vector<14x128xf32>
    %160 = arith.mulf %141, %159 : vector<14x128xf32>
    %161 = arith.addf %136, %160 : vector<14x128xf32>
    %c140 = arith.constant 140 : index
    %162 = memref.load %arg1[%c140] : memref<162xf32, #tpu.memory_space<smem>>
    %163 = vector.broadcast %162 : f32 to vector<14x128xf32>
    %164 = arith.mulf %141, %163 : vector<14x128xf32>
    %165 = arith.addf %140, %164 : vector<14x128xf32>
    %166 = vector.extract_strided_slice %1 {offsets = [2, 0], sizes = [14, 128], strides = [1, 1]} : vector<16x128xf32> to vector<14x128xf32>
    %c6 = arith.constant 6 : index
    %167 = memref.load %arg1[%c6] : memref<162xf32, #tpu.memory_space<smem>>
    %168 = vector.broadcast %167 : f32 to vector<14x128xf32>
    %169 = arith.mulf %166, %168 : vector<14x128xf32>
    %170 = arith.addf %145, %169 : vector<14x128xf32>
    %c33 = arith.constant 33 : index
    %171 = memref.load %arg1[%c33] : memref<162xf32, #tpu.memory_space<smem>>
    %172 = vector.broadcast %171 : f32 to vector<14x128xf32>
    %173 = arith.mulf %166, %172 : vector<14x128xf32>
    %174 = arith.addf %149, %173 : vector<14x128xf32>
    %c60 = arith.constant 60 : index
    %175 = memref.load %arg1[%c60] : memref<162xf32, #tpu.memory_space<smem>>
    %176 = vector.broadcast %175 : f32 to vector<14x128xf32>
    %177 = arith.mulf %166, %176 : vector<14x128xf32>
    %178 = arith.addf %153, %177 : vector<14x128xf32>
    %c87 = arith.constant 87 : index
    %179 = memref.load %arg1[%c87] : memref<162xf32, #tpu.memory_space<smem>>
    %180 = vector.broadcast %179 : f32 to vector<14x128xf32>
    %181 = arith.mulf %166, %180 : vector<14x128xf32>
    %182 = arith.addf %157, %181 : vector<14x128xf32>
    %c114 = arith.constant 114 : index
    %183 = memref.load %arg1[%c114] : memref<162xf32, #tpu.memory_space<smem>>
    %184 = vector.broadcast %183 : f32 to vector<14x128xf32>
    %185 = arith.mulf %166, %184 : vector<14x128xf32>
    %186 = arith.addf %161, %185 : vector<14x128xf32>
    %c141 = arith.constant 141 : index
    %187 = memref.load %arg1[%c141] : memref<162xf32, #tpu.memory_space<smem>>
    %188 = vector.broadcast %187 : f32 to vector<14x128xf32>
    %189 = arith.mulf %166, %188 : vector<14x128xf32>
    %190 = arith.addf %165, %189 : vector<14x128xf32>
    %191 = vector.extract_strided_slice %2 {offsets = [2, 0], sizes = [14, 128], strides = [1, 1]} : vector<16x128xf32> to vector<14x128xf32>
    %c7 = arith.constant 7 : index
    %192 = memref.load %arg1[%c7] : memref<162xf32, #tpu.memory_space<smem>>
    %193 = vector.broadcast %192 : f32 to vector<14x128xf32>
    %194 = arith.mulf %191, %193 : vector<14x128xf32>
    %195 = arith.addf %170, %194 : vector<14x128xf32>
    %c34 = arith.constant 34 : index
    %196 = memref.load %arg1[%c34] : memref<162xf32, #tpu.memory_space<smem>>
    %197 = vector.broadcast %196 : f32 to vector<14x128xf32>
    %198 = arith.mulf %191, %197 : vector<14x128xf32>
    %199 = arith.addf %174, %198 : vector<14x128xf32>
    %c61 = arith.constant 61 : index
    %200 = memref.load %arg1[%c61] : memref<162xf32, #tpu.memory_space<smem>>
    %201 = vector.broadcast %200 : f32 to vector<14x128xf32>
    %202 = arith.mulf %191, %201 : vector<14x128xf32>
    %203 = arith.addf %178, %202 : vector<14x128xf32>
    %c88 = arith.constant 88 : index
    %204 = memref.load %arg1[%c88] : memref<162xf32, #tpu.memory_space<smem>>
    %205 = vector.broadcast %204 : f32 to vector<14x128xf32>
    %206 = arith.mulf %191, %205 : vector<14x128xf32>
    %207 = arith.addf %182, %206 : vector<14x128xf32>
    %c115 = arith.constant 115 : index
    %208 = memref.load %arg1[%c115] : memref<162xf32, #tpu.memory_space<smem>>
    %209 = vector.broadcast %208 : f32 to vector<14x128xf32>
    %210 = arith.mulf %191, %209 : vector<14x128xf32>
    %211 = arith.addf %186, %210 : vector<14x128xf32>
    %c142 = arith.constant 142 : index
    %212 = memref.load %arg1[%c142] : memref<162xf32, #tpu.memory_space<smem>>
    %213 = vector.broadcast %212 : f32 to vector<14x128xf32>
    %214 = arith.mulf %191, %213 : vector<14x128xf32>
    %215 = arith.addf %190, %214 : vector<14x128xf32>
    %216 = vector.extract_strided_slice %3 {offsets = [2, 0], sizes = [14, 128], strides = [1, 1]} : vector<16x128xf32> to vector<14x128xf32>
    %c8 = arith.constant 8 : index
    %217 = memref.load %arg1[%c8] : memref<162xf32, #tpu.memory_space<smem>>
    %218 = vector.broadcast %217 : f32 to vector<14x128xf32>
    %219 = arith.mulf %216, %218 : vector<14x128xf32>
    %220 = arith.addf %195, %219 : vector<14x128xf32>
    %c35 = arith.constant 35 : index
    %221 = memref.load %arg1[%c35] : memref<162xf32, #tpu.memory_space<smem>>
    %222 = vector.broadcast %221 : f32 to vector<14x128xf32>
    %223 = arith.mulf %216, %222 : vector<14x128xf32>
    %224 = arith.addf %199, %223 : vector<14x128xf32>
    %c62 = arith.constant 62 : index
    %225 = memref.load %arg1[%c62] : memref<162xf32, #tpu.memory_space<smem>>
    %226 = vector.broadcast %225 : f32 to vector<14x128xf32>
    %227 = arith.mulf %216, %226 : vector<14x128xf32>
    %228 = arith.addf %203, %227 : vector<14x128xf32>
    %c89 = arith.constant 89 : index
    %229 = memref.load %arg1[%c89] : memref<162xf32, #tpu.memory_space<smem>>
    %230 = vector.broadcast %229 : f32 to vector<14x128xf32>
    %231 = arith.mulf %216, %230 : vector<14x128xf32>
    %232 = arith.addf %207, %231 : vector<14x128xf32>
    %c116 = arith.constant 116 : index
    %233 = memref.load %arg1[%c116] : memref<162xf32, #tpu.memory_space<smem>>
    %234 = vector.broadcast %233 : f32 to vector<14x128xf32>
    %235 = arith.mulf %216, %234 : vector<14x128xf32>
    %236 = arith.addf %211, %235 : vector<14x128xf32>
    %c143 = arith.constant 143 : index
    %237 = memref.load %arg1[%c143] : memref<162xf32, #tpu.memory_space<smem>>
    %238 = vector.broadcast %237 : f32 to vector<14x128xf32>
    %239 = arith.mulf %216, %238 : vector<14x128xf32>
    %240 = arith.addf %215, %239 : vector<14x128xf32>
    %c0_10 = arith.constant 0 : index
    %c1_11 = arith.constant 1 : index
    %c0_12 = arith.constant 0 : index
    %c0_13 = arith.constant 0 : index
    %241 = vector.load %arg3[%c0_10, %c1_11, %c0_12, %c0_13] : memref<1x3x16x128xf32, #tpu.memory_space<vmem>>, vector<1x1x16x128xf32>
    %242 = vector.shape_cast %241 : vector<1x1x16x128xf32> to vector<16x128xf32>
    %c127_i32_14 = arith.constant 127 : i32
    %243 = tpu.dynamic_rotate %242 by %c127_i32_14 dim 1 : vector<16x128xf32>, i32 -> vector<16x128xf32>
    %c126_i32_15 = arith.constant 126 : i32
    %244 = tpu.dynamic_rotate %242 by %c126_i32_15 dim 1 : vector<16x128xf32>, i32 -> vector<16x128xf32>
    %245 = vector.extract_strided_slice %242 {offsets = [0, 0], sizes = [14, 128], strides = [1, 1]} : vector<16x128xf32> to vector<14x128xf32>
    %c9 = arith.constant 9 : index
    %246 = memref.load %arg1[%c9] : memref<162xf32, #tpu.memory_space<smem>>
    %247 = vector.broadcast %246 : f32 to vector<14x128xf32>
    %248 = arith.mulf %245, %247 : vector<14x128xf32>
    %249 = arith.addf %220, %248 : vector<14x128xf32>
    %c36 = arith.constant 36 : index
    %250 = memref.load %arg1[%c36] : memref<162xf32, #tpu.memory_space<smem>>
    %251 = vector.broadcast %250 : f32 to vector<14x128xf32>
    %252 = arith.mulf %245, %251 : vector<14x128xf32>
    %253 = arith.addf %224, %252 : vector<14x128xf32>
    %c63 = arith.constant 63 : index
    %254 = memref.load %arg1[%c63] : memref<162xf32, #tpu.memory_space<smem>>
    %255 = vector.broadcast %254 : f32 to vector<14x128xf32>
    %256 = arith.mulf %245, %255 : vector<14x128xf32>
    %257 = arith.addf %228, %256 : vector<14x128xf32>
    %c90 = arith.constant 90 : index
    %258 = memref.load %arg1[%c90] : memref<162xf32, #tpu.memory_space<smem>>
    %259 = vector.broadcast %258 : f32 to vector<14x128xf32>
    %260 = arith.mulf %245, %259 : vector<14x128xf32>
    %261 = arith.addf %232, %260 : vector<14x128xf32>
    %c117 = arith.constant 117 : index
    %262 = memref.load %arg1[%c117] : memref<162xf32, #tpu.memory_space<smem>>
    %263 = vector.broadcast %262 : f32 to vector<14x128xf32>
    %264 = arith.mulf %245, %263 : vector<14x128xf32>
    %265 = arith.addf %236, %264 : vector<14x128xf32>
    %c144 = arith.constant 144 : index
    %266 = memref.load %arg1[%c144] : memref<162xf32, #tpu.memory_space<smem>>
    %267 = vector.broadcast %266 : f32 to vector<14x128xf32>
    %268 = arith.mulf %245, %267 : vector<14x128xf32>
    %269 = arith.addf %240, %268 : vector<14x128xf32>
    %270 = vector.extract_strided_slice %243 {offsets = [0, 0], sizes = [14, 128], strides = [1, 1]} : vector<16x128xf32> to vector<14x128xf32>
    %c10 = arith.constant 10 : index
    %271 = memref.load %arg1[%c10] : memref<162xf32, #tpu.memory_space<smem>>
    %272 = vector.broadcast %271 : f32 to vector<14x128xf32>
    %273 = arith.mulf %270, %272 : vector<14x128xf32>
    %274 = arith.addf %249, %273 : vector<14x128xf32>
    %c37 = arith.constant 37 : index
    %275 = memref.load %arg1[%c37] : memref<162xf32, #tpu.memory_space<smem>>
    %276 = vector.broadcast %275 : f32 to vector<14x128xf32>
    %277 = arith.mulf %270, %276 : vector<14x128xf32>
    %278 = arith.addf %253, %277 : vector<14x128xf32>
    %c64 = arith.constant 64 : index
    %279 = memref.load %arg1[%c64] : memref<162xf32, #tpu.memory_space<smem>>
    %280 = vector.broadcast %279 : f32 to vector<14x128xf32>
    %281 = arith.mulf %270, %280 : vector<14x128xf32>
    %282 = arith.addf %257, %281 : vector<14x128xf32>
    %c91 = arith.constant 91 : index
    %283 = memref.load %arg1[%c91] : memref<162xf32, #tpu.memory_space<smem>>
    %284 = vector.broadcast %283 : f32 to vector<14x128xf32>
    %285 = arith.mulf %270, %284 : vector<14x128xf32>
    %286 = arith.addf %261, %285 : vector<14x128xf32>
    %c118 = arith.constant 118 : index
    %287 = memref.load %arg1[%c118] : memref<162xf32, #tpu.memory_space<smem>>
    %288 = vector.broadcast %287 : f32 to vector<14x128xf32>
    %289 = arith.mulf %270, %288 : vector<14x128xf32>
    %290 = arith.addf %265, %289 : vector<14x128xf32>
    %c145 = arith.constant 145 : index
    %291 = memref.load %arg1[%c145] : memref<162xf32, #tpu.memory_space<smem>>
    %292 = vector.broadcast %291 : f32 to vector<14x128xf32>
    %293 = arith.mulf %270, %292 : vector<14x128xf32>
    %294 = arith.addf %269, %293 : vector<14x128xf32>
    %295 = vector.extract_strided_slice %244 {offsets = [0, 0], sizes = [14, 128], strides = [1, 1]} : vector<16x128xf32> to vector<14x128xf32>
    %c11 = arith.constant 11 : index
    %296 = memref.load %arg1[%c11] : memref<162xf32, #tpu.memory_space<smem>>
    %297 = vector.broadcast %296 : f32 to vector<14x128xf32>
    %298 = arith.mulf %295, %297 : vector<14x128xf32>
    %299 = arith.addf %274, %298 : vector<14x128xf32>
    %c38 = arith.constant 38 : index
    %300 = memref.load %arg1[%c38] : memref<162xf32, #tpu.memory_space<smem>>
    %301 = vector.broadcast %300 : f32 to vector<14x128xf32>
    %302 = arith.mulf %295, %301 : vector<14x128xf32>
    %303 = arith.addf %278, %302 : vector<14x128xf32>
    %c65 = arith.constant 65 : index
    %304 = memref.load %arg1[%c65] : memref<162xf32, #tpu.memory_space<smem>>
    %305 = vector.broadcast %304 : f32 to vector<14x128xf32>
    %306 = arith.mulf %295, %305 : vector<14x128xf32>
    %307 = arith.addf %282, %306 : vector<14x128xf32>
    %c92 = arith.constant 92 : index
    %308 = memref.load %arg1[%c92] : memref<162xf32, #tpu.memory_space<smem>>
    %309 = vector.broadcast %308 : f32 to vector<14x128xf32>
    %310 = arith.mulf %295, %309 : vector<14x128xf32>
    %311 = arith.addf %286, %310 : vector<14x128xf32>
    %c119 = arith.constant 119 : index
    %312 = memref.load %arg1[%c119] : memref<162xf32, #tpu.memory_space<smem>>
    %313 = vector.broadcast %312 : f32 to vector<14x128xf32>
    %314 = arith.mulf %295, %313 : vector<14x128xf32>
    %315 = arith.addf %290, %314 : vector<14x128xf32>
    %c146 = arith.constant 146 : index
    %316 = memref.load %arg1[%c146] : memref<162xf32, #tpu.memory_space<smem>>
    %317 = vector.broadcast %316 : f32 to vector<14x128xf32>
    %318 = arith.mulf %295, %317 : vector<14x128xf32>
    %319 = arith.addf %294, %318 : vector<14x128xf32>
    %320 = vector.extract_strided_slice %242 {offsets = [1, 0], sizes = [14, 128], strides = [1, 1]} : vector<16x128xf32> to vector<14x128xf32>
    %c12 = arith.constant 12 : index
    %321 = memref.load %arg1[%c12] : memref<162xf32, #tpu.memory_space<smem>>
    %322 = vector.broadcast %321 : f32 to vector<14x128xf32>
    %323 = arith.mulf %320, %322 : vector<14x128xf32>
    %324 = arith.addf %299, %323 : vector<14x128xf32>
    %c39 = arith.constant 39 : index
    %325 = memref.load %arg1[%c39] : memref<162xf32, #tpu.memory_space<smem>>
    %326 = vector.broadcast %325 : f32 to vector<14x128xf32>
    %327 = arith.mulf %320, %326 : vector<14x128xf32>
    %328 = arith.addf %303, %327 : vector<14x128xf32>
    %c66 = arith.constant 66 : index
    %329 = memref.load %arg1[%c66] : memref<162xf32, #tpu.memory_space<smem>>
    %330 = vector.broadcast %329 : f32 to vector<14x128xf32>
    %331 = arith.mulf %320, %330 : vector<14x128xf32>
    %332 = arith.addf %307, %331 : vector<14x128xf32>
    %c93 = arith.constant 93 : index
    %333 = memref.load %arg1[%c93] : memref<162xf32, #tpu.memory_space<smem>>
    %334 = vector.broadcast %333 : f32 to vector<14x128xf32>
    %335 = arith.mulf %320, %334 : vector<14x128xf32>
    %336 = arith.addf %311, %335 : vector<14x128xf32>
    %c120 = arith.constant 120 : index
    %337 = memref.load %arg1[%c120] : memref<162xf32, #tpu.memory_space<smem>>
    %338 = vector.broadcast %337 : f32 to vector<14x128xf32>
    %339 = arith.mulf %320, %338 : vector<14x128xf32>
    %340 = arith.addf %315, %339 : vector<14x128xf32>
    %c147 = arith.constant 147 : index
    %341 = memref.load %arg1[%c147] : memref<162xf32, #tpu.memory_space<smem>>
    %342 = vector.broadcast %341 : f32 to vector<14x128xf32>
    %343 = arith.mulf %320, %342 : vector<14x128xf32>
    %344 = arith.addf %319, %343 : vector<14x128xf32>
    %345 = vector.extract_strided_slice %243 {offsets = [1, 0], sizes = [14, 128], strides = [1, 1]} : vector<16x128xf32> to vector<14x128xf32>
    %c13 = arith.constant 13 : index
    %346 = memref.load %arg1[%c13] : memref<162xf32, #tpu.memory_space<smem>>
    %347 = vector.broadcast %346 : f32 to vector<14x128xf32>
    %348 = arith.mulf %345, %347 : vector<14x128xf32>
    %349 = arith.addf %324, %348 : vector<14x128xf32>
    %c40 = arith.constant 40 : index
    %350 = memref.load %arg1[%c40] : memref<162xf32, #tpu.memory_space<smem>>
    %351 = vector.broadcast %350 : f32 to vector<14x128xf32>
    %352 = arith.mulf %345, %351 : vector<14x128xf32>
    %353 = arith.addf %328, %352 : vector<14x128xf32>
    %c67 = arith.constant 67 : index
    %354 = memref.load %arg1[%c67] : memref<162xf32, #tpu.memory_space<smem>>
    %355 = vector.broadcast %354 : f32 to vector<14x128xf32>
    %356 = arith.mulf %345, %355 : vector<14x128xf32>
    %357 = arith.addf %332, %356 : vector<14x128xf32>
    %c94 = arith.constant 94 : index
    %358 = memref.load %arg1[%c94] : memref<162xf32, #tpu.memory_space<smem>>
    %359 = vector.broadcast %358 : f32 to vector<14x128xf32>
    %360 = arith.mulf %345, %359 : vector<14x128xf32>
    %361 = arith.addf %336, %360 : vector<14x128xf32>
    %c121 = arith.constant 121 : index
    %362 = memref.load %arg1[%c121] : memref<162xf32, #tpu.memory_space<smem>>
    %363 = vector.broadcast %362 : f32 to vector<14x128xf32>
    %364 = arith.mulf %345, %363 : vector<14x128xf32>
    %365 = arith.addf %340, %364 : vector<14x128xf32>
    %c148 = arith.constant 148 : index
    %366 = memref.load %arg1[%c148] : memref<162xf32, #tpu.memory_space<smem>>
    %367 = vector.broadcast %366 : f32 to vector<14x128xf32>
    %368 = arith.mulf %345, %367 : vector<14x128xf32>
    %369 = arith.addf %344, %368 : vector<14x128xf32>
    %370 = vector.extract_strided_slice %244 {offsets = [1, 0], sizes = [14, 128], strides = [1, 1]} : vector<16x128xf32> to vector<14x128xf32>
    %c14 = arith.constant 14 : index
    %371 = memref.load %arg1[%c14] : memref<162xf32, #tpu.memory_space<smem>>
    %372 = vector.broadcast %371 : f32 to vector<14x128xf32>
    %373 = arith.mulf %370, %372 : vector<14x128xf32>
    %374 = arith.addf %349, %373 : vector<14x128xf32>
    %c41 = arith.constant 41 : index
    %375 = memref.load %arg1[%c41] : memref<162xf32, #tpu.memory_space<smem>>
    %376 = vector.broadcast %375 : f32 to vector<14x128xf32>
    %377 = arith.mulf %370, %376 : vector<14x128xf32>
    %378 = arith.addf %353, %377 : vector<14x128xf32>
    %c68 = arith.constant 68 : index
    %379 = memref.load %arg1[%c68] : memref<162xf32, #tpu.memory_space<smem>>
    %380 = vector.broadcast %379 : f32 to vector<14x128xf32>
    %381 = arith.mulf %370, %380 : vector<14x128xf32>
    %382 = arith.addf %357, %381 : vector<14x128xf32>
    %c95 = arith.constant 95 : index
    %383 = memref.load %arg1[%c95] : memref<162xf32, #tpu.memory_space<smem>>
    %384 = vector.broadcast %383 : f32 to vector<14x128xf32>
    %385 = arith.mulf %370, %384 : vector<14x128xf32>
    %386 = arith.addf %361, %385 : vector<14x128xf32>
    %c122 = arith.constant 122 : index
    %387 = memref.load %arg1[%c122] : memref<162xf32, #tpu.memory_space<smem>>
    %388 = vector.broadcast %387 : f32 to vector<14x128xf32>
    %389 = arith.mulf %370, %388 : vector<14x128xf32>
    %390 = arith.addf %365, %389 : vector<14x128xf32>
    %c149 = arith.constant 149 : index
    %391 = memref.load %arg1[%c149] : memref<162xf32, #tpu.memory_space<smem>>
    %392 = vector.broadcast %391 : f32 to vector<14x128xf32>
    %393 = arith.mulf %370, %392 : vector<14x128xf32>
    %394 = arith.addf %369, %393 : vector<14x128xf32>
    %395 = vector.extract_strided_slice %242 {offsets = [2, 0], sizes = [14, 128], strides = [1, 1]} : vector<16x128xf32> to vector<14x128xf32>
    %c15 = arith.constant 15 : index
    %396 = memref.load %arg1[%c15] : memref<162xf32, #tpu.memory_space<smem>>
    %397 = vector.broadcast %396 : f32 to vector<14x128xf32>
    %398 = arith.mulf %395, %397 : vector<14x128xf32>
    %399 = arith.addf %374, %398 : vector<14x128xf32>
    %c42 = arith.constant 42 : index
    %400 = memref.load %arg1[%c42] : memref<162xf32, #tpu.memory_space<smem>>
    %401 = vector.broadcast %400 : f32 to vector<14x128xf32>
    %402 = arith.mulf %395, %401 : vector<14x128xf32>
    %403 = arith.addf %378, %402 : vector<14x128xf32>
    %c69 = arith.constant 69 : index
    %404 = memref.load %arg1[%c69] : memref<162xf32, #tpu.memory_space<smem>>
    %405 = vector.broadcast %404 : f32 to vector<14x128xf32>
    %406 = arith.mulf %395, %405 : vector<14x128xf32>
    %407 = arith.addf %382, %406 : vector<14x128xf32>
    %c96 = arith.constant 96 : index
    %408 = memref.load %arg1[%c96] : memref<162xf32, #tpu.memory_space<smem>>
    %409 = vector.broadcast %408 : f32 to vector<14x128xf32>
    %410 = arith.mulf %395, %409 : vector<14x128xf32>
    %411 = arith.addf %386, %410 : vector<14x128xf32>
    %c123 = arith.constant 123 : index
    %412 = memref.load %arg1[%c123] : memref<162xf32, #tpu.memory_space<smem>>
    %413 = vector.broadcast %412 : f32 to vector<14x128xf32>
    %414 = arith.mulf %395, %413 : vector<14x128xf32>
    %415 = arith.addf %390, %414 : vector<14x128xf32>
    %c150 = arith.constant 150 : index
    %416 = memref.load %arg1[%c150] : memref<162xf32, #tpu.memory_space<smem>>
    %417 = vector.broadcast %416 : f32 to vector<14x128xf32>
    %418 = arith.mulf %395, %417 : vector<14x128xf32>
    %419 = arith.addf %394, %418 : vector<14x128xf32>
    %420 = vector.extract_strided_slice %243 {offsets = [2, 0], sizes = [14, 128], strides = [1, 1]} : vector<16x128xf32> to vector<14x128xf32>
    %c16 = arith.constant 16 : index
    %421 = memref.load %arg1[%c16] : memref<162xf32, #tpu.memory_space<smem>>
    %422 = vector.broadcast %421 : f32 to vector<14x128xf32>
    %423 = arith.mulf %420, %422 : vector<14x128xf32>
    %424 = arith.addf %399, %423 : vector<14x128xf32>
    %c43 = arith.constant 43 : index
    %425 = memref.load %arg1[%c43] : memref<162xf32, #tpu.memory_space<smem>>
    %426 = vector.broadcast %425 : f32 to vector<14x128xf32>
    %427 = arith.mulf %420, %426 : vector<14x128xf32>
    %428 = arith.addf %403, %427 : vector<14x128xf32>
    %c70 = arith.constant 70 : index
    %429 = memref.load %arg1[%c70] : memref<162xf32, #tpu.memory_space<smem>>
    %430 = vector.broadcast %429 : f32 to vector<14x128xf32>
    %431 = arith.mulf %420, %430 : vector<14x128xf32>
    %432 = arith.addf %407, %431 : vector<14x128xf32>
    %c97 = arith.constant 97 : index
    %433 = memref.load %arg1[%c97] : memref<162xf32, #tpu.memory_space<smem>>
    %434 = vector.broadcast %433 : f32 to vector<14x128xf32>
    %435 = arith.mulf %420, %434 : vector<14x128xf32>
    %436 = arith.addf %411, %435 : vector<14x128xf32>
    %c124 = arith.constant 124 : index
    %437 = memref.load %arg1[%c124] : memref<162xf32, #tpu.memory_space<smem>>
    %438 = vector.broadcast %437 : f32 to vector<14x128xf32>
    %439 = arith.mulf %420, %438 : vector<14x128xf32>
    %440 = arith.addf %415, %439 : vector<14x128xf32>
    %c151 = arith.constant 151 : index
    %441 = memref.load %arg1[%c151] : memref<162xf32, #tpu.memory_space<smem>>
    %442 = vector.broadcast %441 : f32 to vector<14x128xf32>
    %443 = arith.mulf %420, %442 : vector<14x128xf32>
    %444 = arith.addf %419, %443 : vector<14x128xf32>
    %445 = vector.extract_strided_slice %244 {offsets = [2, 0], sizes = [14, 128], strides = [1, 1]} : vector<16x128xf32> to vector<14x128xf32>
    %c17 = arith.constant 17 : index
    %446 = memref.load %arg1[%c17] : memref<162xf32, #tpu.memory_space<smem>>
    %447 = vector.broadcast %446 : f32 to vector<14x128xf32>
    %448 = arith.mulf %445, %447 : vector<14x128xf32>
    %449 = arith.addf %424, %448 : vector<14x128xf32>
    %c44 = arith.constant 44 : index
    %450 = memref.load %arg1[%c44] : memref<162xf32, #tpu.memory_space<smem>>
    %451 = vector.broadcast %450 : f32 to vector<14x128xf32>
    %452 = arith.mulf %445, %451 : vector<14x128xf32>
    %453 = arith.addf %428, %452 : vector<14x128xf32>
    %c71 = arith.constant 71 : index
    %454 = memref.load %arg1[%c71] : memref<162xf32, #tpu.memory_space<smem>>
    %455 = vector.broadcast %454 : f32 to vector<14x128xf32>
    %456 = arith.mulf %445, %455 : vector<14x128xf32>
    %457 = arith.addf %432, %456 : vector<14x128xf32>
    %c98 = arith.constant 98 : index
    %458 = memref.load %arg1[%c98] : memref<162xf32, #tpu.memory_space<smem>>
    %459 = vector.broadcast %458 : f32 to vector<14x128xf32>
    %460 = arith.mulf %445, %459 : vector<14x128xf32>
    %461 = arith.addf %436, %460 : vector<14x128xf32>
    %c125 = arith.constant 125 : index
    %462 = memref.load %arg1[%c125] : memref<162xf32, #tpu.memory_space<smem>>
    %463 = vector.broadcast %462 : f32 to vector<14x128xf32>
    %464 = arith.mulf %445, %463 : vector<14x128xf32>
    %465 = arith.addf %440, %464 : vector<14x128xf32>
    %c152 = arith.constant 152 : index
    %466 = memref.load %arg1[%c152] : memref<162xf32, #tpu.memory_space<smem>>
    %467 = vector.broadcast %466 : f32 to vector<14x128xf32>
    %468 = arith.mulf %445, %467 : vector<14x128xf32>
    %469 = arith.addf %444, %468 : vector<14x128xf32>
    %c0_16 = arith.constant 0 : index
    %c2_17 = arith.constant 2 : index
    %c0_18 = arith.constant 0 : index
    %c0_19 = arith.constant 0 : index
    %470 = vector.load %arg3[%c0_16, %c2_17, %c0_18, %c0_19] : memref<1x3x16x128xf32, #tpu.memory_space<vmem>>, vector<1x1x16x128xf32>
    %471 = vector.shape_cast %470 : vector<1x1x16x128xf32> to vector<16x128xf32>
    %c127_i32_20 = arith.constant 127 : i32
    %472 = tpu.dynamic_rotate %471 by %c127_i32_20 dim 1 : vector<16x128xf32>, i32 -> vector<16x128xf32>
    %c126_i32_21 = arith.constant 126 : i32
    %473 = tpu.dynamic_rotate %471 by %c126_i32_21 dim 1 : vector<16x128xf32>, i32 -> vector<16x128xf32>
    %474 = vector.extract_strided_slice %471 {offsets = [0, 0], sizes = [14, 128], strides = [1, 1]} : vector<16x128xf32> to vector<14x128xf32>
    %c18 = arith.constant 18 : index
    %475 = memref.load %arg1[%c18] : memref<162xf32, #tpu.memory_space<smem>>
    %476 = vector.broadcast %475 : f32 to vector<14x128xf32>
    %477 = arith.mulf %474, %476 : vector<14x128xf32>
    %478 = arith.addf %449, %477 : vector<14x128xf32>
    %c45 = arith.constant 45 : index
    %479 = memref.load %arg1[%c45] : memref<162xf32, #tpu.memory_space<smem>>
    %480 = vector.broadcast %479 : f32 to vector<14x128xf32>
    %481 = arith.mulf %474, %480 : vector<14x128xf32>
    %482 = arith.addf %453, %481 : vector<14x128xf32>
    %c72 = arith.constant 72 : index
    %483 = memref.load %arg1[%c72] : memref<162xf32, #tpu.memory_space<smem>>
    %484 = vector.broadcast %483 : f32 to vector<14x128xf32>
    %485 = arith.mulf %474, %484 : vector<14x128xf32>
    %486 = arith.addf %457, %485 : vector<14x128xf32>
    %c99 = arith.constant 99 : index
    %487 = memref.load %arg1[%c99] : memref<162xf32, #tpu.memory_space<smem>>
    %488 = vector.broadcast %487 : f32 to vector<14x128xf32>
    %489 = arith.mulf %474, %488 : vector<14x128xf32>
    %490 = arith.addf %461, %489 : vector<14x128xf32>
    %c126 = arith.constant 126 : index
    %491 = memref.load %arg1[%c126] : memref<162xf32, #tpu.memory_space<smem>>
    %492 = vector.broadcast %491 : f32 to vector<14x128xf32>
    %493 = arith.mulf %474, %492 : vector<14x128xf32>
    %494 = arith.addf %465, %493 : vector<14x128xf32>
    %c153 = arith.constant 153 : index
    %495 = memref.load %arg1[%c153] : memref<162xf32, #tpu.memory_space<smem>>
    %496 = vector.broadcast %495 : f32 to vector<14x128xf32>
    %497 = arith.mulf %474, %496 : vector<14x128xf32>
    %498 = arith.addf %469, %497 : vector<14x128xf32>
    %499 = vector.extract_strided_slice %472 {offsets = [0, 0], sizes = [14, 128], strides = [1, 1]} : vector<16x128xf32> to vector<14x128xf32>
    %c19 = arith.constant 19 : index
    %500 = memref.load %arg1[%c19] : memref<162xf32, #tpu.memory_space<smem>>
    %501 = vector.broadcast %500 : f32 to vector<14x128xf32>
    %502 = arith.mulf %499, %501 : vector<14x128xf32>
    %503 = arith.addf %478, %502 : vector<14x128xf32>
    %c46 = arith.constant 46 : index
    %504 = memref.load %arg1[%c46] : memref<162xf32, #tpu.memory_space<smem>>
    %505 = vector.broadcast %504 : f32 to vector<14x128xf32>
    %506 = arith.mulf %499, %505 : vector<14x128xf32>
    %507 = arith.addf %482, %506 : vector<14x128xf32>
    %c73 = arith.constant 73 : index
    %508 = memref.load %arg1[%c73] : memref<162xf32, #tpu.memory_space<smem>>
    %509 = vector.broadcast %508 : f32 to vector<14x128xf32>
    %510 = arith.mulf %499, %509 : vector<14x128xf32>
    %511 = arith.addf %486, %510 : vector<14x128xf32>
    %c100 = arith.constant 100 : index
    %512 = memref.load %arg1[%c100] : memref<162xf32, #tpu.memory_space<smem>>
    %513 = vector.broadcast %512 : f32 to vector<14x128xf32>
    %514 = arith.mulf %499, %513 : vector<14x128xf32>
    %515 = arith.addf %490, %514 : vector<14x128xf32>
    %c127 = arith.constant 127 : index
    %516 = memref.load %arg1[%c127] : memref<162xf32, #tpu.memory_space<smem>>
    %517 = vector.broadcast %516 : f32 to vector<14x128xf32>
    %518 = arith.mulf %499, %517 : vector<14x128xf32>
    %519 = arith.addf %494, %518 : vector<14x128xf32>
    %c154 = arith.constant 154 : index
    %520 = memref.load %arg1[%c154] : memref<162xf32, #tpu.memory_space<smem>>
    %521 = vector.broadcast %520 : f32 to vector<14x128xf32>
    %522 = arith.mulf %499, %521 : vector<14x128xf32>
    %523 = arith.addf %498, %522 : vector<14x128xf32>
    %524 = vector.extract_strided_slice %473 {offsets = [0, 0], sizes = [14, 128], strides = [1, 1]} : vector<16x128xf32> to vector<14x128xf32>
    %c20 = arith.constant 20 : index
    %525 = memref.load %arg1[%c20] : memref<162xf32, #tpu.memory_space<smem>>
    %526 = vector.broadcast %525 : f32 to vector<14x128xf32>
    %527 = arith.mulf %524, %526 : vector<14x128xf32>
    %528 = arith.addf %503, %527 : vector<14x128xf32>
    %c47 = arith.constant 47 : index
    %529 = memref.load %arg1[%c47] : memref<162xf32, #tpu.memory_space<smem>>
    %530 = vector.broadcast %529 : f32 to vector<14x128xf32>
    %531 = arith.mulf %524, %530 : vector<14x128xf32>
    %532 = arith.addf %507, %531 : vector<14x128xf32>
    %c74 = arith.constant 74 : index
    %533 = memref.load %arg1[%c74] : memref<162xf32, #tpu.memory_space<smem>>
    %534 = vector.broadcast %533 : f32 to vector<14x128xf32>
    %535 = arith.mulf %524, %534 : vector<14x128xf32>
    %536 = arith.addf %511, %535 : vector<14x128xf32>
    %c101 = arith.constant 101 : index
    %537 = memref.load %arg1[%c101] : memref<162xf32, #tpu.memory_space<smem>>
    %538 = vector.broadcast %537 : f32 to vector<14x128xf32>
    %539 = arith.mulf %524, %538 : vector<14x128xf32>
    %540 = arith.addf %515, %539 : vector<14x128xf32>
    %c128 = arith.constant 128 : index
    %541 = memref.load %arg1[%c128] : memref<162xf32, #tpu.memory_space<smem>>
    %542 = vector.broadcast %541 : f32 to vector<14x128xf32>
    %543 = arith.mulf %524, %542 : vector<14x128xf32>
    %544 = arith.addf %519, %543 : vector<14x128xf32>
    %c155 = arith.constant 155 : index
    %545 = memref.load %arg1[%c155] : memref<162xf32, #tpu.memory_space<smem>>
    %546 = vector.broadcast %545 : f32 to vector<14x128xf32>
    %547 = arith.mulf %524, %546 : vector<14x128xf32>
    %548 = arith.addf %523, %547 : vector<14x128xf32>
    %549 = vector.extract_strided_slice %471 {offsets = [1, 0], sizes = [14, 128], strides = [1, 1]} : vector<16x128xf32> to vector<14x128xf32>
    %c21 = arith.constant 21 : index
    %550 = memref.load %arg1[%c21] : memref<162xf32, #tpu.memory_space<smem>>
    %551 = vector.broadcast %550 : f32 to vector<14x128xf32>
    %552 = arith.mulf %549, %551 : vector<14x128xf32>
    %553 = arith.addf %528, %552 : vector<14x128xf32>
    %c48 = arith.constant 48 : index
    %554 = memref.load %arg1[%c48] : memref<162xf32, #tpu.memory_space<smem>>
    %555 = vector.broadcast %554 : f32 to vector<14x128xf32>
    %556 = arith.mulf %549, %555 : vector<14x128xf32>
    %557 = arith.addf %532, %556 : vector<14x128xf32>
    %c75 = arith.constant 75 : index
    %558 = memref.load %arg1[%c75] : memref<162xf32, #tpu.memory_space<smem>>
    %559 = vector.broadcast %558 : f32 to vector<14x128xf32>
    %560 = arith.mulf %549, %559 : vector<14x128xf32>
    %561 = arith.addf %536, %560 : vector<14x128xf32>
    %c102 = arith.constant 102 : index
    %562 = memref.load %arg1[%c102] : memref<162xf32, #tpu.memory_space<smem>>
    %563 = vector.broadcast %562 : f32 to vector<14x128xf32>
    %564 = arith.mulf %549, %563 : vector<14x128xf32>
    %565 = arith.addf %540, %564 : vector<14x128xf32>
    %c129 = arith.constant 129 : index
    %566 = memref.load %arg1[%c129] : memref<162xf32, #tpu.memory_space<smem>>
    %567 = vector.broadcast %566 : f32 to vector<14x128xf32>
    %568 = arith.mulf %549, %567 : vector<14x128xf32>
    %569 = arith.addf %544, %568 : vector<14x128xf32>
    %c156 = arith.constant 156 : index
    %570 = memref.load %arg1[%c156] : memref<162xf32, #tpu.memory_space<smem>>
    %571 = vector.broadcast %570 : f32 to vector<14x128xf32>
    %572 = arith.mulf %549, %571 : vector<14x128xf32>
    %573 = arith.addf %548, %572 : vector<14x128xf32>
    %574 = vector.extract_strided_slice %472 {offsets = [1, 0], sizes = [14, 128], strides = [1, 1]} : vector<16x128xf32> to vector<14x128xf32>
    %c22 = arith.constant 22 : index
    %575 = memref.load %arg1[%c22] : memref<162xf32, #tpu.memory_space<smem>>
    %576 = vector.broadcast %575 : f32 to vector<14x128xf32>
    %577 = arith.mulf %574, %576 : vector<14x128xf32>
    %578 = arith.addf %553, %577 : vector<14x128xf32>
    %c49 = arith.constant 49 : index
    %579 = memref.load %arg1[%c49] : memref<162xf32, #tpu.memory_space<smem>>
    %580 = vector.broadcast %579 : f32 to vector<14x128xf32>
    %581 = arith.mulf %574, %580 : vector<14x128xf32>
    %582 = arith.addf %557, %581 : vector<14x128xf32>
    %c76 = arith.constant 76 : index
    %583 = memref.load %arg1[%c76] : memref<162xf32, #tpu.memory_space<smem>>
    %584 = vector.broadcast %583 : f32 to vector<14x128xf32>
    %585 = arith.mulf %574, %584 : vector<14x128xf32>
    %586 = arith.addf %561, %585 : vector<14x128xf32>
    %c103 = arith.constant 103 : index
    %587 = memref.load %arg1[%c103] : memref<162xf32, #tpu.memory_space<smem>>
    %588 = vector.broadcast %587 : f32 to vector<14x128xf32>
    %589 = arith.mulf %574, %588 : vector<14x128xf32>
    %590 = arith.addf %565, %589 : vector<14x128xf32>
    %c130 = arith.constant 130 : index
    %591 = memref.load %arg1[%c130] : memref<162xf32, #tpu.memory_space<smem>>
    %592 = vector.broadcast %591 : f32 to vector<14x128xf32>
    %593 = arith.mulf %574, %592 : vector<14x128xf32>
    %594 = arith.addf %569, %593 : vector<14x128xf32>
    %c157 = arith.constant 157 : index
    %595 = memref.load %arg1[%c157] : memref<162xf32, #tpu.memory_space<smem>>
    %596 = vector.broadcast %595 : f32 to vector<14x128xf32>
    %597 = arith.mulf %574, %596 : vector<14x128xf32>
    %598 = arith.addf %573, %597 : vector<14x128xf32>
    %599 = vector.extract_strided_slice %473 {offsets = [1, 0], sizes = [14, 128], strides = [1, 1]} : vector<16x128xf32> to vector<14x128xf32>
    %c23 = arith.constant 23 : index
    %600 = memref.load %arg1[%c23] : memref<162xf32, #tpu.memory_space<smem>>
    %601 = vector.broadcast %600 : f32 to vector<14x128xf32>
    %602 = arith.mulf %599, %601 : vector<14x128xf32>
    %603 = arith.addf %578, %602 : vector<14x128xf32>
    %c50 = arith.constant 50 : index
    %604 = memref.load %arg1[%c50] : memref<162xf32, #tpu.memory_space<smem>>
    %605 = vector.broadcast %604 : f32 to vector<14x128xf32>
    %606 = arith.mulf %599, %605 : vector<14x128xf32>
    %607 = arith.addf %582, %606 : vector<14x128xf32>
    %c77 = arith.constant 77 : index
    %608 = memref.load %arg1[%c77] : memref<162xf32, #tpu.memory_space<smem>>
    %609 = vector.broadcast %608 : f32 to vector<14x128xf32>
    %610 = arith.mulf %599, %609 : vector<14x128xf32>
    %611 = arith.addf %586, %610 : vector<14x128xf32>
    %c104 = arith.constant 104 : index
    %612 = memref.load %arg1[%c104] : memref<162xf32, #tpu.memory_space<smem>>
    %613 = vector.broadcast %612 : f32 to vector<14x128xf32>
    %614 = arith.mulf %599, %613 : vector<14x128xf32>
    %615 = arith.addf %590, %614 : vector<14x128xf32>
    %c131 = arith.constant 131 : index
    %616 = memref.load %arg1[%c131] : memref<162xf32, #tpu.memory_space<smem>>
    %617 = vector.broadcast %616 : f32 to vector<14x128xf32>
    %618 = arith.mulf %599, %617 : vector<14x128xf32>
    %619 = arith.addf %594, %618 : vector<14x128xf32>
    %c158 = arith.constant 158 : index
    %620 = memref.load %arg1[%c158] : memref<162xf32, #tpu.memory_space<smem>>
    %621 = vector.broadcast %620 : f32 to vector<14x128xf32>
    %622 = arith.mulf %599, %621 : vector<14x128xf32>
    %623 = arith.addf %598, %622 : vector<14x128xf32>
    %624 = vector.extract_strided_slice %471 {offsets = [2, 0], sizes = [14, 128], strides = [1, 1]} : vector<16x128xf32> to vector<14x128xf32>
    %c24 = arith.constant 24 : index
    %625 = memref.load %arg1[%c24] : memref<162xf32, #tpu.memory_space<smem>>
    %626 = vector.broadcast %625 : f32 to vector<14x128xf32>
    %627 = arith.mulf %624, %626 : vector<14x128xf32>
    %628 = arith.addf %603, %627 : vector<14x128xf32>
    %c51 = arith.constant 51 : index
    %629 = memref.load %arg1[%c51] : memref<162xf32, #tpu.memory_space<smem>>
    %630 = vector.broadcast %629 : f32 to vector<14x128xf32>
    %631 = arith.mulf %624, %630 : vector<14x128xf32>
    %632 = arith.addf %607, %631 : vector<14x128xf32>
    %c78 = arith.constant 78 : index
    %633 = memref.load %arg1[%c78] : memref<162xf32, #tpu.memory_space<smem>>
    %634 = vector.broadcast %633 : f32 to vector<14x128xf32>
    %635 = arith.mulf %624, %634 : vector<14x128xf32>
    %636 = arith.addf %611, %635 : vector<14x128xf32>
    %c105 = arith.constant 105 : index
    %637 = memref.load %arg1[%c105] : memref<162xf32, #tpu.memory_space<smem>>
    %638 = vector.broadcast %637 : f32 to vector<14x128xf32>
    %639 = arith.mulf %624, %638 : vector<14x128xf32>
    %640 = arith.addf %615, %639 : vector<14x128xf32>
    %c132 = arith.constant 132 : index
    %641 = memref.load %arg1[%c132] : memref<162xf32, #tpu.memory_space<smem>>
    %642 = vector.broadcast %641 : f32 to vector<14x128xf32>
    %643 = arith.mulf %624, %642 : vector<14x128xf32>
    %644 = arith.addf %619, %643 : vector<14x128xf32>
    %c159 = arith.constant 159 : index
    %645 = memref.load %arg1[%c159] : memref<162xf32, #tpu.memory_space<smem>>
    %646 = vector.broadcast %645 : f32 to vector<14x128xf32>
    %647 = arith.mulf %624, %646 : vector<14x128xf32>
    %648 = arith.addf %623, %647 : vector<14x128xf32>
    %649 = vector.extract_strided_slice %472 {offsets = [2, 0], sizes = [14, 128], strides = [1, 1]} : vector<16x128xf32> to vector<14x128xf32>
    %c25 = arith.constant 25 : index
    %650 = memref.load %arg1[%c25] : memref<162xf32, #tpu.memory_space<smem>>
    %651 = vector.broadcast %650 : f32 to vector<14x128xf32>
    %652 = arith.mulf %649, %651 : vector<14x128xf32>
    %653 = arith.addf %628, %652 : vector<14x128xf32>
    %c52 = arith.constant 52 : index
    %654 = memref.load %arg1[%c52] : memref<162xf32, #tpu.memory_space<smem>>
    %655 = vector.broadcast %654 : f32 to vector<14x128xf32>
    %656 = arith.mulf %649, %655 : vector<14x128xf32>
    %657 = arith.addf %632, %656 : vector<14x128xf32>
    %c79 = arith.constant 79 : index
    %658 = memref.load %arg1[%c79] : memref<162xf32, #tpu.memory_space<smem>>
    %659 = vector.broadcast %658 : f32 to vector<14x128xf32>
    %660 = arith.mulf %649, %659 : vector<14x128xf32>
    %661 = arith.addf %636, %660 : vector<14x128xf32>
    %c106 = arith.constant 106 : index
    %662 = memref.load %arg1[%c106] : memref<162xf32, #tpu.memory_space<smem>>
    %663 = vector.broadcast %662 : f32 to vector<14x128xf32>
    %664 = arith.mulf %649, %663 : vector<14x128xf32>
    %665 = arith.addf %640, %664 : vector<14x128xf32>
    %c133 = arith.constant 133 : index
    %666 = memref.load %arg1[%c133] : memref<162xf32, #tpu.memory_space<smem>>
    %667 = vector.broadcast %666 : f32 to vector<14x128xf32>
    %668 = arith.mulf %649, %667 : vector<14x128xf32>
    %669 = arith.addf %644, %668 : vector<14x128xf32>
    %c160 = arith.constant 160 : index
    %670 = memref.load %arg1[%c160] : memref<162xf32, #tpu.memory_space<smem>>
    %671 = vector.broadcast %670 : f32 to vector<14x128xf32>
    %672 = arith.mulf %649, %671 : vector<14x128xf32>
    %673 = arith.addf %648, %672 : vector<14x128xf32>
    %674 = vector.extract_strided_slice %473 {offsets = [2, 0], sizes = [14, 128], strides = [1, 1]} : vector<16x128xf32> to vector<14x128xf32>
    %c26 = arith.constant 26 : index
    %675 = memref.load %arg1[%c26] : memref<162xf32, #tpu.memory_space<smem>>
    %676 = vector.broadcast %675 : f32 to vector<14x128xf32>
    %677 = arith.mulf %674, %676 : vector<14x128xf32>
    %678 = arith.addf %653, %677 : vector<14x128xf32>
    %c53 = arith.constant 53 : index
    %679 = memref.load %arg1[%c53] : memref<162xf32, #tpu.memory_space<smem>>
    %680 = vector.broadcast %679 : f32 to vector<14x128xf32>
    %681 = arith.mulf %674, %680 : vector<14x128xf32>
    %682 = arith.addf %657, %681 : vector<14x128xf32>
    %c80 = arith.constant 80 : index
    %683 = memref.load %arg1[%c80] : memref<162xf32, #tpu.memory_space<smem>>
    %684 = vector.broadcast %683 : f32 to vector<14x128xf32>
    %685 = arith.mulf %674, %684 : vector<14x128xf32>
    %686 = arith.addf %661, %685 : vector<14x128xf32>
    %c107 = arith.constant 107 : index
    %687 = memref.load %arg1[%c107] : memref<162xf32, #tpu.memory_space<smem>>
    %688 = vector.broadcast %687 : f32 to vector<14x128xf32>
    %689 = arith.mulf %674, %688 : vector<14x128xf32>
    %690 = arith.addf %665, %689 : vector<14x128xf32>
    %c134 = arith.constant 134 : index
    %691 = memref.load %arg1[%c134] : memref<162xf32, #tpu.memory_space<smem>>
    %692 = vector.broadcast %691 : f32 to vector<14x128xf32>
    %693 = arith.mulf %674, %692 : vector<14x128xf32>
    %694 = arith.addf %669, %693 : vector<14x128xf32>
    %c161 = arith.constant 161 : index
    %695 = memref.load %arg1[%c161] : memref<162xf32, #tpu.memory_space<smem>>
    %696 = vector.broadcast %695 : f32 to vector<14x128xf32>
    %697 = arith.mulf %674, %696 : vector<14x128xf32>
    %698 = arith.addf %673, %697 : vector<14x128xf32>
    %c0_22 = arith.constant 0 : index
    %c0_23 = arith.constant 0 : index
    %c0_24 = arith.constant 0 : index
    %c0_25 = arith.constant 0 : index
    %699 = vector.load %arg4[%c0_22, %c0_23, %c0_24, %c0_25] : memref<1x6x14x128xf32, #tpu.memory_space<vmem>>, vector<1x1x14x128xf32>
    %700 = vector.shape_cast %699 : vector<1x1x14x128xf32> to vector<14x128xf32>
    %701 = vector.shape_cast %678 : vector<14x128xf32> to vector<1x1x14x128xf32>
    tpu.vector_store %arg4[%c0_22, %c0_23, %c0_24, %c0_25], %701 {strides = array<i32>} : memref<1x6x14x128xf32, #tpu.memory_space<vmem>>, vector<1x1x14x128xf32>,
    %c0_26 = arith.constant 0 : index
    %c1_27 = arith.constant 1 : index
    %c0_28 = arith.constant 0 : index
    %c0_29 = arith.constant 0 : index
    %702 = vector.load %arg4[%c0_26, %c1_27, %c0_28, %c0_29] : memref<1x6x14x128xf32, #tpu.memory_space<vmem>>, vector<1x1x14x128xf32>
    %703 = vector.shape_cast %702 : vector<1x1x14x128xf32> to vector<14x128xf32>
    %704 = vector.shape_cast %682 : vector<14x128xf32> to vector<1x1x14x128xf32>
    tpu.vector_store %arg4[%c0_26, %c1_27, %c0_28, %c0_29], %704 {strides = array<i32>} : memref<1x6x14x128xf32, #tpu.memory_space<vmem>>, vector<1x1x14x128xf32>,
    %c0_30 = arith.constant 0 : index
    %c2_31 = arith.constant 2 : index
    %c0_32 = arith.constant 0 : index
    %c0_33 = arith.constant 0 : index
    %705 = vector.load %arg4[%c0_30, %c2_31, %c0_32, %c0_33] : memref<1x6x14x128xf32, #tpu.memory_space<vmem>>, vector<1x1x14x128xf32>
    %706 = vector.shape_cast %705 : vector<1x1x14x128xf32> to vector<14x128xf32>
    %707 = vector.shape_cast %686 : vector<14x128xf32> to vector<1x1x14x128xf32>
    tpu.vector_store %arg4[%c0_30, %c2_31, %c0_32, %c0_33], %707 {strides = array<i32>} : memref<1x6x14x128xf32, #tpu.memory_space<vmem>>, vector<1x1x14x128xf32>,
    %c0_34 = arith.constant 0 : index
    %c3_35 = arith.constant 3 : index
    %c0_36 = arith.constant 0 : index
    %c0_37 = arith.constant 0 : index
    %708 = vector.load %arg4[%c0_34, %c3_35, %c0_36, %c0_37] : memref<1x6x14x128xf32, #tpu.memory_space<vmem>>, vector<1x1x14x128xf32>
    %709 = vector.shape_cast %708 : vector<1x1x14x128xf32> to vector<14x128xf32>
    %710 = vector.shape_cast %690 : vector<14x128xf32> to vector<1x1x14x128xf32>
    tpu.vector_store %arg4[%c0_34, %c3_35, %c0_36, %c0_37], %710 {strides = array<i32>} : memref<1x6x14x128xf32, #tpu.memory_space<vmem>>, vector<1x1x14x128xf32>,
    %c0_38 = arith.constant 0 : index
    %c4_39 = arith.constant 4 : index
    %c0_40 = arith.constant 0 : index
    %c0_41 = arith.constant 0 : index
    %711 = vector.load %arg4[%c0_38, %c4_39, %c0_40, %c0_41] : memref<1x6x14x128xf32, #tpu.memory_space<vmem>>, vector<1x1x14x128xf32>
    %712 = vector.shape_cast %711 : vector<1x1x14x128xf32> to vector<14x128xf32>
    %713 = vector.shape_cast %694 : vector<14x128xf32> to vector<1x1x14x128xf32>
    tpu.vector_store %arg4[%c0_38, %c4_39, %c0_40, %c0_41], %713 {strides = array<i32>} : memref<1x6x14x128xf32, #tpu.memory_space<vmem>>, vector<1x1x14x128xf32>,
    %c0_42 = arith.constant 0 : index
    %c5_43 = arith.constant 5 : index
    %c0_44 = arith.constant 0 : index
    %c0_45 = arith.constant 0 : index
    %714 = vector.load %arg4[%c0_42, %c5_43, %c0_44, %c0_45] : memref<1x6x14x128xf32, #tpu.memory_space<vmem>>, vector<1x1x14x128xf32>
    %715 = vector.shape_cast %714 : vector<1x1x14x128xf32> to vector<14x128xf32>
    %716 = vector.shape_cast %698 : vector<14x128xf32> to vector<1x1x14x128xf32>
    tpu.vector_store %arg4[%c0_42, %c5_43, %c0_44, %c0_45], %716 {strides = array<i32>} : memref<1x6x14x128xf32, #tpu.memory_space<vmem>>, vector<1x1x14x128xf32>,
    return
  }
  func.func @transform_0(%arg0: i32, %arg1: memref<162xf32, #tpu.memory_space<smem>>, %arg2: memref<6xf32, #tpu.memory_space<smem>>) -> (i32, i32, i32, i32) {
    %c0_i32 = arith.constant 0 : i32
    %c0_i32_0 = arith.constant 0 : i32
    %c0_i32_1 = arith.constant 0 : i32
    %c0_i32_2 = arith.constant 0 : i32
    return %arg0, %c0_i32, %c0_i32_0, %c0_i32_1 : i32, i32, i32, i32
  }
  func.func @transform_1(%arg0: i32, %arg1: memref<162xf32, #tpu.memory_space<smem>>, %arg2: memref<6xf32, #tpu.memory_space<smem>>) -> (i32, i32, i32, i32) {
    %c0_i32 = arith.constant 0 : i32
    %c0_i32_0 = arith.constant 0 : i32
    %c0_i32_1 = arith.constant 0 : i32
    %c0_i32_2 = arith.constant 0 : i32
    return %arg0, %c0_i32, %c0_i32_0, %c0_i32_1 : i32, i32, i32, i32
  }
}

</mosaic_0001>

<bundles_post_ra>
// kernel: tpu_custom_call.1
= control target key start
LH: loop header
LB: loop body
LE: loop exit
PB: predicated region body
PF: predicated region fallthrough
CT: control target
= control target key end

     0   :  { %s2059_s12 = smov [#allocation3]   ;;  %s4782_s0 = inlined_call_operand.hbm [shape: f32[162], index: 0, kind: input, shape index: {}]   ;;  %s4783_s2 = inlined_call_operand.hbm [shape: f32[1,3,16,128], index: 2, kind: input, shape index: {}]   ;;  %s4784_s3 = inlined_call_operand.vmem [shape: f32[1,6,14,128], index: 3, kind: output, shape index: {}]   ;;  %s4785_s1 = inlined_call_operand.vmem [shape: f32[6], index: 1, kind: input, shape index: {}]  }
   0x1   :  { %5021 = sst [smem:[#allocation135_spill]] %s4784_s3  ;;  %s10_s17 = sshll.u32 %s4785_s1, 4  ;;  %s11_s17 = int_to_ptr.vmem [resolvable:$true] %s10_s17 }
   0x2   :  { %9 = dma.hbm_to_smem %s4782_s0, 32, %s2059_s12, [#allocation2] }
   0x3   :  { %s2023_s18 = scalar_lea.vmem %s11_s17, 16  ;;  %p2028_p1 = scmp.lt.s32.totalorder %s11_s17, %s11_s17 }
   0x4   :  { %p2024_p0 = scmp.ne.s32.totalorder %s11_s17, %s2023_s18  ;;  %p2029_p2 = scmp.lt.s32.totalorder %s2023_s18, %s2023_s18 }
   0x6   :  { %p2030_p3 = por %p2029_p2, %p2028_p1 }
   0x8   :  { %p2031_p4 = pnand %p2030_p3, %p2024_p0 }
   0xa   :  { %2034 = shalt.err (!%p2031_p4)  }
   0xb   :  { %s2060_s19 = smov [#allocation4]  }
   0xc   :  { %13 = dma.vmem_to_smem %s11_s17, 16, %s2060_s19, [#allocation2] }
   0xd   :  { %2055 = dma.done.wait [#allocation2], 48 }
   0xe   :  { %2056 = vsyncadd [#allocation2], 4294967248 }
   0xf   :  { %15 = sfence }
  0x10   :  { %16 = vsyncpa [#allocation6], 0  ;;  %s2061_s20 = smov [#allocation5]  }
  0x11   :  { %s22_s0 = sshll.u32 %s2061_s20, 4  ;;  %s23_s0 = int_to_ptr.vmem [resolvable:$true] %s22_s0 }
  0x12   :  { %s2043_s21 = scalar_lea.vmem %s23_s0, 768  ;;  %p2048_p6 = scmp.lt.s32.totalorder %s23_s0, %s23_s0 }
  0x13   :  { %p2044_p5 = scmp.ne.s32.totalorder %s23_s0, %s2043_s21  ;;  %p2049_p7 = scmp.lt.s32.totalorder %s2043_s21, %s2043_s21 }
  0x15   :  { %p2050_p8 = por %p2049_p7, %p2048_p6 }
  0x17   :  { %p2051_p9 = pnand %p2050_p8, %p2044_p5 }
  0x19   :  { %2054 = shalt.err (!%p2051_p9)
}
  0x1a   :  { %s2062_s1 = smov 128   ;;  %s2063_s22 = smov 8  }
  0x1b   :  { %28 = dma.hbm_to_vmem [thread:$0]  %s4783_s2, 768, %s23_s0, [#allocation6], %s2062_s1, %s2062_s1, %s2063_s22  }
  0x1c   :  { %2057 = dma.done.wait [#allocation6], 768  }
  0x1d   :  { %2058 = vsyncadd [#allocation6], 4294966528  ;;  %s2095_s25 = sld [smem:[#allocation3 + $0x2]]  ;;  %v2107_v0 = vld [vmem:[#allocation5] sm:$0xff]  ;;  %s2064_s5 = smov 126   ;;  %v2116_v1 = vld [vmem:[#allocation5 + $0x8] sm:$0xff] }
  0x1e   :  { %s2097_s26 = sld [smem:[#allocation3 + $0x1d]]  ;;  %38 = vrot.lane.b32.xlu1 %v2107_v0, %s2064_s5  ;;  %s2065_s2 = smov 127   ;;  %v2129_v2 = vld [vmem:[#allocation5 + $0x10] sm:$0xff]  ;;  %v2131_v3 = vld [vmem:[#allocation5 + $0x18] sm:$0xff]  ;;  %v1220_v4 = vld [vmem:[#allocation5 + $0x20] sm:$0xff]  ;;  %vm168_vm0 = vcmask 1046528  }
  0x1f   :  { %s2099_s27 = sld [smem:[#allocation3 + $0x38]]  ;;  %34 = vrot.lane.b32.xlu0 %v2107_v0, %s2065_s2  ;;  %v1221_v5 = vld [vmem:[#allocation5 + $0x28] sm:$0xff]  ;;  %vm403_vm1 = vcmask 1045504  }
  0x20   :  { %s2101_s28 = sld [smem:[#allocation3 + $0x53]] }
  0x21   :  { %s2103_s29 = sld [smem:[#allocation3 + $0x6e]] }
  0x22   :  { %s2105_s30 = sld [smem:[#allocation3 + $0x89]]  ;;  %40 = vrot.lane.b32.xlu1 %v2116_v1, %s2064_s5 }
  0x23   :  { %5022 = sst [smem:[#allocation9_spill]] %s2095_s25  ;;  %36 = vrot.lane.b32.xlu0 %v2116_v1, %s2065_s2 }
  0x24   :  { %5023 = sst [smem:[#allocation10_spill]] %s2097_s26 }
  0x25   :  { %5024 = sst [smem:[#allocation11_spill]] %s2099_s27 }
  0x26   :  { %5025 = sst [smem:[#allocation12_spill]] %s2101_s28  ;;  %637 = vrot.lane.b32.xlu1 %v2131_v3, %s2065_s2 }
  0x27   :  { %5026 = sst [smem:[#allocation13_spill]] %s2103_s29  ;;  %635 = vrot.lane.b32.xlu0 %v2129_v2, %s2065_s2 }
  0x28   :  { %5027 = sst [smem:[#allocation14_spill]] %s2105_s30 }
  0x29   :  { %s2109_s4 = sld [smem:[#allocation3 + $0x5]] }
  0x2a   :  { %s2114_s6 = sld [smem:[#allocation3 + $0x20]]  ;;  %641 = vrot.lane.b32.xlu1 %v2131_v3, %s2064_s5 }
  0x2b   :  { %s2118_s7 = sld [smem:[#allocation3 + $0x3b]]  ;;  %639 = vrot.lane.b32.xlu0 %v2129_v2, %s2064_s5 }
  0x2c   :  { %s2120_s8 = sld [smem:[#allocation3 + $0x56]] }
  0x2d   :  { %s2122_s9 = sld [smem:[#allocation3 + $0x71]] }
  0x2e   :  { %s2127_s10 = sld [smem:[#allocation3 + $0x8c]]  ;;  %1224 = vrot.lane.b32.xlu1 %v1221_v5, %s2065_s2 }
  0x2f   :  { %5028 = sst [smem:[#allocation15_spill]] %s2109_s4  ;;  %1222 = vrot.lane.b32.xlu0 %v1220_v4, %s2065_s2 }
  0x30   :  { %5029 = sst [smem:[#allocation16_spill]] %s2114_s6 }
  0x31   :  { %5030 = sst [smem:[#allocation17_spill]] %s2118_s7 }
  0x32   :  { %5031 = sst [smem:[#allocation18_spill]] %s2120_s8  ;;  %1228 = vrot.lane.b32.xlu1 %v1221_v5, %s2064_s5 }
  0x33   :  { %5032 = sst [smem:[#allocation19_spill]] %s2122_s9  ;;  %1226 = vrot.lane.b32.xlu0 %v1220_v4, %s2064_s5 }
  0x34   :  { %5033 = sst [smem:[#allocation20_spill]] %s2127_s10 }
  0x35   :  { %s2133_s11 = sld [smem:[#allocation3 + $0x8]] }
  0x36   :  { %s2135_s12 = sld [smem:[#allocation3 + $0x23]] }
  0x37   :  { %s2137_s13 = sld [smem:[#allocation3 + $0x3e]] }
  0x38   :  { %s2141_s14 = sld [smem:[#allocation3 + $0x59]] }
  0x39   :  { %s2143_s15 = sld [smem:[#allocation3 + $0x74]] }
  0x3a   :  { %s2145_s16 = sld [smem:[#allocation3 + $0x8f]] }
  0x3b   :  { %5034 = sst [smem:[#allocation21_spill]] %s2133_s11 }
  0x3c   :  { %5035 = sst [smem:[#allocation22_spill]] %s2135_s12 }
  0x3d   :  { %5036 = sst [smem:[#allocation23_spill]] %s2137_s13 }
  0x3e   :  { %5037 = sst [smem:[#allocation24_spill]] %s2141_s14 }
  0x3f   :  { %5038 = sst [smem:[#allocation25_spill]] %s2143_s15 }
  0x40   :  { %5039 = sst [smem:[#allocation26_spill]] %s2145_s16 }
  0x41   :  { %s2147_s17 = sld [smem:[#allocation3]] }
  0x42   :  { %s2153_s18 = sld [smem:[#allocation4]] }
  0x43   :  { %s2155_s19 = sld [smem:[#allocation3 + $0x1b]] }
  0x44   :  { %s2157_s20 = sld [smem:[#allocation4 + $0x1]] }
  0x45   :  { %s2159_s0 = sld [smem:[#allocation3 + $0x36]] }
  0x46   :  { %s2161_s21 = sld [smem:[#allocation4 + $0x2]] }
  0x47   :  { %s2163_s1 = sld [smem:[#allocation3 + $0x51]] }
  0x48   :  { %5040 = sst [smem:[#allocation27_spill]] %s2153_s18 }
  0x49   :  { %s2165_s22 = sld [smem:[#allocation4 + $0x3]] }
  0x4a   :  { %5041 = sst [smem:[#allocation28_spill]] %s2157_s20 }
  0x4b   :  { %5042 = sst [smem:[#allocation29_spill]] %s2159_s0 }
  0x4c   :  { %5043 = sst [smem:[#allocation30_spill]] %s2161_s21 }
  0x4d   :  { %5044 = sst [smem:[#allocation31_spill]] %s2163_s1 }
  0x4e   :  { %s2167_s23 = sld [smem:[#allocation3 + $0x6c]] }
  0x4f   :  { %5045 = sst [smem:[#allocation32_spill]] %s2165_s22 }
  0x50   :  { %s2171_s24 = sld [smem:[#allocation4 + $0x4]] }
  0x51   :  { %s2173_s3 = sld [smem:[#allocation3 + $0x87]] }
  0x52   :  { %s2175_s16 = sld [smem:[#allocation4 + $0x5]] }
  0x53   :  { %s2177_s20 = sld [smem:[#allocation3 + $0x1]] }
  0x54   :  { %5046 = sst [smem:[#allocation33_spill]] %s2167_s23 }
  0x55   :  { %s2179_s2 = sld [smem:[#allocation3 + $0x1c]] }
  0x56   :  { %5047 = sst [smem:[#allocation34_spill]] %s2171_s24 }
  0x57   :  { %s2181_s21 = sld [smem:[#allocation3 + $0x37]] }
  0x58   :  { %5048 = sst [smem:[#allocation35_spill]] %s2175_s16 }
  0x59   :  { %5049 = sst [smem:[#allocation36_spill]] %s2177_s20 }
  0x5a   :  { %s2183_s18 = sld [smem:[#allocation3 + $0x52]] }
  0x5b   :  { %5050 = sst [smem:[#allocation37_spill]] %s2179_s2 }
  0x5c   :  { %s2185_s22 = sld [smem:[#allocation3 + $0x6d]] }
  0x5d   :  { %5051 = sst [smem:[#allocation38_spill]] %s2181_s21 }
  0x5e   :  { %s2187_s23 = sld [smem:[#allocation3 + $0x88]] }
  0x5f   :  { %s1850_s1 = sld [smem:[#allocation3 + $0x3]] }
  0x60   :  { %5052 = sst [smem:[#allocation39_spill]] %s2183_s18 }
  0x61   :  { %s1851_s5 = sld [smem:[#allocation3 + $0x1e]] }
  0x62   :  { %5053 = sst [smem:[#allocation40_spill]] %s2185_s22 }
  0x63   :  { %s2189_s0 = sld [smem:[#allocation3 + $0x39]] }
  0x64   :  { %5054 = sst [smem:[#allocation41_spill]] %s2187_s23 }
  0x65   :  { %s2191_s24 = sld [smem:[#allocation3 + $0x54]]  ;;  %v163_v6 = vstv %s1850_s1 }
  0x66   :  { %s2193_s16 = sld [smem:[#allocation3 + $0x6f]]  ;;  %v2200_v7 = vmul.f32 %v163_v6, %v2116_v1  ;;  %v164_v9 = vmul.f32 %v163_v6, %v2107_v0 }
  0x67   :  { %s2195_s20 = sld [smem:[#allocation3 + $0x8a]]  ;;  %v177_v8 = vstv %s1851_s5 }
  0x68   :  { %s2197_s21 = sld [smem:[#allocation3 + $0x4]]  ;;  %v2206_v10 = vmul.f32 %v177_v8, %v2116_v1  ;;  %v178_v12 = vmul.f32 %v177_v8, %v2107_v0  ;;  %v4842_v13 = vrot.slane %v2200_v7, 1  ;;  %v169_v16 = vrot.slane %v164_v9, 1 }
  0x69   :  { %s2202_s23 = sld [smem:[#allocation3 + $0x1f]]  ;;  %v190_v11 = vstv %s2189_s0 }
  0x6a   :  { %s2209_s22 = sld [smem:[#allocation3 + $0x3a]]  ;;  %v2214_v14 = vmul.f32 %v190_v11, %v2116_v1  ;;  %v4841_v17 = vrot.slane %v2206_v10, 1  ;;  %v182_v20 = vrot.slane %v178_v12, 1  ;;  %v2235_v23 = vsel %vm168_vm0, %v169_v16, %v4842_v13 }
  0x6b   :  { %v203_v15 = vstv %s2191_s24  ;;  %s2217_s1 = sld [smem:[#allocation3 + $0x55]]  ;;  %v191_v28 = vmul.f32 %v190_v11, %v2107_v0 }
  0x6c   :  { %v2221_v18 = vmul.f32 %v203_v15, %v2116_v1  ;;  %v216_v19 = vstv %s2193_s16  ;;  %s2224_s0 = sld [smem:[#allocation3 + $0x70]]  ;;  %v2245_v25 = vsel %vm168_vm0, %v182_v20, %v4841_v17  ;;  %v4840_v26 = vrot.slane %v2214_v14, 1 }
  0x6d   :  { %v2227_v21 = vmul.f32 %v216_v19, %v2116_v1  ;;  %v229_v22 = vstv %s2195_s20  ;;  %s2230_s5 = sld [smem:[#allocation3 + $0x8b]]  ;;  %v204_v29 = vmul.f32 %v203_v15, %v2107_v0  ;;  %v217_v32 = vmul.f32 %v216_v19, %v2107_v0 }
  0x6e   :  { %5055 = sst [smem:[#allocation42_spill]] %s2197_s21  ;;  %v2238_v24 = vmul.f32 %v229_v22, %v2116_v1  ;;  %v4839_v27 = vrot.slane %v2221_v18, 1  ;;  %v230_v33 = vmul.f32 %v229_v22, %v2107_v0  ;;  %v195_v34 = vrot.slane %v191_v28, 1 }
  0x6f   :  { %5056 = sst [smem:[#allocation43_spill]] %s2202_s23  ;;  %v4838_v30 = vrot.slane %v2227_v21, 1  ;;  %v208_v35 = vrot.slane %v204_v29, 1  ;;  %v221_v36 = vrot.slane %v217_v32, 1 }
  0x70   :  { %5057 = sst [smem:[#allocation44_spill]] %s2209_s22  ;;  %v4837_v31 = vrot.slane %v2238_v24, 1  ;;  %v234_v37 = vrot.slane %v230_v33, 1  ;;  %v2268_v38 = vsel %vm168_vm0, %v195_v34, %v4840_v26 }
  0x71   :  { %5058 = sst [smem:[#allocation45_spill]] %s2217_s1  ;;  %v2273_v39 = vsel %vm168_vm0, %v208_v35, %v4839_v27  ;;  %v2278_v40 = vsel %vm168_vm0, %v221_v36, %v4838_v30 }
  0x72   :  { %5059 = sst [smem:[#allocation46_spill]] %s2224_s0  ;;  %v2283_v41 = vsel %vm168_vm0, %v234_v37, %v4837_v31 }
  0x73   :  { %5060 = sst [smem:[#allocation47_spill]] %s2230_s5 }
  0x74   :  { %s2240_s24 = sld [smem:[#allocation3 + $0x7]] }
  0x75   :  { %s2249_s16 = sld [smem:[#allocation3 + $0x22]] }
  0x76   :  { %s2255_s20 = sld [smem:[#allocation3 + $0x3d]] }
  0x77   :  { %s2261_s5 = sld [smem:[#allocation3 + $0x73]] }
  0x78   :  { %s2289_s0 = sld [smem:[#allocation3 + $0x72]] }
  0x79   :  { %s2291_s1 = sld [smem:[#allocation3 + $0x8d]] }
  0x7a   :  { %5061 = sst [smem:[#allocation48_spill]] %s2240_s24 }
  0x7b   :  { %5062 = sst [smem:[#allocation49_spill]] %s2249_s16 }
  0x7c   :  { %5063 = sst [smem:[#allocation50_spill]] %s2255_s20 }
  0x7d   :  { %s2259_s24 = sld [smem:[#allocation3 + $0x58]] }
  0x7e   :  { %5065 = sst [smem:[#allocation52_spill]] %s2261_s5  ;;  %v451_v55 = vstv %s2289_s0 }
  0x7f   :  { %s2263_s16 = sld [smem:[#allocation3 + $0x8e]]  ;;  %v2324_v58 = vmul.f32 %v451_v55, %v2116_v1  ;;  %v464_v59 = vstv %s2291_s1  ;;  %v452_v8 = vmul.f32 %v451_v55, %v2107_v0 }
  0x80   :  { %s1869_s5 = sld [smem:[#allocation3 + $0x21]]  ;;  %v2336_v62 = vmul.f32 %v464_v59, %v2116_v1  ;;  %v465_v9 = vmul.f32 %v464_v59, %v2107_v0 }
  0x81   :  { %s2287_s20 = sld [smem:[#allocation3 + $0x57]]  ;;  %5076 = vst [vmem:[#allocation63_spill] sm:$0xff] %v2324_v58  ;;  %v4832_v5 = vrot.slane %v2324_v58, 2  ;;  %v456_v16 = vrot.slane %v452_v8, 2  ;;  %v5251_v58 = vstv %s2183_s18 }
  0x82   :  { %s2293_s22 = sld [smem:[#allocation3 + $0x9]]  ;;  %5078 = vst [vmem:[#allocation65_spill] sm:$0xff] %v2336_v62  ;;  %v4829_v11 = vrot.slane %v2336_v62, 2  ;;  %v469_v19 = vrot.slane %v465_v9, 2 }
  0x83   :  { %5064 = sst [smem:[#allocation51_spill]] %s2259_s24  ;;  %v2372_v28 = vsel %vm403_vm1, %v456_v16, %v4832_v5 }
  0x84   :  { %s2285_s24 = sld [smem:[#allocation3 + $0x3c]]  ;;  %5087 = vst [vmem:[#allocation74_spill] sm:$0xff] %v2372_v28  ;;  %v2377_v29 = vsel %vm403_vm1, %v469_v19, %v4829_v11 }
  0x85   :  { %5066 = sst [smem:[#allocation53_spill]] %s2263_s16  ;;  %5088 = vst [vmem:[#allocation75_spill] sm:$0xff] %v2377_v29 }
  0x86   :  { %s1868_s16 = sld [smem:[#allocation3 + $0x6]]  ;;  %v412_v44 = vstv %s1869_s5 }
  0x87   :  { %s2299_s23 = sld [smem:[#allocation3 + $0x24]]  ;;  %v2302_v46 = vmul.f32 %v412_v44, %v2116_v1  ;;  %v413_v48 = vmul.f32 %v412_v44, %v2107_v0  ;;  %v438_v51 = vstv %s2287_s20 }
  0x88   :  { %5067 = sst [smem:[#allocation54_spill]] %s2293_s22  ;;  %v2317_v54 = vmul.f32 %v438_v51, %v2116_v1  ;;  %v439_v6 = vmul.f32 %v438_v51, %v2107_v0 }
  0x89   :  { %5070 = vst [vmem:[#allocation57_spill] sm:$0xff] %v2302_v46  ;;  %s2313_s5 = sld [smem:[#allocation3 + $0x5a]]  ;;  %v4835_v53 = vrot.slane %v2302_v46, 2  ;;  %v417_v56 = vrot.slane %v413_v48, 2 }
  0x8a   :  { %v425_v47 = vstv %s2285_s24  ;;  %5074 = vst [vmem:[#allocation61_spill] sm:$0xff] %v2317_v54  ;;  %s2320_s24 = sld [smem:[#allocation3 + $0x75]]  ;;  %v4833_v61 = vrot.slane %v2317_v54, 2  ;;  %v443_v15 = vrot.slane %v439_v6, 2 }
  0x8b   :  { %v2310_v50 = vmul.f32 %v425_v47, %v2116_v1  ;;  %s2332_s20 = sld [smem:[#allocation3 + $0x90]]  ;;  %v2341_v63 = vsel %vm403_vm1, %v417_v56, %v4835_v53  ;;  %v426_v4 = vmul.f32 %v425_v47, %v2107_v0 }
  0x8c   :  { %v398_v42 = vstv %s1868_s16  ;;  %s2306_s16 = sld [smem:[#allocation3 + $0x3f]]  ;;  %5079 = vst [vmem:[#allocation66_spill] sm:$0xff] %v2341_v63  ;;  %v2367_v22 = vsel %vm403_vm1, %v443_v15, %v4833_v61  ;;  %v83_v61 = vstv %s2173_s3 }
  0x8d   :  { %v2296_v43 = vmul.f32 %v398_v42, %v2116_v1  ;;  %v399_v45 = vmul.f32 %v398_v42, %v2107_v0  ;;  %5069 = sst [smem:[#allocation56_spill]] %s2299_s23  ;;  %5072 = vst [vmem:[#allocation59_spill] sm:$0xff] %v2310_v50  ;;  %v4834_v57 = vrot.slane %v2310_v50, 2  ;;  %v430_v12 = vrot.slane %v426_v4, 2  ;;  %5086 = vst [vmem:[#allocation73_spill] sm:$0xff] %v2367_v22 }
  0x8e   :  { %s2344_s1 = sld [smem:[#allocation3 + $0xa]]  ;;  %v51_v4 = vstv %s2155_s19  ;;  %v84_v6 = vmul.f32 %v83_v61, %v2107_v0  ;;  %v85_v59 = vmul.f32 %v83_v61, %v2116_v1 }
  0x8f   :  { %5068 = vst [vmem:[#allocation55_spill] sm:$0xff] %v2296_v43  ;;  %v4836_v49 = vrot.slane %v2296_v43, 2  ;;  %v404_v52 = vrot.slane %v399_v45, 2  ;;  %5073 = sst [smem:[#allocation60_spill]] %s2313_s5  ;;  %v2360_v20 = vsel %vm403_vm1, %v430_v12, %v4834_v57  ;;  %v52_v57 = vmul.f32 %v51_v4, %v2107_v0 }
  0x90   :  { %5075 = sst [smem:[#allocation62_spill]] %s2320_s24  ;;  %5084 = vst [vmem:[#allocation71_spill] sm:$0xff] %v2360_v20  ;;  %v53_v53 = vmul.f32 %v51_v4, %v2116_v1 }
  0x91   :  { %v2330_v60 = vsel %vm403_vm1, %v404_v52, %v4836_v49  ;;  %5077 = sst [smem:[#allocation64_spill]] %s2332_s20  ;;  %v43_v52 = vstv %s2147_s17 }
  0x92   :  { %5071 = sst [smem:[#allocation58_spill]] %s2306_s16  ;;  %v44_v19 = vmul.f32 %v43_v52, %v2107_v0  ;;  %v45_v11 = vmul.f32 %v43_v52, %v2116_v1 }
  0x93   :  { %s2350_s0 = sld [smem:[#allocation3 + $0x25]] }
  0x94   :  { %5080 = sst [smem:[#allocation67_spill]] %s2344_s1 }
  0x95   :  { %s2353_s20 = sld [smem:[#allocation3 + $0x40]] }
  0x96   :  { %s2355_s1 = sld [smem:[#allocation3 + $0x5b]] }
  0x97   :  { %s2362_s24 = sld [smem:[#allocation3 + $0x76]] }
  0x98   :  { %s2387_s5 = sld [smem:[#allocation3 + $0x5e]] }
  0x99   :  { %5081 = sst [smem:[#allocation68_spill]] %s2350_s0 }
  0x9a   :  { %s2385_s0 = sld [smem:[#allocation3 + $0x43]] }
  0x9b   :  { %5082 = sst [smem:[#allocation69_spill]] %s2353_s20 }
  0x9c   :  { %5083 = sst [smem:[#allocation70_spill]] %s2355_s1 }
  0x9d   :  { %5085 = sst [smem:[#allocation72_spill]] %s2362_s24 }
  0x9e   :  { %s2379_s1 = sld [smem:[#allocation3 + $0x91]] }
  0x9f   :  { %s2381_s24 = sld [smem:[#allocation3 + $0xd]] }
  0xa0   :  { %s2383_s20 = sld [smem:[#allocation3 + $0x28]] }
  0xa1   :  { %5092 = sst [smem:[#allocation79_spill]] %s2385_s0 }
  0xa2   :  { %5093 = sst [smem:[#allocation80_spill]] %s2387_s5 }
  0xa3   :  { %s2389_s16 = sld [smem:[#allocation3 + $0x79]] }
  0xa4   :  { %5089 = sst [smem:[#allocation76_spill]] %s2379_s1 }
  0xa5   :  { %5090 = sst [smem:[#allocation77_spill]] %s2381_s24 }
  0xa6   :  { %5091 = sst [smem:[#allocation78_spill]] %s2383_s20 }
  0xa7   :  { %s2391_s23 = sld [smem:[#allocation3 + $0x94]] }
  0xa8   :  { %s2393_s22 = sld [smem:[#allocation3 + $0x10]] }
  0xa9   :  { %5094 = sst [smem:[#allocation81_spill]] %s2389_s16 }
  0xaa   :  { %s2396_s24 = sld [smem:[#allocation3 + $0x2b]] }
  0xab   :  { %s2402_s5 = sld [smem:[#allocation3 + $0x46]] }
  0xac   :  { %s2408_s25 = sld [smem:[#allocation3 + $0x61]] }
  0xad   :  { %5095 = sst [smem:[#allocation82_spill]] %s2391_s23 }
  0xae   :  { %5096 = sst [smem:[#allocation83_spill]] %s2393_s22 }
  0xaf   :  { %s5099_s23 = sld [smem:[#allocation29_spill]] }
  0xb0   :  { %5097 = sst [smem:[#allocation84_spill]] %s2396_s24 }
  0xb1   :  { %5098 = sst [smem:[#allocation85_spill]] %s2402_s5 }
  0xb2   :  { %s5100_s22 = sld [smem:[#allocation31_spill]] }
  0xb3   :  { %5101 = sst [smem:[#allocation29_spill]] %s2408_s25 }
  0xb4   :  { %s5102_s24 = sld [smem:[#allocation27_spill]] }
  0xb5   :  { %s5103_s26 = sld [smem:[#allocation33_spill]]  ;;  %v59_v9 = vstv %s5099_s23 }
  0xb6   :  { %s2414_s28 = sld [smem:[#allocation3 + $0x7c]]  ;;  %v60_v31 = vmul.f32 %v59_v9, %v2107_v0  ;;  %v61_v52 = vmul.f32 %v59_v9, %v2116_v1 }
  0xb7   :  { %s5105_s29 = sld [smem:[#allocation28_spill]] }
  0xb8   :  { %s2420_s30 = sld [smem:[#allocation3 + $0x97]]  ;;  %v67_v12 = vstv %s5100_s22 }
  0xb9   :  { %s5107_s6 = sld [smem:[#allocation30_spill]]  ;;  %v68_v30 = vmul.f32 %v67_v12, %v2107_v0  ;;  %v69_v17 = vmul.f32 %v67_v12, %v2116_v1 }
  0xba   :  { %s2426_s8 = sld [smem:[#allocation3 + $0xb]]  ;;  %v47_v15 = vstv %s5102_s24 }
  0xbb   :  { %s5109_s9 = sld [smem:[#allocation32_spill]]  ;;  %v75_v16 = vstv %s5103_s26  ;;  %v2459_v37 = vadd.f32 %v47_v15, %v44_v19  ;;  %v2463_v12 = vadd.f32 %v47_v15, %v45_v11 }
  0xbc   :  { %5104 = sst [smem:[#allocation31_spill]] %s2414_s28  ;;  %v76_v26 = vmul.f32 %v75_v16, %v2107_v0  ;;  %v77_v13 = vmul.f32 %v75_v16, %v2116_v1 }
  0xbd   :  { %s2432_s17 = sld [smem:[#allocation3 + $0x26]]  ;;  %v55_v5 = vstv %s5105_s29 }
  0xbe   :  { %5106 = sst [smem:[#allocation27_spill]] %s2420_s30  ;;  %v2461_v56 = vadd.f32 %v55_v5, %v52_v57  ;;  %v2471_v1 = vadd.f32 %v55_v5, %v53_v53 }
  0xbf   :  { %s5112_s19 = sld [smem:[#allocation34_spill]]  ;;  %v63_v49 = vstv %s5107_s6 }
  0xc0   :  { %5108 = sst [smem:[#allocation33_spill]] %s2426_s8  ;;  %v2467_v16 = vadd.f32 %v63_v49, %v60_v31  ;;  %v2473_v61 = vadd.f32 %v63_v49, %v61_v52 }
  0xc1   :  { %s2438_s22 = sld [smem:[#allocation3 + $0x41]]  ;;  %v71_v27 = vstv %s5109_s9 }
  0xc2   :  { %s5114_s23 = sld [smem:[#allocation35_spill]]  ;;  %v2469_v0 = vadd.f32 %v71_v27, %v68_v30  ;;  %v2480_v15 = vadd.f32 %v71_v27, %v69_v17 }
  0xc3   :  { %5110 = sst [smem:[#allocation28_spill]] %s2432_s17 }
  0xc4   :  { %s2444_s26 = sld [smem:[#allocation3 + $0x5c]] }
  0xc5   :  { %s2450_s3 = sld [smem:[#allocation3 + $0x77]]  ;;  %v79_v8 = vstv %s5112_s19 }
  0xc6   :  { %s2456_s6 = sld [smem:[#allocation3 + $0x92]]  ;;  %v2478_v11 = vadd.f32 %v79_v8, %v76_v26  ;;  %v2482_v31 = vadd.f32 %v79_v8, %v77_v13 }
  0xc7   :  { %5113 = sst [smem:[#allocation30_spill]] %s2438_s22 }
  0xc8   :  { %v87_v9 = vstv %s5114_s23  ;;  %s2465_s24 = sld [smem:[#allocation3 + $0xc]] }
  0xc9   :  { %s5120_s19 = sld [smem:[#allocation40_spill]]  ;;  %v2488_v53 = vadd.f32 %v87_v9, %v84_v6  ;;  %v2490_v5 = vadd.f32 %v87_v9, %v85_v59 }
  0xca   :  { %5115 = sst [smem:[#allocation32_spill]] %s2444_s26 }
  0xcb   :  { %5116 = sst [smem:[#allocation34_spill]] %s2450_s3 }
  0xcc   :  { %5118 = sst [smem:[#allocation35_spill]] %s2456_s6 }
  0xcd   :  { %s2475_s23 = sld [smem:[#allocation3 + $0x27]] }
  0xce   :  { %s2484_s10 = sld [smem:[#allocation3 + $0x42]] }
  0xcf   :  { %s5126_s7 = sld [smem:[#allocation47_spill]] }
  0xd0   :  { %s5127_s4 = sld [smem:[#allocation54_spill]] }
  0xd1   :  { %s5128_s27 = sld [smem:[#allocation56_spill]] }
  0xd2   :  { %s5129_s6 = sld [smem:[#allocation58_spill]] }
  0xd3   :  { %s2492_s29 = sld [smem:[#allocation3 + $0x5d]]  ;;  %v765_v44 = vstv %s2475_s23 }
  0xd4   :  { %s5130_s3 = sld [smem:[#allocation48_spill]]  ;;  %v778_v55 = vstv %s2484_s10  ;;  %v2606_v42 = vmul.f32 %v765_v44, %v2131_v3 }
  0xd5   :  { %s5131_s26 = sld [smem:[#allocation60_spill]]  ;;  %v779_v51 = vmul.f32 %v778_v55, %v2129_v2 }
  0xd6   :  { %s5132_s22 = sld [smem:[#allocation62_spill]]  ;;  %v644_v9 = vstv %s5127_s4  ;;  %5179 = vst [vmem:[#allocation102_spill] sm:$0xff] %v2606_v42 }
  0xd7   :  { %s5133_s17 = sld [smem:[#allocation64_spill]]  ;;  %v650_v26 = vstv %s5128_s27  ;;  %v2526_v30 = vmul.f32 %v644_v9, %v2129_v2  ;;  %v2551_v36 = vmul.f32 %v644_v9, %v2131_v3 }
  0xd8   :  { %s2498_s8 = sld [smem:[#allocation3 + $0x78]]  ;;  %v656_v4 = vstv %s5129_s6  ;;  %v2529_v27 = vmul.f32 %v650_v26, %v2129_v2  ;;  %v2554_v35 = vmul.f32 %v650_v26, %v2131_v3  ;;  %v766_v26 = vmul.f32 %v765_v44, %v2129_v2 }
  0xd9   :  { %s5134_s2 = sld [smem:[#allocation49_spill]]  ;;  %5146 = vst [vmem:[#allocation86_spill] sm:$0xff] %v2526_v30  ;;  %v2532_v57 = vmul.f32 %v656_v4, %v2129_v2  ;;  %5157 = vst [vmem:[#allocation92_spill] sm:$0xff] %v2551_v36  ;;  %v2560_v6 = vmul.f32 %v656_v4, %v2131_v3  ;;  %v783_v44 = vrot.slane %v779_v51, 1 }
  0xda   :  { %s2504_s25 = sld [smem:[#allocation3 + $0x93]]  ;;  %5147 = vst [vmem:[#allocation87_spill] sm:$0xff] %v2529_v27  ;;  %5158 = vst [vmem:[#allocation93_spill] sm:$0xff] %v2554_v35 }
  0xdb   :  { %s2510_s13 = sld [smem:[#allocation3 + $0xe]]  ;;  %v662_v13 = vstv %s5131_s26  ;;  %5148 = vst [vmem:[#allocation88_spill] sm:$0xff] %v2532_v57  ;;  %5161 = vst [vmem:[#allocation94_spill] sm:$0xff] %v2560_v6 }
  0xdc   :  { %v668_v17 = vstv %s5132_s22  ;;  %s2516_s15 = sld [smem:[#allocation3 + $0x29]]  ;;  %v2537_v59 = vmul.f32 %v662_v13, %v2129_v2  ;;  %v2563_v19 = vmul.f32 %v662_v13, %v2131_v3  ;;  %v2610_v13 = vmul.f32 %v778_v55, %v2131_v3 }
  0xdd   :  { %v674_v8 = vstv %s5133_s17  ;;  %s2522_s11 = sld [smem:[#allocation3 + $0x44]]  ;;  %v2540_v49 = vmul.f32 %v668_v17, %v2129_v2  ;;  %v2566_v9 = vmul.f32 %v668_v17, %v2131_v3  ;;  %v752_v17 = vstv %s2465_s24 }
  0xde   :  { %s2534_s27 = sld [smem:[#allocation3 + $0x5f]]  ;;  %5151 = vst [vmem:[#allocation89_spill] sm:$0xff] %v2537_v59  ;;  %v2543_v52 = vmul.f32 %v674_v8, %v2129_v2  ;;  %5162 = vst [vmem:[#allocation95_spill] sm:$0xff] %v2563_v19  ;;  %v2574_v4 = vmul.f32 %v674_v8, %v2131_v3  ;;  %v791_v8 = vstv %s2492_s29  ;;  %v804_v34 = vstv %s2498_s8 }
  0xdf   :  { %5152 = vst [vmem:[#allocation90_spill] sm:$0xff] %v2540_v49  ;;  %s2546_s26 = sld [smem:[#allocation3 + $0x7a]]  ;;  %5163 = vst [vmem:[#allocation96_spill] sm:$0xff] %v2566_v9  ;;  %v753_v47 = vmul.f32 %v752_v17, %v2129_v2  ;;  %v2599_v48 = vmul.f32 %v752_v17, %v2131_v3  ;;  %v792_v17 = vmul.f32 %v791_v8, %v2129_v2 }
  0xe0   :  { %5154 = vst [vmem:[#allocation91_spill] sm:$0xff] %v2543_v52  ;;  %s2556_s5 = sld [smem:[#allocation3 + $0x95]]  ;;  %5167 = vst [vmem:[#allocation97_spill] sm:$0xff] %v2574_v4  ;;  %v817_v45 = vstv %s2504_s25  ;;  %v2616_v33 = vmul.f32 %v791_v8, %v2131_v3  ;;  %v805_v32 = vmul.f32 %v804_v34, %v2129_v2  ;;  %v2620_v4 = vmul.f32 %v804_v34, %v2131_v3 }
  0xe1   :  { %5139 = sst [smem:[#allocation47_spill]] %s2510_s13  ;;  %5175 = vst [vmem:[#allocation100_spill] sm:$0xff] %v2599_v48  ;;  %5180 = vst [vmem:[#allocation103_spill] sm:$0xff] %v2610_v13  ;;  %v818_v19 = vmul.f32 %v817_v45, %v2129_v2  ;;  %v2628_v55 = vmul.f32 %v817_v45, %v2131_v3  ;;  %v757_v35 = vrot.slane %v753_v47, 1  ;;  %v770_v34 = vrot.slane %v766_v26, 1 }
  0xe2   :  { %5141 = sst [smem:[#allocation54_spill]] %s2516_s15  ;;  %5182 = vst [vmem:[#allocation105_spill] sm:$0xff] %v2616_v33  ;;  %5183 = vst [vmem:[#allocation106_spill] sm:$0xff] %v2620_v4  ;;  %v4877_v45 = vrot.slane %v2610_v13, 1  ;;  %v796_v52 = vrot.slane %v792_v17, 1  ;;  %v809_v47 = vrot.slane %v805_v32, 1 }
  0xe3   :  { %5144 = sst [smem:[#allocation56_spill]] %s2522_s11  ;;  %5185 = vst [vmem:[#allocation108_spill] sm:$0xff] %v2628_v55  ;;  %v822_v9 = vrot.slane %v818_v19, 1  ;;  %v5195_v8 = vrot.slane %v2599_v48, 1  ;;  %v5198_v19 = vrot.slane %v2606_v42, 1  ;;  %v5203_v51 = vrot.slane %v2620_v4, 1 }
  0xe4   :  { %5149 = sst [smem:[#allocation58_spill]] %s2534_s27  ;;  %v2668_v32 = vsel %vm168_vm0, %v783_v44, %v4877_v45  ;;  %v5205_v45 = vrot.slane %v2628_v55, 1 }
  0xe5   :  { %5155 = sst [smem:[#allocation48_spill]] %s2546_s26  ;;  %v2656_v26 = vsel %vm168_vm0, %v757_v35, %v5195_v8  ;;  %v2663_v36 = vsel %vm168_vm0, %v770_v34, %v5198_v19  ;;  %5200 = vst [vmem:[#allocation116_spill] sm:$0xff] %v2668_v32  ;;  %v5201_v8 = vrot.slane %v2616_v33, 1  ;;  %v2680_v34 = vsel %vm168_vm0, %v809_v47, %v5203_v51  ;;  %v2753_v32 = vpop.permute.xlu0 %34 }
  0xe6   :  { %5159 = sst [smem:[#allocation60_spill]] %s2556_s5  ;;  %5196 = vst [vmem:[#allocation113_spill] sm:$0xff] %v2656_v26  ;;  %5199 = vst [vmem:[#allocation115_spill] sm:$0xff] %v2663_v36  ;;  %v2687_v35 = vsel %vm168_vm0, %v822_v9, %v5205_v45  ;;  %v39_v45 = vpop.permute.xlu1 %38 }
  0xe7   :  { %s2568_s12 = sld [smem:[#allocation3 + $0x11]]  ;;  %v2675_v17 = vsel %vm168_vm0, %v796_v52, %v5201_v8  ;;  %5204 = vst [vmem:[#allocation118_spill] sm:$0xff] %v2680_v34  ;;  %5206 = vst [vmem:[#allocation119_spill] sm:$0xff] %v2687_v35 }
  0xe8   :  { %s2576_s4 = sld [smem:[#allocation3 + $0x2c]]  ;;  %5202 = vst [vmem:[#allocation117_spill] sm:$0xff] %v2675_v17 }
  0xe9   :  { %s2582_s9 = sld [smem:[#allocation3 + $0x47]] }
  0xea   :  { %s2588_s1 = sld [smem:[#allocation3 + $0x62]] }
  0xeb   :  { %s2594_s22 = sld [smem:[#allocation3 + $0x7d]] }
  0xec   :  { %s2602_s24 = sld [smem:[#allocation3 + $0x98]] }
  0xed   :  { %5164 = sst [smem:[#allocation62_spill]] %s2568_s12 }
  0xee   :  { %5168 = sst [smem:[#allocation64_spill]] %s2576_s4 }
  0xef   :  { %5170 = sst [smem:[#allocation49_spill]] %s2582_s9 }
  0xf0   :  { %5171 = sst [smem:[#allocation98_spill]] %s2588_s1 }
  0xf1   :  { %5172 = sst [smem:[#allocation99_spill]] %s2594_s22 }
  0xf2   :  { %5176 = sst [smem:[#allocation101_spill]] %s2602_s24 }
  0xf3   :  { %s2612_s8 = sld [smem:[#allocation3 + $0x16]] }
  0xf4   :  { %s2622_s25 = sld [smem:[#allocation3 + $0x31]] }
  0xf5   :  { %s2630_s29 = sld [smem:[#allocation3 + $0x4c]] }
  0xf6   :  { %s2635_s14 = sld [smem:[#allocation3 + $0x67]] }
  0xf7   :  { %s2639_s16 = sld [smem:[#allocation3 + $0x82]] }
  0xf8   :  { %s2643_s23 = sld [smem:[#allocation3 + $0x9d]] }
  0xf9   :  { %5181 = sst [smem:[#allocation104_spill]] %s2612_s8 }
  0xfa   :  { %5184 = sst [smem:[#allocation107_spill]] %s2622_s25 }
  0xfb   :  { %5186 = sst [smem:[#allocation109_spill]] %s2630_s29 }
  0xfc   :  { %5189 = sst [smem:[#allocation110_spill]] %s2635_s14 }
  0xfd   :  { %5193 = sst [smem:[#allocation111_spill]] %s2639_s16 }
  0xfe   :  { %5194 = sst [smem:[#allocation112_spill]] %s2643_s23 }
  0xff   :  { %s2648_s10 = sld [smem:[#allocation3 + $0xf]] }
 0x100   :  { %s2658_s28 = sld [smem:[#allocation3 + $0x2a]] }
 0x101   :  { %s5207_s15 = sld [smem:[#allocation9_spill]] }
 0x102   :  { %s5208_s13 = sld [smem:[#allocation10_spill]] }
 0x103   :  { %s5209_s17 = sld [smem:[#allocation11_spill]] }
 0x104   :  { %s5210_s11 = sld [smem:[#allocation15_spill]] }
 0x105   :  { %s5211_s27 = sld [smem:[#allocation16_spill]]  ;;  %v986_v9 = vstv %s2648_s10 }
 0x106   :  { %5197 = sst [smem:[#allocation114_spill]] %s2658_s28  ;;  %v2707_v44 = vmul.f32 %v986_v9, %v2129_v2  ;;  %v2710_v55 = vmul.f32 %v986_v9, %v2131_v3 }
 0x107   :  { %s5212_s6 = sld [smem:[#allocation17_spill]]  ;;  %v5219_v8 = vstv %s5207_s15 }
 0x108   :  { %s5213_s21 = sld [smem:[#allocation18_spill]]  ;;  %v128_v51 = vmul.f32 %v5219_v8, %v39_v45  ;;  %5221 = vst [vmem:[#allocation120_spill] sm:$0xff] %v2707_v44  ;;  %5223 = vst [vmem:[#allocation121_spill] sm:$0xff] %v2710_v55  ;;  %v5224_v6 = vstv %s5208_s13 }
 0x109   :  { %s5214_s30 = sld [smem:[#allocation19_spill]]  ;;  %v134_v13 = vmul.f32 %v5224_v6, %v39_v45  ;;  %v5225_v52 = vstv %s5209_s17 }
 0x10a   :  { %s5215_s26 = sld [smem:[#allocation20_spill]]  ;;  %v140_v42 = vmul.f32 %v5225_v52, %v39_v45  ;;  %v5226_v33 = vstv %s5210_s11 }
 0x10b   :  { %s5216_s12 = sld [smem:[#allocation12_spill]]  ;;  %v2719_v48 = vmul.f32 %v5226_v33, %v39_v45  ;;  %v5227_v4 = vstv %s5211_s27  ;;  %v5288_v54 = vstv %s5211_s27 }
 0x10c   :  { %s5217_s4 = sld [smem:[#allocation13_spill]]  ;;  %v2723_v47 = vmul.f32 %v5227_v4, %v39_v45 }
 0x10d   :  { %s5218_s9 = sld [smem:[#allocation21_spill]]  ;;  %v5228_v35 = vstv %s5212_s6  ;;  %v5300_v46 = vrot.slane %v2719_v48, 1 }
 0x10e   :  { %s5220_s22 = sld [smem:[#allocation22_spill]]  ;;  %v2727_v8 = vmul.f32 %v5228_v35, %v39_v45  ;;  %v5229_v2 = vstv %s5213_s21 }
 0x10f   :  { %s5222_s25 = sld [smem:[#allocation14_spill]]  ;;  %v2731_v44 = vmul.f32 %v5229_v2, %v39_v45  ;;  %v5231_v3 = vstv %s5214_s30 }
 0x110   :  { %s5230_s10 = sld [smem:[#allocation23_spill]]  ;;  %v2735_v9 = vmul.f32 %v5231_v3, %v39_v45  ;;  %v5233_v6 = vstv %s5215_s26  ;;  %v5305_v63 = vrot.slane %v2727_v8, 1 }
 0x111   :  { %s5232_s23 = sld [smem:[#allocation24_spill]]  ;;  %v2739_v52 = vmul.f32 %v5233_v6, %v39_v45  ;;  %v5235_v33 = vstv %s5216_s12 }
 0x112   :  { %s5234_s28 = sld [smem:[#allocation25_spill]]  ;;  %v146_v19 = vmul.f32 %v5235_v33, %v39_v45  ;;  %v5237_v4 = vstv %s5217_s4 }
 0x113   :  { %s5236_s16 = sld [smem:[#allocation36_spill]]  ;;  %v152_v55 = vmul.f32 %v5237_v4, %v39_v45  ;;  %v5239_v35 = vstv %s5218_s9 }
 0x114   :  { %s5238_s14 = sld [smem:[#allocation37_spill]]  ;;  %v2747_v34 = vmul.f32 %v5239_v35, %v39_v45  ;;  %v5240_v17 = vstv %s5220_s22 }
 0x115   :  { %v2751_v2 = vmul.f32 %v5240_v17, %v39_v45  ;;  %s5241_s29 = sld [smem:[#allocation38_spill]]  ;;  %v5242_v3 = vstv %s5222_s25  ;;  %v5298_v50 = vstv %s5222_s25 }
 0x116   :  { %v158_v36 = vmul.f32 %v5242_v3, %v39_v45  ;;  %s5243_s8 = sld [smem:[#allocation26_spill]]  ;;  %v5244_v49 = vstv %s5230_s10 }
 0x117   :  { %v2765_v59 = vmul.f32 %v5244_v49, %v39_v45  ;;  %v5245_v57 = vstv %s5232_s23  ;;  %s5246_s24 = sld [smem:[#allocation41_spill]]  ;;  %v5313_v8 = vstv %s5232_s23 }
 0x118   :  { %v2769_v3 = vmul.f32 %v5245_v57, %v39_v45  ;;  %v5247_v6 = vstv %s5234_s28  ;;  %v110_v57 = vmul.f32 %v5251_v58, %v2753_v32  ;;  %s5254_s1 = sld [smem:[#allocation42_spill]] }
 0x119   :  { %v2773_v27 = vmul.f32 %v5247_v6, %v39_v45  ;;  %v5248_v33 = vstv %s5236_s16  ;;  %s5255_s5 = sld [smem:[#allocation43_spill]] }
 0x11a   :  { %v92_v26 = vmul.f32 %v5248_v33, %v2753_v32  ;;  %v5249_v4 = vstv %s5238_s14  ;;  %v112_v17 = vadd.f32 %v110_v57, %v2469_v0  ;;  %s5258_s0 = sld [smem:[#allocation44_spill]] }
 0x11b   :  { %v98_v30 = vmul.f32 %v5249_v4, %v2753_v32  ;;  %v5250_v49 = vstv %s5241_s29  ;;  %s5259_s20 = sld [smem:[#allocation45_spill]] }
 0x11c   :  { %v104_v62 = vmul.f32 %v5250_v49, %v2753_v32  ;;  %v5252_v6 = vstv %s5243_s8  ;;  %v94_v33 = vadd.f32 %v92_v26, %v2459_v37  ;;  %v5256_v49 = vstv %s5120_s19  ;;  %s5260_s18 = sld [smem:[#allocation46_spill]] }
 0x11d   :  { %v2792_v29 = vmul.f32 %v5252_v6, %v39_v45  ;;  %v100_v4 = vadd.f32 %v98_v30, %v2461_v56  ;;  %v116_v28 = vmul.f32 %v5256_v49, %v2753_v32  ;;  %v5257_v58 = vstv %s5246_s24  ;;  %s5263_s24 = sld [smem:[#allocation50_spill]] }
 0x11e   :  { %v106_v35 = vadd.f32 %v104_v62, %v2467_v16  ;;  %v122_v22 = vmul.f32 %v5257_v58, %v2753_v32  ;;  %v130_v37 = vadd.f32 %v128_v51, %v94_v33  ;;  %v148_v30 = vadd.f32 %v146_v19, %v112_v17  ;;  %s5265_s19 = sld [smem:[#allocation51_spill]] }
 0x11f   :  { %5253 = vst [vmem:[#allocation122_spill] sm:$0xff] %v2792_v29  ;;  %v136_v56 = vadd.f32 %v134_v13, %v100_v4  ;;  %v118_v62 = vadd.f32 %v116_v28, %v2478_v11  ;;  %v5261_v6 = vstv %s5254_s1  ;;  %v5262_v13 = vstv %s5255_s5  ;;  %s5269_s5 = sld [smem:[#allocation52_spill]] }
 0x120   :  { %v124_v16 = vadd.f32 %v122_v22, %v2488_v53  ;;  %v142_v0 = vadd.f32 %v140_v42, %v106_v35  ;;  %v2809_v26 = vadd.f32 %v2235_v23, %v130_v37  ;;  %v2817_v51 = vmul.f32 %v5261_v6, %v2753_v32  ;;  %s5443_s27 = sld [smem:[#allocation29_spill]] }
 0x121   :  { %v2812_v57 = vadd.f32 %v2245_v25, %v136_v56  ;;  %v2822_v33 = vmul.f32 %v5262_v13, %v2753_v32  ;;  %v154_v28 = vadd.f32 %v152_v55, %v118_v62  ;;  %v2828_v23 = vadd.f32 %v2273_v39, %v148_v30  ;;  %s5480_s23 = sld [smem:[#allocation32_spill]] }
 0x122   :  { %v160_v22 = vadd.f32 %v158_v36, %v124_v16  ;;  %v2825_v42 = vadd.f32 %v2268_v38, %v142_v0  ;;  %v5264_v25 = vstv %s5258_s0  ;;  %v5266_v53 = vstv %s5259_s20  ;;  %s5484_s25 = sld [smem:[#allocation35_spill]] }
 0x123   :  { %v2833_v11 = vmul.f32 %v5264_v25, %v2753_v32  ;;  %v2838_v19 = vmul.f32 %v5266_v53, %v2753_v32  ;;  %v5267_v35 = vstv %s5260_s18  ;;  %v5268_v38 = vstv %s5126_s7  ;;  %s5273_s18 = sld [smem:[#allocation53_spill]] }
 0x124   :  { %v2843_v55 = vmul.f32 %v5267_v35, %v2753_v32  ;;  %v2848_v36 = vmul.f32 %v5268_v38, %v2753_v32  ;;  %v2851_v39 = vadd.f32 %v2278_v40, %v154_v28  ;;  %v2854_v17 = vadd.f32 %v2283_v41, %v160_v22 }
 0x125   :  { %v5270_v4 = vstv %s5130_s3  ;;  %v5272_v58 = vstv %s5134_s2  ;;  %v5275_v30 = vstv %s5263_s24  ;;  %v5277_v13 = vstv %s5265_s19 }
 0x126   :  { %v2859_v49 = vmul.f32 %v5270_v4, %v2753_v32  ;;  %v2864_v37 = vmul.f32 %v5272_v58, %v2753_v32  ;;  %v2875_v6 = vmul.f32 %v5275_v30, %v2753_v32  ;;  %v2880_v28 = vmul.f32 %v5277_v13, %v2753_v32  ;;  %v41_v4 = vpop.permute.xlu1 %40 }
 0x127   :  { %v5279_v35 = vstv %s5269_s5  ;;  %v5283_v56 = vstv %s5207_s15  ;;  %v5284_v25 = vstv %s5208_s13  ;;  %v5285_v16 = vstv %s5209_s17  ;;  %s5341_s13 = sld [smem:[#allocation46_spill]] }
 0x128   :  { %5271 = vst [vmem:[#allocation123_spill] sm:$0xff] %v2859_v49  ;;  %5274 = vst [vmem:[#allocation124_spill] sm:$0xff] %v2864_v37  ;;  %v2888_v38 = vmul.f32 %v5279_v35, %v2753_v32  ;;  %v129_v22 = vmul.f32 %v5283_v56, %v41_v4  ;;  %v135_v0 = vmul.f32 %v5284_v25, %v41_v4  ;;  %v5286_v41 = vstv %s5216_s12  ;;  %s5320_s12 = sld [smem:[#allocation41_spill]] }
 0x129   :  { %5276 = vst [vmem:[#allocation125_spill] sm:$0xff] %v2875_v6  ;;  %5278 = vst [vmem:[#allocation126_spill] sm:$0xff] %v2880_v28  ;;  %v5281_v30 = vstv %s5273_s18  ;;  %v141_v35 = vmul.f32 %v5285_v16, %v41_v4  ;;  %v147_v40 = vmul.f32 %v5286_v41, %v41_v4  ;;  %v5287_v62 = vstv %s5210_s11  ;;  %s5318_s11 = sld [smem:[#allocation40_spill]] }
 0x12a   :  { %5280 = vst [vmem:[#allocation127_spill] sm:$0xff] %v2888_v38  ;;  %v2894_v13 = vmul.f32 %v5281_v30, %v2753_v32  ;;  %v2908_v58 = vmul.f32 %v5287_v62, %v41_v4  ;;  %v2912_v32 = vmul.f32 %v5288_v54, %v41_v4  ;;  %v5289_v30 = vstv %s5212_s6  ;;  %s5409_s15 = sld [smem:[#allocation69_spill]] }
 0x12b   :  { %v2916_v56 = vmul.f32 %v5289_v30, %v41_v4  ;;  %v5290_v25 = vstv %s5213_s21  ;;  %v5292_v53 = vstv %s5214_s30  ;;  %v5294_v38 = vstv %s5215_s26  ;;  %s5301_s30 = sld [smem:[#allocation39_spill]] }
 0x12c   :  { %5282 = vst [vmem:[#allocation128_spill] sm:$0xff] %v2894_v13  ;;  %v2920_v6 = vmul.f32 %v5290_v25, %v41_v4  ;;  %v2924_v45 = vmul.f32 %v5292_v53, %v41_v4  ;;  %v2928_v16 = vmul.f32 %v5294_v38, %v41_v4  ;;  %v5295_v28 = vstv %s5218_s9  ;;  %v2956_v13 = vpop.permute.xlu0 %36  ;;  %s5414_s21 = sld [smem:[#allocation72_spill]] }
 0x12d   :  { %v2932_v41 = vmul.f32 %v5295_v28, %v41_v4  ;;  %v5296_v62 = vstv %s5220_s22  ;;  %v5297_v49 = vstv %s5217_s4  ;;  %v5299_v30 = vrot.slane %v2908_v58, 1  ;;  %s5435_s9 = sld [smem:[#allocation83_spill]] }
 0x12e   :  { %5291 = vst [vmem:[#allocation129_spill] sm:$0xff] %v2920_v6  ;;  %5293 = vst [vmem:[#allocation130_spill] sm:$0xff] %v2924_v45  ;;  %v2936_v37 = vmul.f32 %v5296_v62, %v41_v4  ;;  %v153_v28 = vmul.f32 %v5297_v49, %v41_v4  ;;  %v159_v62 = vmul.f32 %v5298_v50, %v41_v4  ;;  %v5302_v50 = vrot.slane %v2912_v32, 1  ;;  %s5441_s4 = sld [smem:[#allocation85_spill]] }
 0x12f   :  { %v327_v25 = vsel %vm168_vm0, %v5300_v46, %v5299_v30  ;;  %v5303_v54 = vrot.slane %v2723_v47, 1  ;;  %v5304_v48 = vrot.slane %v2916_v56, 1  ;;  %v5306_v30 = vrot.slane %v2920_v6, 1  ;;  %s5444_s17 = sld [smem:[#allocation31_spill]] }
 0x130   :  { %v5307_v38 = vrot.slane %v2731_v44, 1  ;;  %v5309_v53 = vrot.slane %v2924_v45, 1  ;;  %v5310_v47 = vrot.slane %v2735_v9, 1  ;;  %v5315_v44 = vstv %s5243_s8  ;;  %s5448_s22 = sld [smem:[#allocation27_spill]] }
 0x131   :  { %v340_v20 = vsel %vm168_vm0, %v5303_v54, %v5302_v50  ;;  %v2968_v46 = vsel %vm168_vm0, %v5305_v63, %v5304_v48  ;;  %v5312_v50 = vstv %s5230_s10  ;;  %v2990_v63 = vmul.f32 %v5313_v8, %v41_v4  ;;  %s5477_s26 = sld [smem:[#allocation33_spill]] }
 0x132   :  { %v2975_v49 = vsel %vm168_vm0, %v5307_v38, %v5306_v30  ;;  %v2982_v54 = vsel %vm168_vm0, %v5310_v47, %v5309_v53  ;;  %v2986_v43 = vmul.f32 %v5312_v50, %v41_v4  ;;  %v5314_v48 = vstv %s5234_s28  ;;  %s5329_s28 = sld [smem:[#allocation43_spill]] }
 0x133   :  { %5308 = vst [vmem:[#allocation131_spill] sm:$0xff] %v2975_v49  ;;  %5311 = vst [vmem:[#allocation132_spill] sm:$0xff] %v2982_v54  ;;  %v2994_v6 = vmul.f32 %v5314_v48, %v41_v4  ;;  %v2998_v29 = vmul.f32 %v5315_v44, %v41_v4  ;;  %v5316_v38 = vstv %s5236_s16  ;;  %v5317_v9 = vstv %s5238_s14  ;;  %s5398_s14 = sld [smem:[#allocation68_spill]] }
 0x134   :  { %v93_v30 = vmul.f32 %v5316_v38, %v2956_v13  ;;  %v99_v53 = vmul.f32 %v5317_v9, %v2956_v13  ;;  %v5319_v47 = vstv %s5241_s29  ;;  %v5321_v8 = vstv %s5301_s30  ;;  %s5419_s16 = sld [smem:[#allocation77_spill]] }
 0x135   :  { %v105_v50 = vmul.f32 %v5319_v47, %v2956_v13  ;;  %v111_v45 = vmul.f32 %v5321_v8, %v2956_v13  ;;  %v5322_v48 = vrot.slane %v2928_v16, 1  ;;  %v5323_v54 = vrot.slane %v2739_v52, 1  ;;  %s5478_s6 = sld [smem:[#allocation28_spill]] }
 0x136   :  { %v5324_v44 = vrot.slane %v2932_v41, 2  ;;  %v5325_v38 = vrot.slane %v2747_v34, 2  ;;  %v5326_v49 = vrot.slane %v2936_v37, 2  ;;  %v5327_v47 = vrot.slane %v2751_v2, 2  ;;  %s5483_s8 = sld [smem:[#allocation34_spill]] }
 0x137   :  { %v3017_v4 = vsel %vm168_vm0, %v5323_v54, %v5322_v48  ;;  %v4944_v52 = vrot.slane %v2986_v43, 2  ;;  %v95_v54 = vadd.f32 %v93_v30, %v2463_v12  ;;  %v101_v48 = vadd.f32 %v99_v53, %v2471_v1  ;;  %s5487_s29 = sld [smem:[#allocation47_spill]] }
 0x138   :  { %v3024_v9 = vsel %vm403_vm1, %v5325_v38, %v5324_v44  ;;  %v3031_v8 = vsel %vm403_vm1, %v5327_v47, %v5326_v49  ;;  %v107_v34 = vadd.f32 %v105_v50, %v2473_v61  ;;  %v113_v44 = vadd.f32 %v111_v45, %v2480_v15  ;;  %s5489_s10 = sld [smem:[#allocation54_spill]] }
 0x139   :  { %5328 = vst [vmem:[#allocation133_spill] sm:$0xff] %v3031_v8  ;;  %v5330_v38 = vrot.slane %v2765_v59, 2  ;;  %v5332_v12 = vstv %s5318_s11  ;;  %v5333_v61 = vstv %s5320_s12  ;;  %v131_v15 = vadd.f32 %v129_v22, %v95_v54  ;;  %s5501_s30 = sld [smem:[#allocation56_spill]] }
 0x13a   :  { %v117_v1 = vmul.f32 %v5332_v12, %v2956_v13  ;;  %v123_v30 = vmul.f32 %v5333_v61, %v2956_v13  ;;  %v137_v45 = vadd.f32 %v135_v0, %v101_v48  ;;  %v143_v59 = vadd.f32 %v141_v35, %v107_v34  ;;  %s5502_s11 = sld [smem:[#allocation58_spill]] }
 0x13b   :  { %v3043_v2 = vsel %vm403_vm1, %v5330_v38, %v4944_v52  ;;  %v149_v53 = vadd.f32 %v147_v40, %v113_v44  ;;  %v5334_v50 = vstv %s5254_s1  ;;  %v5335_v52 = vstv %s5329_s28  ;;  %s5426_s1 = sld [smem:[#allocation80_spill]] }
 0x13c   :  { %5331 = vst [vmem:[#allocation134_spill] sm:$0xff] %v3043_v2  ;;  %v244_v38 = vmul.f32 %v5334_v50, %v2956_v13  ;;  %v257_v47 = vmul.f32 %v5335_v52, %v2956_v13  ;;  %v119_v8 = vadd.f32 %v117_v1, %v2482_v31  ;;  %v125_v49 = vadd.f32 %v123_v30, %v2490_v5  ;;  %s5504_s12 = sld [smem:[#allocation48_spill]] }
 0x13d   :  { %v5336_v12 = vrot.slane %v2200_v7, 1  ;;  %v5337_v22 = vrot.slane %v2206_v10, 1  ;;  %v5338_v0 = vrot.slane %v2990_v63, 2  ;;  %v5339_v40 = vrot.slane %v2769_v3, 2  ;;  %s5506_s28 = sld [smem:[#allocation60_spill]] }
 0x13e   :  { %v5340_v48 = vrot.slane %v2214_v14, 1  ;;  %v248_v34 = vrot.slane %v244_v38, 1  ;;  %v261_v31 = vrot.slane %v257_v47, 1  ;;  %v155_v5 = vadd.f32 %v153_v28, %v119_v8 }
 0x13f   :  { %v175_v2 = vadd.f32 %v5336_v12, %v131_v15  ;;  %v188_v54 = vadd.f32 %v5337_v22, %v137_v45  ;;  %v3071_v35 = vsel %vm403_vm1, %v5339_v40, %v5338_v0  ;;  %v161_v7 = vadd.f32 %v159_v62, %v125_v49 }
 0x140   :  { %v201_v52 = vadd.f32 %v5340_v48, %v143_v59  ;;  %v5342_v44 = vstv %s5258_s0  ;;  %v5343_v1 = vstv %s5259_s20  ;;  %v5344_v3 = vrot.slane %v2221_v18, 1  ;;  %s5423_s20 = sld [smem:[#allocation79_spill]] }
 0x141   :  { %v270_v10 = vmul.f32 %v5342_v44, %v2956_v13  ;;  %v283_v61 = vmul.f32 %v5343_v1, %v2956_v13  ;;  %v5345_v15 = vrot.slane %v2817_v51, 1  ;;  %v253_v45 = vadd.f32 %v248_v34, %v175_v2  ;;  %s5428_s0 = sld [smem:[#allocation81_spill]] }
 0x142   :  { %v214_v30 = vadd.f32 %v5344_v3, %v149_v53  ;;  %v5346_v59 = vrot.slane %v2822_v33, 1  ;;  %v5347_v28 = vrot.slane %v2227_v21, 1  ;;  %v266_v50 = vadd.f32 %v261_v31, %v188_v54 }
 0x143   :  { %v249_v14 = vsel %vm168_vm0, %v5345_v15, %v248_v34  ;;  %v274_v38 = vrot.slane %v270_v10, 1  ;;  %v287_v18 = vrot.slane %v283_v61, 1  ;;  %v5348_v53 = vstv %s5341_s13  ;;  %s5508_s13 = sld [smem:[#allocation62_spill]] }
 0x144   :  { %v262_v47 = vsel %vm168_vm0, %v5346_v59, %v261_v31  ;;  %v227_v62 = vadd.f32 %v5347_v28, %v155_v5  ;;  %v252_v8 = vadd.f32 %v249_v14, %v2809_v26  ;;  %v296_v51 = vmul.f32 %v5348_v53, %v2956_v13  ;;  %v5370_v53 = vld [vmem:[#allocation130_spill] sm:$0xff] }
 0x145   :  { %v265_v49 = vadd.f32 %v262_v47, %v2812_v57  ;;  %v5349_v12 = vstv %s5126_s7  ;;  %v5350_v33 = vrot.slane %v2238_v24, 1  ;;  %v5351_v21 = vrot.slane %v2908_v58, 1  ;;  %s5397_s7 = sld [smem:[#allocation67_spill]] }
 0x146   :  { %v309_v2 = vmul.f32 %v5349_v12, %v2956_v13  ;;  %v330_v0 = vadd.f32 %v327_v25, %v252_v8  ;;  %v5352_v26 = vrot.slane %v2833_v11, 1  ;;  %v279_v54 = vadd.f32 %v274_v38, %v201_v52 }
 0x147   :  { %v240_v22 = vadd.f32 %v5350_v33, %v161_v7  ;;  %v331_v40 = vadd.f32 %v5351_v21, %v253_v45  ;;  %v343_v48 = vadd.f32 %v340_v20, %v265_v49  ;;  %v5353_v34 = vrot.slane %v2838_v19, 1  ;;  %v5366_v49 = vld [vmem:[#allocation55_spill] sm:$0xff]  ;;  %v5372_v33 = vld [vmem:[#allocation71_spill] sm:$0xff] }
 0x148   :  { %v275_v57 = vsel %vm168_vm0, %v5352_v26, %v274_v38  ;;  %v292_v5 = vadd.f32 %v287_v18, %v214_v30  ;;  %v300_v7 = vrot.slane %v296_v51, 1  ;;  %v313_v25 = vrot.slane %v309_v2, 1  ;;  %v5369_v38 = vld [vmem:[#allocation132_spill] sm:$0xff]  ;;  %v5374_v26 = vld [vmem:[#allocation57_spill] sm:$0xff] }
 0x149   :  { %v288_v31 = vsel %vm168_vm0, %v5353_v34, %v287_v18  ;;  %v278_v44 = vadd.f32 %v275_v57, %v2825_v42  ;;  %v5354_v58 = vrot.slane %v2994_v6, 2  ;;  %v5355_v20 = vrot.slane %v2773_v27, 2 }
 0x14a   :  { %v291_v24 = vadd.f32 %v288_v31, %v2828_v23  ;;  %v5356_v52 = vrot.slane %v2912_v32, 1  ;;  %v5357_v19 = vrot.slane %v2916_v56, 1  ;;  %v409_v61 = vadd.f32 %v2330_v60, %v330_v0  ;;  %v5360_v56 = vld [vmem:[#allocation131_spill] sm:$0xff] }
 0x14b   :  { %v3116_v11 = vsel %vm403_vm1, %v5355_v20, %v5354_v58  ;;  %v5358_v42 = vrot.slane %v2843_v55, 1  ;;  %v305_v3 = vadd.f32 %v300_v7, %v227_v62  ;;  %v5359_v30 = vrot.slane %v2848_v36, 1  ;;  %v5362_v55 = vld [vmem:[#allocation122_spill] sm:$0xff]  ;;  %v5364_v36 = vld [vmem:[#allocation129_spill] sm:$0xff] }
 0x14c   :  { %v344_v10 = vadd.f32 %v5356_v52, %v266_v50  ;;  %v357_v1 = vadd.f32 %v5357_v19, %v279_v54  ;;  %v318_v15 = vadd.f32 %v313_v25, %v240_v22  ;;  %v356_v45 = vadd.f32 %v2968_v46, %v278_v44  ;;  %v5368_v50 = vld [vmem:[#allocation66_spill] sm:$0xff]  ;;  %v5379_v44 = vld [vmem:[#allocation74_spill] sm:$0xff] }
 0x14d   :  { %v301_v23 = vsel %vm168_vm0, %v5358_v42, %v300_v7  ;;  %v314_v27 = vsel %vm168_vm0, %v5359_v30, %v313_v25  ;;  %v369_v59 = vadd.f32 %v5360_v56, %v291_v24  ;;  %v5361_v60 = vrot.slane %v2998_v29, 2  ;;  %v5380_v7 = vld [vmem:[#allocation75_spill] sm:$0xff] }
 0x14e   :  { %v304_v14 = vadd.f32 %v301_v23, %v2851_v39  ;;  %v317_v32 = vadd.f32 %v314_v27, %v2854_v17  ;;  %v5363_v47 = vrot.slane %v5362_v55, 2  ;;  %v5365_v62 = vrot.slane %v5364_v36, 1  ;;  %v5387_v27 = vld [vmem:[#allocation61_spill] sm:$0xff] }
 0x14f   :  { %v5367_v39 = vrot.slane %v5366_v49, 2  ;;  %v422_v46 = vadd.f32 %v5368_v50, %v343_v48  ;;  %v5371_v51 = vrot.slane %v5370_v53, 1  ;;  %v435_v22 = vadd.f32 %v5372_v33, %v356_v45  ;;  %v5378_v48 = vld [vmem:[#allocation73_spill] sm:$0xff]  ;;  %v5391_v49 = vld [vmem:[#allocation65_spill] sm:$0xff] }
 0x150   :  { %v627_v28 = vsel %vm403_vm1, %v5363_v47, %v5361_v60  ;;  %v370_v8 = vadd.f32 %v5365_v62, %v292_v5  ;;  %v382_v18 = vadd.f32 %v5369_v38, %v304_v14  ;;  %v395_v2 = vadd.f32 %v3017_v4, %v317_v32  ;;  %v5389_v32 = vld [vmem:[#allocation63_spill] sm:$0xff]  ;;  %v5393_v38 = vld [vmem:[#allocation123_spill] sm:$0xff] }
 0x151   :  { %v410_v17 = vadd.f32 %v5367_v39, %v331_v40  ;;  %v383_v12 = vadd.f32 %v5371_v51, %v305_v3  ;;  %v5373_v0 = vrot.slane %v2928_v16, 1  ;;  %v5375_v57 = vrot.slane %v5374_v26, 2  ;;  %v5376_v40 = vld [vmem:[#allocation59_spill] sm:$0xff]  ;;  %v5395_v51 = vld [vmem:[#allocation124_spill] sm:$0xff]  ;;  %v5399_v26 = vld [vmem:[#allocation125_spill] sm:$0xff] }
 0x152   :  { %v5377_v34 = vrot.slane %v5376_v40, 2  ;;  %v448_v5 = vadd.f32 %v5378_v48, %v369_v59  ;;  %v461_v24 = vadd.f32 %v5379_v44, %v382_v18  ;;  %v474_v25 = vadd.f32 %v5380_v7, %v395_v2  ;;  %v5401_v48 = vld [vmem:[#allocation126_spill] sm:$0xff] }
 0x153   :  { %v396_v21 = vadd.f32 %v5373_v0, %v318_v15  ;;  %v423_v54 = vadd.f32 %v5375_v57, %v344_v10  ;;  %v5381_v58 = vstv %s5130_s3  ;;  %v5382_v20 = vstv %s5134_s2  ;;  %s5418_s2 = sld [smem:[#allocation76_spill]] }
 0x154   :  { %v436_v31 = vadd.f32 %v5377_v34, %v357_v1  ;;  %v479_v4 = vmul.f32 %v5381_v58, %v2956_v13  ;;  %v492_v52 = vmul.f32 %v5382_v20, %v2956_v13  ;;  %v5383_v16 = vstv %s5263_s24  ;;  %s5430_s3 = sld [smem:[#allocation82_spill]] }
 0x155   :  { %v505_v19 = vmul.f32 %v5383_v16, %v2956_v13  ;;  %v5384_v10 = vstv %s5265_s19  ;;  %v5385_v1 = vstv %s5269_s5  ;;  %v5386_v3 = vstv %s5273_s18  ;;  %v5405_v16 = vld [vmem:[#allocation128_spill] sm:$0xff]  ;;  %s5412_s18 = sld [smem:[#allocation70_spill]] }
 0x156   :  { %v518_v42 = vmul.f32 %v5384_v10, %v2956_v13  ;;  %v531_v23 = vmul.f32 %v5385_v1, %v2956_v13  ;;  %v544_v30 = vmul.f32 %v5386_v3, %v2956_v13  ;;  %v5388_v15 = vrot.slane %v5387_v27, 2  ;;  %s5421_s5 = sld [smem:[#allocation78_spill]] }
 0x157   :  { %v5390_v45 = vrot.slane %v5389_v32, 2  ;;  %v483_v59 = vrot.slane %v479_v4, 2  ;;  %v496_v60 = vrot.slane %v492_v52, 2  ;;  %v509_v55 = vrot.slane %v505_v19, 2  ;;  %v636_v19 = vpop.permute.xlu0 %635  ;;  %s5438_s19 = sld [smem:[#allocation84_spill]] }
 0x158   :  { %v449_v14 = vadd.f32 %v5388_v15, %v370_v8  ;;  %v522_v47 = vrot.slane %v518_v42, 2  ;;  %v535_v36 = vrot.slane %v531_v23, 2  ;;  %v548_v62 = vrot.slane %v544_v30, 2  ;;  %s5479_s24 = sld [smem:[#allocation30_spill]] }
 0x159   :  { %v462_v56 = vadd.f32 %v5390_v45, %v383_v12  ;;  %v5392_v39 = vrot.slane %v5391_v49, 2  ;;  %v5394_v18 = vrot.slane %v5393_v38, 2  ;;  %v488_v13 = vadd.f32 %v483_v59, %v410_v17  ;;  %v5403_v17 = vld [vmem:[#allocation127_spill] sm:$0xff]  ;;  %v5424_v49 = vld [vmem:[#allocation88_spill] sm:$0xff] }
 0x15a   :  { %v5396_v2 = vrot.slane %v5395_v51, 2  ;;  %v501_v0 = vadd.f32 %v496_v60, %v423_v54  ;;  %v5400_v57 = vrot.slane %v5399_v26, 2  ;;  %v5402_v44 = vrot.slane %v5401_v48, 2 }
 0x15b   :  { %v475_v50 = vadd.f32 %v5392_v39, %v396_v21  ;;  %v484_v53 = vsel %vm403_vm1, %v5394_v18, %v483_v59  ;;  %v514_v21 = vadd.f32 %v509_v55, %v436_v31  ;;  %v5404_v58 = vrot.slane %v5403_v17, 2  ;;  %v5429_v18 = vld [vmem:[#allocation90_spill] sm:$0xff] }
 0x15c   :  { %v497_v8 = vsel %vm403_vm1, %v5396_v2, %v496_v60  ;;  %v487_v12 = vadd.f32 %v484_v53, %v409_v61  ;;  %v510_v40 = vsel %vm403_vm1, %v5400_v57, %v509_v55  ;;  %v523_v7 = vsel %vm403_vm1, %v5402_v44, %v522_v47 }
 0x15d   :  { %v500_v33 = vadd.f32 %v497_v8, %v422_v46  ;;  %v513_v34 = vadd.f32 %v510_v40, %v435_v22  ;;  %v536_v4 = vsel %vm403_vm1, %v5404_v58, %v535_v36  ;;  %v526_v20 = vadd.f32 %v523_v7, %v448_v5 }
 0x15e   :  { %v527_v52 = vadd.f32 %v522_v47, %v449_v14  ;;  %v539_v61 = vadd.f32 %v536_v4, %v461_v24  ;;  %v5406_v46 = vrot.slane %v5405_v16, 2  ;;  %v540_v10 = vadd.f32 %v535_v36, %v462_v56  ;;  %v5416_v56 = vld [vmem:[#allocation134_spill] sm:$0xff]  ;;  %v5420_v36 = vld [vmem:[#allocation86_spill] sm:$0xff] }
 0x15f   :  { %v5407_v22 = vstv %s5397_s7  ;;  %v5408_v1 = vstv %s5398_s14  ;;  %v553_v3 = vadd.f32 %v548_v62, %v475_v50  ;;  %v5410_v30 = vrot.slane %v2932_v41, 2  ;;  %v5425_v50 = vld [vmem:[#allocation89_spill] sm:$0xff] }
 0x160   :  { %v549_v54 = vsel %vm403_vm1, %v5406_v46, %v548_v62  ;;  %v681_v31 = vmul.f32 %v5407_v22, %v636_v19  ;;  %v687_v23 = vmul.f32 %v5408_v1, %v636_v19  ;;  %v5411_v5 = vrot.slane %v2936_v37, 2 }
 0x161   :  { %v552_v42 = vadd.f32 %v549_v54, %v474_v25  ;;  %v566_v27 = vadd.f32 %v5410_v30, %v488_v13  ;;  %v565_v24 = vadd.f32 %v3024_v9, %v487_v12  ;;  %v5413_v14 = vrot.slane %v2986_v43, 2  ;;  %v5415_v25 = vld [vmem:[#allocation133_spill] sm:$0xff] }
 0x162   :  { %v579_v15 = vadd.f32 %v5411_v5, %v501_v0  ;;  %v578_v45 = vadd.f32 %v5415_v25, %v500_v33  ;;  %v591_v59 = vadd.f32 %v5416_v56, %v513_v34  ;;  %v604_v60 = vadd.f32 %v3071_v35, %v526_v20  ;;  %v5422_v43 = vld [vmem:[#allocation87_spill] sm:$0xff] }
 0x163   :  { %v592_v32 = vadd.f32 %v5413_v14, %v514_v21  ;;  %v5417_v55 = vrot.slane %v2990_v63, 2  ;;  %v617_v37 = vadd.f32 %v3116_v11, %v539_v61  ;;  %v630_v47 = vadd.f32 %v627_v28, %v552_v42  ;;  %v5431_v11 = vld [vmem:[#allocation91_spill] sm:$0xff] }
 0x164   :  { %v647_v9 = vadd.f32 %v5420_v36, %v565_v24  ;;  %v653_v62 = vadd.f32 %v5422_v43, %v578_v45  ;;  %v659_v39 = vadd.f32 %v5424_v49, %v591_v59  ;;  %v665_v38 = vadd.f32 %v5425_v50, %v604_v60  ;;  %v638_v43 = vpop.permute.xlu1 %637 }
 0x165   :  { %v605_v41 = vadd.f32 %v5417_v55, %v527_v52  ;;  %v5427_v35 = vstv %s5409_s15  ;;  %v671_v53 = vadd.f32 %v5429_v18, %v617_v37  ;;  %v677_v13 = vadd.f32 %v5431_v11, %v630_v47 }
 0x166   :  { %v693_v63 = vmul.f32 %v5427_v35, %v636_v19  ;;  %v5432_v28 = vstv %s5412_s18  ;;  %v5433_v2 = vstv %s5414_s21  ;;  %v5434_v12 = vrot.slane %v2994_v6, 2 }
 0x167   :  { %v699_v51 = vmul.f32 %v5432_v28, %v636_v19  ;;  %v705_v8 = vmul.f32 %v5433_v2, %v636_v19  ;;  %v5436_v0 = vrot.slane %v2998_v29, 2  ;;  %v3232_v57 = vadd.f32 %v681_v31, %v647_v9 }
 0x168   :  { %v618_v33 = vadd.f32 %v5434_v12, %v540_v10  ;;  %v5437_v40 = vstv %s5418_s2  ;;  %v3236_v21 = vadd.f32 %v687_v23, %v653_v62  ;;  %v5439_v48 = vstv %s5419_s16 }
 0x169   :  { %v631_v26 = vadd.f32 %v5436_v0, %v553_v3  ;;  %v711_v34 = vmul.f32 %v5437_v40, %v636_v19  ;;  %v3240_v44 = vmul.f32 %v5439_v48, %v636_v19  ;;  %v5440_v7 = vstv %s5421_s5 }
 0x16a   :  { %v3244_v17 = vmul.f32 %v5440_v7, %v636_v19  ;;  %v5442_v6 = vstv %s5423_s20  ;;  %v3250_v29 = vadd.f32 %v693_v63, %v659_v39  ;;  %v5445_v4 = vstv %s5426_s1  ;;  %v5455_v39 = vld [vmem:[#allocation92_spill] sm:$0xff] }
 0x16b   :  { %v3248_v58 = vmul.f32 %v5442_v6, %v636_v19  ;;  %v3254_v20 = vmul.f32 %v5445_v4, %v636_v19  ;;  %v5446_v52 = vstv %s5428_s0  ;;  %v5447_v16 = vstv %s5430_s3 }
 0x16c   :  { %v3258_v61 = vmul.f32 %v5446_v52, %v636_v19  ;;  %v3262_v46 = vmul.f32 %v5447_v16, %v636_v19  ;;  %v3264_v54 = vadd.f32 %v699_v51, %v665_v38  ;;  %v3266_v10 = vadd.f32 %v705_v8, %v671_v53  ;;  %v5456_v38 = vld [vmem:[#allocation93_spill] sm:$0xff]  ;;  %v5457_v53 = vld [vmem:[#allocation94_spill] sm:$0xff]  ;;  %v5459_v51 = vld [vmem:[#allocation96_spill] sm:$0xff] }
 0x16d   :  { %v3268_v42 = vadd.f32 %v711_v34, %v677_v13  ;;  %v5449_v22 = vstv %s5435_s9  ;;  %v835_v1 = vrot.slane %v3240_v44, 1  ;;  %v848_v23 = vrot.slane %v3244_v17, 1  ;;  %v5458_v13 = vld [vmem:[#allocation95_spill] sm:$0xff]  ;;  %v5460_v8 = vld [vmem:[#allocation97_spill] sm:$0xff] }
 0x16e   :  { %v3272_v31 = vmul.f32 %v5449_v22, %v636_v19  ;;  %v861_v3 = vrot.slane %v3248_v58, 1  ;;  %v5450_v30 = vstv %s5438_s19  ;;  %v874_v24 = vrot.slane %v3254_v20, 1 }
 0x16f   :  { %v3279_v5 = vmul.f32 %v5450_v30, %v636_v19  ;;  %v5451_v14 = vstv %s5441_s4  ;;  %v5452_v45 = vstv %s5443_s27  ;;  %v5453_v59 = vstv %s5444_s17 }
 0x170   :  { %v3284_v25 = vmul.f32 %v5451_v14, %v636_v19  ;;  %v3288_v56 = vmul.f32 %v5452_v45, %v636_v19  ;;  %v3292_v60 = vmul.f32 %v5453_v59, %v636_v19  ;;  %v887_v55 = vrot.slane %v3258_v61, 1 }
 0x171   :  { %v900_v37 = vrot.slane %v3262_v46, 1  ;;  %v5454_v36 = vstv %s5448_s22  ;;  %v648_v50 = vadd.f32 %v5455_v39, %v566_v27  ;;  %v654_v35 = vadd.f32 %v5456_v38, %v579_v15 }
 0x172   :  { %v3299_v9 = vmul.f32 %v5454_v36, %v636_v19  ;;  %v660_v11 = vadd.f32 %v5457_v53, %v592_v32  ;;  %v666_v28 = vadd.f32 %v5458_v13, %v605_v41  ;;  %v672_v2 = vadd.f32 %v5459_v51, %v618_v33 }
 0x173   :  { %v678_v27 = vadd.f32 %v5460_v8, %v631_v26  ;;  %v5461_v12 = vstv %s5397_s7  ;;  %v5462_v0 = vstv %s5398_s14  ;;  %v5463_v34 = vstv %s5409_s15  ;;  %s5509_s7 = sld [smem:[#allocation64_spill]] }
 0x174   :  { %v682_v15 = vmul.f32 %v5461_v12, %v638_v43  ;;  %v688_v40 = vmul.f32 %v5462_v0, %v638_v43  ;;  %v694_v48 = vmul.f32 %v5463_v34, %v638_v43  ;;  %v5464_v44 = vstv %s5419_s16  ;;  %s5513_s14 = sld [smem:[#allocation49_spill]] }
 0x175   :  { %v3320_v7 = vmul.f32 %v5464_v44, %v638_v43  ;;  %v5465_v32 = vstv %s5421_s5  ;;  %v5466_v17 = vstv %s5412_s18  ;;  %v5467_v6 = vstv %s5414_s21  ;;  %v3384_v44 = vpop.permute.xlu0 %639  ;;  %s5514_s15 = sld [smem:[#allocation98_spill]] }
 0x176   :  { %v3324_v41 = vmul.f32 %v5465_v32, %v638_v43  ;;  %v3326_v33 = vadd.f32 %v682_v15, %v648_v50  ;;  %v700_v26 = vmul.f32 %v5466_v17, %v638_v43  ;;  %v706_v58 = vmul.f32 %v5467_v6, %v638_v43  ;;  %s5523_s18 = sld [smem:[#allocation99_spill]] }
 0x177   :  { %v5468_v4 = vstv %s5418_s2  ;;  %v3334_v52 = vadd.f32 %v688_v40, %v654_v35  ;;  %v3336_v61 = vadd.f32 %v694_v48, %v660_v11  ;;  %v836_v16 = vrot.slane %v3320_v7, 1  ;;  %s5526_s21 = sld [smem:[#allocation101_spill]] }
 0x178   :  { %v712_v20 = vmul.f32 %v5468_v4, %v638_v43  ;;  %v4949_v46 = vrot.slane %v3324_v41, 1  ;;  %v5469_v22 = vstv %s5423_s20  ;;  %v5470_v14 = vstv %s5426_s1  ;;  %s3584_s2 = sld [smem:[#allocation3 + $0x45]] }
 0x179   :  { %v3342_v30 = vmul.f32 %v5469_v22, %v638_v43  ;;  %v3346_v45 = vmul.f32 %v5470_v14, %v638_v43  ;;  %v5471_v59 = vstv %s5428_s0  ;;  %v5472_v39 = vstv %s5430_s3  ;;  %s3597_s16 = sld [smem:[#allocation3 + $0x60]] }
 0x17a   :  { %v3350_v36 = vmul.f32 %v5471_v59, %v638_v43  ;;  %v3354_v50 = vmul.f32 %v5472_v39, %v638_v43  ;;  %v3356_v38 = vadd.f32 %v700_v26, %v666_v28  ;;  %v3358_v35 = vadd.f32 %v706_v58, %v672_v2  ;;  %s3615_s5 = sld [smem:[#allocation3 + $0x7b]] }
 0x17b   :  { %v5473_v53 = vstv %s5435_s9  ;;  %v5475_v13 = vstv %s5438_s19  ;;  %v4948_v8 = vrot.slane %v3342_v30, 1  ;;  %v4947_v12 = vrot.slane %v3346_v45, 1  ;;  %s3624_s20 = sld [smem:[#allocation3 + $0x96]] }
 0x17c   :  { %v3362_v11 = vmul.f32 %v5473_v53, %v638_v43  ;;  %v3366_v51 = vmul.f32 %v5475_v13, %v638_v43  ;;  %v4946_v15 = vrot.slane %v3350_v36, 1  ;;  %v4945_v28 = vrot.slane %v3354_v50, 1  ;;  %s3633_s1 = sld [smem:[#allocation3 + $0x12]] }
 0x17d   :  { %v3372_v0 = vadd.f32 %v712_v20, %v678_v27  ;;  %v837_v2 = vsel %vm168_vm0, %v835_v1, %v836_v16  ;;  %v850_v40 = vsel %vm168_vm0, %v848_v23, %v4949_v46  ;;  %v5481_v34 = vstv %s5441_s4  ;;  %s5571_s0 = sld [smem:[#allocation104_spill]] }
 0x17e   :  { %5474 = vst [vmem:[#allocation131_spill] sm:$0xff] %v3362_v11  ;;  %5476 = vst [vmem:[#allocation122_spill] sm:$0xff] %v3366_v51  ;;  %v3382_v48 = vmul.f32 %v5481_v34, %v638_v43  ;;  %v863_v27 = vsel %vm168_vm0, %v861_v3, %v4948_v8  ;;  %v5485_v17 = vstv %s5443_s27  ;;  %v876_v23 = vsel %vm168_vm0, %v874_v24, %v4947_v12  ;;  %v5538_v12 = vld [vmem:[#allocation100_spill] sm:$0xff]  ;;  %s5573_s3 = sld [smem:[#allocation107_spill]] }
 0x17f   :  { %v3393_v26 = vmul.f32 %v5485_v17, %v638_v43  ;;  %v889_v6 = vsel %vm168_vm0, %v887_v55, %v4946_v15  ;;  %v902_v58 = vsel %vm168_vm0, %v900_v37, %v4945_v28  ;;  %v5488_v4 = vstv %s5477_s26  ;;  %s3647_s9 = sld [smem:[#allocation3 + $0x2d]] }
 0x180   :  { %5482 = vst [vmem:[#allocation129_spill] sm:$0xff] %v3382_v48  ;;  %v717_v20 = vmul.f32 %v5488_v4, %v3384_v44  ;;  %v5490_v22 = vstv %s5478_s6  ;;  %v5491_v24 = vstv %s5479_s24  ;;  %v5492_v39 = vstv %s5480_s23  ;;  %s5580_s19 = sld [smem:[#allocation109_spill]] }
 0x181   :  { %5486 = vst [vmem:[#allocation55_spill] sm:$0xff] %v3393_v26  ;;  %v723_v14 = vmul.f32 %v5490_v22, %v3384_v44  ;;  %v729_v59 = vmul.f32 %v5491_v24, %v3384_v44  ;;  %v735_v55 = vmul.f32 %v5492_v39, %v3384_v44  ;;  %v5493_v53 = vstv %s5444_s17  ;;  %s3663_s4 = sld [smem:[#allocation3 + $0x48]] }
 0x182   :  { %v3419_v13 = vmul.f32 %v5493_v53, %v638_v43  ;;  %v5495_v37 = vstv %s5448_s22  ;;  %v5497_v17 = vstv %s5483_s8  ;;  %v5498_v4 = vstv %s5484_s25  ;;  %s5588_s27 = sld [smem:[#allocation110_spill]] }
 0x183   :  { %v3423_v34 = vmul.f32 %v5495_v37, %v638_v43  ;;  %v741_v19 = vmul.f32 %v5497_v17, %v3384_v44  ;;  %v747_v18 = vmul.f32 %v5498_v4, %v3384_v44  ;;  %v719_v22 = vadd.f32 %v717_v20, %v3232_v57  ;;  %v5510_v20 = vld [vmem:[#allocation117_spill] sm:$0xff]  ;;  %s3682_s17 = sld [smem:[#allocation3 + $0x63]] }
 0x184   :  { %5494 = vst [vmem:[#allocation66_spill] sm:$0xff] %v3419_v13  ;;  %v725_v63 = vadd.f32 %v723_v14, %v3236_v21  ;;  %v731_v24 = vadd.f32 %v729_v59, %v3250_v29  ;;  %v737_v39 = vadd.f32 %v735_v55, %v3264_v54  ;;  %v5499_v43 = vstv %s5487_s29  ;;  %v5503_v21 = vld [vmem:[#allocation113_spill] sm:$0xff]  ;;  %v5505_v54 = vld [vmem:[#allocation115_spill] sm:$0xff]  ;;  %s3699_s22 = sld [smem:[#allocation3 + $0x7e]] }
 0x185   :  { %5496 = vst [vmem:[#allocation132_spill] sm:$0xff] %v3423_v34  ;;  %v743_v53 = vadd.f32 %v741_v19, %v3266_v10  ;;  %v749_v49 = vadd.f32 %v747_v18, %v3268_v42  ;;  %v3440_v37 = vmul.f32 %v5499_v43, %v3384_v44  ;;  %v5500_v17 = vstv %s5489_s10  ;;  %v5507_v19 = vld [vmem:[#allocation116_spill] sm:$0xff]  ;;  %v5511_v59 = vld [vmem:[#allocation118_spill] sm:$0xff]  ;;  %v5512_v43 = vld [vmem:[#allocation119_spill] sm:$0xff] }
 0x186   :  { %v3445_v4 = vmul.f32 %v5500_v17, %v3384_v44  ;;  %v762_v29 = vadd.f32 %v5503_v21, %v719_v22  ;;  %v775_v10 = vadd.f32 %v5505_v54, %v725_v63  ;;  %v788_v42 = vadd.f32 %v5507_v19, %v731_v24 }
 0x187   :  { %v801_v14 = vadd.f32 %v5510_v20, %v737_v39  ;;  %v814_v55 = vadd.f32 %v5511_v59, %v743_v53  ;;  %v827_v17 = vadd.f32 %v5512_v43, %v749_v49  ;;  %v913_v22 = vrot.slane %v3440_v37, 1 }
 0x188   :  { %v3456_v3 = vadd.f32 %v837_v2, %v762_v29  ;;  %v3460_v21 = vadd.f32 %v850_v40, %v775_v10  ;;  %v3462_v24 = vadd.f32 %v863_v27, %v788_v42  ;;  %v5515_v39 = vstv %s5501_s30 }
 0x189   :  { %v3467_v54 = vmul.f32 %v5515_v39, %v3384_v44  ;;  %v5516_v49 = vstv %s5502_s11  ;;  %v5517_v2 = vstv %s5504_s12  ;;  %v5518_v37 = vstv %s5506_s28 }
 0x18a   :  { %v3472_v53 = vmul.f32 %v5516_v49, %v3384_v44  ;;  %v3477_v29 = vmul.f32 %v5517_v2, %v3384_v44  ;;  %v3482_v19 = vmul.f32 %v5518_v37, %v3384_v44  ;;  %v5519_v40 = vstv %s5508_s13  ;;  %v3505_v2 = vpop.permute.xlu1 %641 }
 0x18b   :  { %v3487_v27 = vmul.f32 %v5519_v40, %v3384_v44  ;;  %v5520_v10 = vstv %s5509_s7  ;;  %v3494_v20 = vadd.f32 %v876_v23, %v801_v14  ;;  %v3496_v59 = vadd.f32 %v889_v6, %v814_v55 }
 0x18c   :  { %v3492_v42 = vmul.f32 %v5520_v10, %v3384_v44  ;;  %v3498_v43 = vadd.f32 %v902_v58, %v827_v17  ;;  %v5525_v39 = vstv %s5513_s14  ;;  %v939_v37 = vrot.slane %v3467_v54, 1 }
 0x18d   :  { %5521 = vst [vmem:[#allocation130_spill] sm:$0xff] %v3494_v20  ;;  %5522 = vst [vmem:[#allocation71_spill] sm:$0xff] %v3496_v59  ;;  %v3503_v49 = vmul.f32 %v5525_v39, %v3384_v44  ;;  %v5527_v6 = vstv %s5514_s15  ;;  %v5528_v39 = vstv %s5477_s26  ;;  %v5529_v57 = vstv %s5478_s6  ;;  %s5596_s26 = sld [smem:[#allocation111_spill]] }
 0x18e   :  { %5524 = vst [vmem:[#allocation57_spill] sm:$0xff] %v3498_v43  ;;  %v3513_v55 = vmul.f32 %v5527_v6, %v3384_v44  ;;  %v718_v54 = vmul.f32 %v5528_v39, %v3505_v2  ;;  %v724_v18 = vmul.f32 %v5529_v57, %v3505_v2  ;;  %v5530_v62 = vstv %s5479_s24  ;;  %s5599_s6 = sld [smem:[#allocation112_spill]] }
 0x18f   :  { %v730_v6 = vmul.f32 %v5530_v62, %v3505_v2  ;;  %v5531_v1 = vstv %s5480_s23  ;;  %v5532_v17 = vstv %s5523_s18  ;;  %v5533_v40 = vstv %s5526_s21  ;;  %s3717_s24 = sld [smem:[#allocation3 + $0x99]] }
 0x190   :  { %v736_v47 = vmul.f32 %v5531_v1, %v3505_v2  ;;  %v3534_v32 = vmul.f32 %v5532_v17, %v3384_v44  ;;  %v3539_v10 = vmul.f32 %v5533_v40, %v3384_v44  ;;  %v5534_v58 = vstv %s5483_s8  ;;  %s5602_s23 = sld [smem:[#allocation114_spill]] }
 0x191   :  { %v742_v39 = vmul.f32 %v5534_v58, %v3505_v2  ;;  %v5535_v14 = vstv %s5484_s25  ;;  %v720_v23 = vadd.f32 %v718_v54, %v3326_v33  ;;  %v726_v62 = vadd.f32 %v724_v18, %v3334_v52  ;;  %v5540_v33 = vld [vmem:[#allocation102_spill] sm:$0xff]  ;;  %v5542_v18 = vld [vmem:[#allocation103_spill] sm:$0xff]  ;;  %s3731_s8 = sld [smem:[#allocation3 + $0x13]] }
 0x192   :  { %v748_v57 = vmul.f32 %v5535_v14, %v3505_v2  ;;  %v732_v1 = vadd.f32 %v730_v6, %v3336_v61  ;;  %v738_v63 = vadd.f32 %v736_v47, %v3356_v38  ;;  %v5536_v44 = vstv %s5487_s29  ;;  %v5544_v47 = vld [vmem:[#allocation105_spill] sm:$0xff]  ;;  %s3741_s25 = sld [smem:[#allocation3 + $0x2e]] }
 0x193   :  { %v744_v17 = vadd.f32 %v742_v39, %v3358_v35  ;;  %v910_v40 = vmul.f32 %v5536_v44, %v3505_v2  ;;  %v5537_v58 = vstv %s5489_s10  ;;  %v5539_v14 = vrot.slane %v5538_v12, 1  ;;  %v5546_v39 = vld [vmem:[#allocation106_spill] sm:$0xff]  ;;  %s3759_s29 = sld [smem:[#allocation3 + $0x49]] }
 0x194   :  { %v750_v28 = vadd.f32 %v748_v57, %v3372_v0  ;;  %v923_v15 = vmul.f32 %v5537_v58, %v3505_v2  ;;  %v5541_v54 = vrot.slane %v5540_v33, 1  ;;  %v5543_v61 = vrot.slane %v5542_v18, 1  ;;  %v5548_v58 = vld [vmem:[#allocation108_spill] sm:$0xff]  ;;  %s3773_s10 = sld [smem:[#allocation3 + $0x64]] }
 0x195   :  { %v763_v8 = vadd.f32 %v5539_v14, %v720_v23  ;;  %v5545_v38 = vrot.slane %v5544_v47, 1  ;;  %v5547_v57 = vrot.slane %v5546_v39, 1  ;;  %v5549_v46 = vrot.slane %v5548_v58, 1 }
 0x196   :  { %v776_v52 = vadd.f32 %v5541_v54, %v726_v62  ;;  %v789_v6 = vadd.f32 %v5543_v61, %v732_v1  ;;  %v914_v23 = vrot.slane %v910_v40, 1  ;;  %v927_v14 = vrot.slane %v923_v15, 1 }
 0x197   :  { %v802_v35 = vadd.f32 %v5545_v38, %v738_v63  ;;  %v815_v44 = vadd.f32 %v5547_v57, %v744_v17  ;;  %v828_v12 = vadd.f32 %v5549_v46, %v750_v28  ;;  %v841_v63 = vadd.f32 %v836_v16, %v763_v8 }
 0x198   :  { %v5550_v33 = vrot.slane %v3324_v41, 1  ;;  %v5551_v17 = vrot.slane %v3342_v30, 1  ;;  %v5552_v46 = vrot.slane %v3346_v45, 1  ;;  %v5553_v40 = vrot.slane %v3350_v36, 1 }
 0x199   :  { %v5554_v47 = vrot.slane %v3354_v50, 1  ;;  %v3589_v16 = vsel %vm168_vm0, %v913_v22, %v914_v23  ;;  %v5555_v41 = vstv %s5501_s30  ;;  %v5556_v30 = vstv %s5502_s11  ;;  %s3779_s30 = sld [smem:[#allocation3 + $0x7f]] }
 0x19a   :  { %v854_v54 = vadd.f32 %v5550_v33, %v776_v52  ;;  %v867_v18 = vadd.f32 %v5551_v17, %v789_v6  ;;  %v880_v28 = vadd.f32 %v5552_v46, %v802_v35  ;;  %v893_v61 = vadd.f32 %v5553_v40, %v815_v44  ;;  %s3784_s11 = sld [smem:[#allocation3 + $0x9a]] }
 0x19b   :  { %v906_v7 = vadd.f32 %v5554_v47, %v828_v12  ;;  %v936_v8 = vmul.f32 %v5555_v41, %v3505_v2  ;;  %v949_v15 = vmul.f32 %v5556_v30, %v3505_v2  ;;  %v5557_v45 = vstv %s5504_s12  ;;  %v3645_v41 = vpop.permute.xlu1 %1224  ;;  %s3789_s12 = sld [smem:[#allocation3 + $0x14]] }
 0x19c   :  { %v962_v36 = vmul.f32 %v5557_v45, %v3505_v2  ;;  %v5558_v52 = vstv %s5506_s28  ;;  %v5559_v50 = vstv %s5508_s13  ;;  %v5561_v22 = vstv %s5509_s7  ;;  %5572 = vst [vmem:[#allocation123_spill] sm:$0xff] %v3645_v41  ;;  %s3795_s28 = sld [smem:[#allocation3 + $0x2f]] }
 0x19d   :  { %v975_v6 = vmul.f32 %v5558_v52, %v3505_v2  ;;  %v3608_v38 = vmul.f32 %v5559_v50, %v3505_v2  ;;  %v3613_v35 = vmul.f32 %v5561_v22, %v3505_v2  ;;  %v3617_v39 = vadd.f32 %v914_v23, %v841_v63  ;;  %v2012_v63 = vld [vmem:[#allocation5 + $0x18] sm:$0xff]  ;;  %s3799_s13 = sld [smem:[#allocation3 + $0x4a]] }
 0x19e   :  { %v5564_v57 = vrot.slane %v3445_v4, 1  ;;  %v940_v58 = vrot.slane %v936_v8, 1  ;;  %v953_v12 = vrot.slane %v949_v15, 1  ;;  %v3626_v33 = vadd.f32 %v927_v14, %v854_v54  ;;  %s3809_s7 = sld [smem:[#allocation3 + $0x65]] }
 0x19f   :  { %5560 = vst [vmem:[#allocation59_spill] sm:$0xff] %v3608_v38  ;;  %5562 = vst [vmem:[#allocation73_spill] sm:$0xff] %v3613_v35  ;;  %v966_v17 = vrot.slane %v962_v36, 1  ;;  %v979_v46 = vrot.slane %v975_v6, 1  ;;  %v5566_v40 = vstv %s5513_s14  ;;  %v5575_v30 = vrot.slane %v3472_v53, 1  ;;  %s3828_s14 = sld [smem:[#allocation3 + $0x80]] }
 0x1a0   :  { %5563 = vst [vmem:[#allocation74_spill] sm:$0xff] %v3617_v39  ;;  %v3622_v44 = vsel %vm168_vm0, %v5564_v57, %v927_v14  ;;  %5565 = vst [vmem:[#allocation75_spill] sm:$0xff] %v3626_v33  ;;  %v3631_v47 = vmul.f32 %v5566_v40, %v3505_v2  ;;  %v3636_v4 = vsel %vm168_vm0, %v939_v37, %v940_v58  ;;  %v5569_v14 = vstv %s5514_s15  ;;  %s3850_s15 = sld [smem:[#allocation3 + $0x15]] }
 0x1a1   :  { %5568 = vst [vmem:[#allocation63_spill] sm:$0xff] %v3636_v4  ;;  %v3643_v54 = vmul.f32 %v5569_v14, %v3505_v2  ;;  %v3649_v8 = vadd.f32 %v940_v58, %v867_v18  ;;  %v3654_v37 = vsel %vm168_vm0, %v5575_v30, %v953_v12  ;;  %v3656_v15 = vadd.f32 %v953_v12, %v880_v28 }
 0x1a2   :  { %5567 = vst [vmem:[#allocation61_spill] sm:$0xff] %v3631_v47  ;;  %5576 = vst [vmem:[#allocation125_spill] sm:$0xff] %v3654_v37  ;;  %v5578_v45 = vrot.slane %v3477_v29, 1  ;;  %v3665_v52 = vadd.f32 %v966_v17, %v893_v61  ;;  %v5582_v18 = vrot.slane %v3482_v19, 1  ;;  %v5584_v6 = vstv %s5523_s18  ;;  %v3687_v19 = vpop.permute.xlu0 %1222  ;;  %s3878_s18 = sld [smem:[#allocation3 + $0x30]] }
 0x1a3   :  { %5570 = vst [vmem:[#allocation65_spill] sm:$0xff] %v3643_v54  ;;  %5574 = vst [vmem:[#allocation124_spill] sm:$0xff] %v3649_v8  ;;  %v3675_v28 = vmul.f32 %v5584_v6, %v3505_v2  ;;  %v5586_v29 = vstv %s5526_s21  ;;  %v3684_v22 = vadd.f32 %v979_v46, %v906_v7  ;;  %v5591_v57 = vstv %s5571_s0  ;;  %s3906_s21 = sld [smem:[#allocation3 + $0x4b]] }
 0x1a4   :  { %5577 = vst [vmem:[#allocation126_spill] sm:$0xff] %v3656_v15  ;;  %v3661_v36 = vsel %vm168_vm0, %v5578_v45, %v966_v17  ;;  %5581 = vst [vmem:[#allocation128_spill] sm:$0xff] %v3665_v52  ;;  %v3670_v53 = vsel %vm168_vm0, %v5582_v18, %v979_v46  ;;  %v3680_v50 = vmul.f32 %v5586_v29, %v3505_v2  ;;  %v5593_v12 = vstv %s5573_s3  ;;  %v5616_v15 = vld [vmem:[#allocation121_spill] sm:$0xff]  ;;  %s4012_s0 = sld [smem:[#allocation3 + $0x17]] }
 0x1a5   :  { %5579 = vst [vmem:[#allocation127_spill] sm:$0xff] %v3661_v36  ;;  %5583 = vst [vmem:[#allocation133_spill] sm:$0xff] %v3670_v53  ;;  %v3692_v58 = vmul.f32 %v5591_v57, %v3645_v41  ;;  %v3697_v17 = vmul.f32 %v5593_v12, %v3645_v41  ;;  %v5595_v7 = vmov %v5591_v57  ;;  %v5597_v40 = vmov %v5593_v12  ;;  %s4018_s3 = sld [smem:[#allocation3 + $0x32]] }
 0x1a6   :  { %5585 = vst [vmem:[#allocation134_spill] sm:$0xff] %v3675_v28  ;;  %5587 = vst [vmem:[#allocation86_spill] sm:$0xff] %v3680_v50  ;;  %v3705_v46 = vmul.f32 %v5595_v7, %v3687_v19  ;;  %v3710_v14 = vmul.f32 %v5597_v40, %v3687_v19  ;;  %v5598_v30 = vstv %s5580_s19  ;;  %v5603_v12 = vstv %s5588_s27  ;;  %s4030_s19 = sld [smem:[#allocation3 + $0x4d]] }
 0x1a7   :  { %5589 = vst [vmem:[#allocation87_spill] sm:$0xff] %v3684_v22  ;;  %5590 = vst [vmem:[#allocation88_spill] sm:$0xff] %v3687_v19  ;;  %v3715_v45 = vmul.f32 %v5598_v30, %v3645_v41  ;;  %v5601_v29 = vmov %v5598_v30  ;;  %v3729_v7 = vmul.f32 %v5603_v12, %v3645_v41  ;;  %v5605_v6 = vmov %v5603_v12  ;;  %s4036_s27 = sld [smem:[#allocation3 + $0x68]] }
 0x1a8   :  { %5592 = vst [vmem:[#allocation89_spill] sm:$0xff] %v3692_v58  ;;  %5594 = vst [vmem:[#allocation90_spill] sm:$0xff] %v3697_v17  ;;  %v3724_v57 = vmul.f32 %v5601_v29, %v3687_v19  ;;  %v3739_v62 = vmul.f32 %v5605_v6, %v3687_v19  ;;  %v5606_v12 = vstv %s5596_s26  ;;  %v5609_v30 = vstv %s5599_s6  ;;  %v2011_v29 = vld [vmem:[#allocation5 + $0x10] sm:$0xff]  ;;  %s4041_s26 = sld [smem:[#allocation3 + $0x83]] }
 0x1a9   :  { %5600 = vst [vmem:[#allocation91_spill] sm:$0xff] %v3715_v45  ;;  %5604 = vst [vmem:[#allocation92_spill] sm:$0xff] %v3729_v7  ;;  %v3747_v18 = vmul.f32 %v5606_v12, %v3687_v19  ;;  %v5607_v0 = vmov %v5606_v12  ;;  %v3757_v40 = vmul.f32 %v5609_v30, %v3687_v19  ;;  %v5610_v6 = vmov %v5609_v30  ;;  %v5615_v30 = vld [vmem:[#allocation120_spill] sm:$0xff]  ;;  %s4051_s6 = sld [smem:[#allocation3 + $0x9e]] }
 0x1aa   :  { %v3752_v2 = vmul.f32 %v5607_v0, %v3645_v41  ;;  %v3764_v1 = vmul.f32 %v5610_v6, %v3645_v41  ;;  %v5612_v61 = vstv %s5602_s23  ;;  %v1012_v0 = vstv %s3584_s2  ;;  %s3912_s2 = sld [smem:[#allocation3 + $0x66]] }
 0x1ab   :  { %v1000_v12 = vmul.f32 %v2011_v29, %v5612_v61  ;;  %v5613_v23 = vmov %v5612_v61  ;;  %v991_v52 = vrot.slane %v5615_v30, 2  ;;  %v1013_v33 = vmul.f32 %v2011_v29, %v1012_v0  ;;  %s4058_s23 = sld [smem:[#allocation3 + $0x1a]] }
 0x1ac   :  { %5608 = vst [vmem:[#allocation93_spill] sm:$0xff] %v3752_v2  ;;  %5611 = vst [vmem:[#allocation94_spill] sm:$0xff] %v3764_v1  ;;  %v3770_v22 = vmul.f32 %v2012_v63, %v5613_v23  ;;  %v3777_v39 = vmul.f32 %v2012_v63, %v1012_v0  ;;  %v1025_v41 = vstv %s3597_s16  ;;  %v1038_v53 = vstv %s3615_s5  ;;  %s3942_s16 = sld [smem:[#allocation3 + $0x81]] }
 0x1ad   :  { %v1004_v6 = vrot.slane %v1000_v12, 2  ;;  %v1017_v23 = vrot.slane %v1013_v33, 2  ;;  %v1026_v36 = vmul.f32 %v2011_v29, %v1025_v41  ;;  %v3787_v30 = vmul.f32 %v2012_v63, %v1025_v41  ;;  %s3948_s5 = sld [smem:[#allocation3 + $0x9c]] }
 0x1ae   :  { %5614 = vst [vmem:[#allocation95_spill] sm:$0xff] %v3770_v22  ;;  %5617 = vst [vmem:[#allocation96_spill] sm:$0xff] %v3777_v39  ;;  %v1039_v8 = vmul.f32 %v2011_v29, %v1038_v53  ;;  %v3792_v59 = vmul.f32 %v2012_v63, %v1038_v53  ;;  %v1051_v12 = vstv %s3624_s20  ;;  %v5620_v41 = vrot.slane %v5616_v15, 2  ;;  %s3994_s20 = sld [smem:[#allocation3 + $0x9b]] }
 0x1af   :  { %5618 = vst [vmem:[#allocation97_spill] sm:$0xff] %v3787_v30  ;;  %v1030_v37 = vrot.slane %v1026_v36, 2  ;;  %v1052_v20 = vmul.f32 %v2011_v29, %v1051_v12  ;;  %v3807_v4 = vmul.f32 %v2012_v63, %v1051_v12  ;;  %v5622_v61 = vrot.slane %v3770_v22, 2  ;;  %5662 = sst [smem:[#allocation9_spill]] %s4030_s19 }
 0x1b0   :  { %5619 = vst [vmem:[#allocation113_spill] sm:$0xff] %v3792_v59  ;;  %v3804_v43 = vsel %vm403_vm1, %v991_v52, %v5620_v41  ;;  %v1043_v0 = vrot.slane %v1039_v8, 2  ;;  %v4954_v53 = vrot.slane %v3792_v59, 2  ;;  %v5623_v29 = vrot.slane %v3777_v39, 2  ;;  %5663 = sst [smem:[#allocation10_spill]] %s4036_s27 }
 0x1b1   :  { %5621 = vst [vmem:[#allocation115_spill] sm:$0xff] %v3807_v4  ;;  %v3814_v36 = vsel %vm403_vm1, %v1004_v6, %v5622_v61  ;;  %v1056_v15 = vrot.slane %v1052_v20, 2  ;;  %v5624_v52 = vrot.slane %v3362_v11, 2  ;;  %v5625_v8 = vrot.slane %v3272_v31, 2  ;;  %5664 = sst [smem:[#allocation11_spill]] %s4041_s26 }
 0x1b2   :  { %v3819_v33 = vsel %vm403_vm1, %v1017_v23, %v5623_v29  ;;  %v5626_v12 = vrot.slane %v3787_v30, 2  ;;  %v4953_v61 = vrot.slane %v3807_v4, 2  ;;  %v5627_v20 = vrot.slane %v3366_v51, 2  ;;  %5665 = sst [smem:[#allocation15_spill]] %s4051_s6 }
 0x1b3   :  { %v3826_v63 = vsel %vm403_vm1, %v5625_v8, %v5624_v52  ;;  %v5628_v23 = vrot.slane %v3279_v5, 2  ;;  %v5629_v41 = vrot.slane %v3382_v48, 2  ;;  %v5630_v29 = vrot.slane %v3284_v25, 2  ;;  %v4021_v48 = vld [vmem:[#allocation5 + $0x28] sm:$0xff] }
 0x1b4   :  { %v3833_v6 = vsel %vm403_vm1, %v1030_v37, %v5626_v12  ;;  %v3855_v37 = vsel %vm403_vm1, %v1043_v0, %v4954_v53  ;;  %v5631_v5 = vrot.slane %v3393_v26, 2  ;;  %v5632_v8 = vrot.slane %v3288_v56, 2 }
 0x1b5   :  { %v3841_v31 = vsel %vm403_vm1, %v5628_v23, %v5627_v20  ;;  %v3848_v52 = vsel %vm403_vm1, %v5630_v29, %v5629_v41  ;;  %v5633_v25 = vrot.slane %v3419_v13, 2  ;;  %v5634_v20 = vrot.slane %v3292_v60, 2 }
 0x1b6   :  { %v3862_v12 = vsel %vm403_vm1, %v5632_v8, %v5631_v5  ;;  %v5635_v41 = vrot.slane %v3423_v34, 2  ;;  %v5636_v29 = vrot.slane %v3299_v9, 2  ;;  %v3883_v56 = vsel %vm403_vm1, %v1056_v15, %v4953_v61 }
 0x1b7   :  { %v3869_v23 = vsel %vm403_vm1, %v5634_v20, %v5633_v25  ;;  %v5637_v60 = vrot.slane %v3608_v38, 2  ;;  %v5638_v5 = vrot.slane %v3487_v27, 2  ;;  %v5639_v9 = vrot.slane %v3613_v35, 2 }
 0x1b8   :  { %v3876_v0 = vsel %vm403_vm1, %v5636_v29, %v5635_v41  ;;  %v5640_v25 = vrot.slane %v3492_v42, 2  ;;  %v5641_v41 = vrot.slane %v3631_v47, 2  ;;  %v5642_v15 = vrot.slane %v3503_v49, 2 }
 0x1b9   :  { %v3890_v8 = vsel %vm403_vm1, %v5638_v5, %v5637_v60  ;;  %v4955_v27 = vstv %s3633_s1  ;;  %v4957_v60 = vstv %s3647_s9  ;;  %v5644_v49 = vrot.slane %v3513_v55, 2  ;;  %v3935_v55 = vld [vmem:[#allocation5 + $0x20] sm:$0xff] }
 0x1ba   :  { %v3897_v20 = vsel %vm403_vm1, %v5640_v25, %v5639_v9  ;;  %v3904_v29 = vsel %vm403_vm1, %v5642_v15, %v5641_v41  ;;  %v5643_v9 = vrot.slane %v3643_v54, 2  ;;  %v5645_v41 = vrot.slane %v3675_v28, 2 }
 0x1bb   :  { %v5646_v15 = vrot.slane %v3534_v32, 2  ;;  %v5647_v53 = vrot.slane %v3680_v50, 2  ;;  %v5648_v5 = vrot.slane %v3539_v10, 2  ;;  %v5651_v10 = vstv %s3699_s22 }
 0x1bc   :  { %v3919_v25 = vsel %vm403_vm1, %v5644_v49, %v5643_v9  ;;  %v3940_v9 = vmul.f32 %v3935_v55, %v4955_v27  ;;  %v5650_v27 = vstv %s3682_s17  ;;  %v4964_v49 = vstv %s3759_s29 }
 0x1bd   :  { %v3926_v61 = vsel %vm403_vm1, %v5646_v15, %v5645_v41  ;;  %v3933_v42 = vsel %vm403_vm1, %v5648_v5, %v5647_v53  ;;  %v3953_v53 = vmul.f32 %v3935_v55, %v4957_v60  ;;  %v5649_v5 = vstv %s3663_s4 }
 0x1be   :  { %v3958_v15 = vmul.f32 %v3935_v55, %v5649_v5  ;;  %v3963_v32 = vmul.f32 %v3935_v55, %v5650_v27  ;;  %v3968_v41 = vmul.f32 %v3935_v55, %v5651_v10  ;;  %v4966_v50 = vstv %s3773_s10 }
 0x1bf   :  { %v4968_v60 = vstv %s3779_s30  ;;  %v5652_v54 = vstv %s3717_s24  ;;  %v5653_v47 = vstv %s3731_s8  ;;  %v5654_v35 = vstv %s3741_s25 }
 0x1c0   :  { %v3977_v5 = vmul.f32 %v3935_v55, %v5652_v54  ;;  %v3982_v27 = vmul.f32 %v5653_v47, %v3687_v19  ;;  %v3987_v38 = vmul.f32 %v5654_v35, %v3687_v19  ;;  %v3992_v10 = vmul.f32 %v4964_v49, %v3687_v19 }
 0x1c1   :  { %v3999_v28 = vmul.f32 %v4966_v50, %v3687_v19  ;;  %v4004_v54 = vmul.f32 %v4968_v60, %v3687_v19  ;;  %v5659_v47 = vstv %s3784_s11  ;;  %v1339_v50 = vstv %s3850_s15  ;;  %s4062_s15 = sld [smem:[#allocation3 + $0x35]] }
 0x1c2   :  { %5655 = vst [vmem:[#allocation116_spill] sm:$0xff] %v3987_v38  ;;  %5656 = vst [vmem:[#allocation117_spill] sm:$0xff] %v3992_v10  ;;  %v4009_v35 = vmul.f32 %v5659_v47, %v3687_v19  ;;  %v1352_v26 = vstv %s3878_s18  ;;  %v1340_v60 = vmul.f32 %v3935_v55, %v1339_v50  ;;  %v4024_v47 = vmul.f32 %v4021_v48, %v1339_v50  ;;  %s4069_s18 = sld [smem:[#allocation3 + $0x50]] }
 0x1c3   :  { %5657 = vst [vmem:[#allocation118_spill] sm:$0xff] %v3999_v28  ;;  %5658 = vst [vmem:[#allocation119_spill] sm:$0xff] %v4004_v54  ;;  %v1353_v34 = vmul.f32 %v3935_v55, %v1352_v26  ;;  %v4028_v19 = vmul.f32 %v4021_v48, %v1352_v26  ;;  %v1365_v49 = vstv %s3906_s21  ;;  %v1378_v51 = vstv %s3912_s2  ;;  %s4079_s21 = sld [smem:[#allocation3 + $0x6b]] }
 0x1c4   :  { %5660 = vst [vmem:[#allocation100_spill] sm:$0xff] %v4009_v35  ;;  %5661 = vst [vmem:[#allocation102_spill] sm:$0xff] %v4024_v47  ;;  %v1391_v11 = vstv %s3942_s16  ;;  %v1344_v59 = vrot.slane %v1340_v60, 1  ;;  %v1404_v39 = vstv %s3948_s5  ;;  %v1366_v50 = vmul.f32 %v3935_v55, %v1365_v49  ;;  %s4088_s2 = sld [smem:[#allocation3 + $0x86]] }
 0x1c5   :  { %v4045_v26 = vmul.f32 %v4021_v48, %v1365_v49  ;;  %v1379_v22 = vmul.f32 %v3935_v55, %v1378_v51  ;;  %v4049_v13 = vmul.f32 %v4021_v48, %v1378_v51  ;;  %v1357_v4 = vrot.slane %v1353_v34, 1  ;;  %s4186_s16 = sld [smem:[#allocation3 + $0xa1]] }
 0x1c6   :  { %v1392_v30 = vmul.f32 %v3935_v55, %v1391_v11  ;;  %v4056_v35 = vmul.f32 %v4021_v48, %v1391_v11  ;;  %v1370_v49 = vrot.slane %v1366_v50, 1  ;;  %v1405_v60 = vmul.f32 %v3935_v55, %v1404_v39  ;;  %s4242_s5 = sld [smem:[#allocation3 + $0x18]] }
 0x1c7   :  { %v1383_v28 = vrot.slane %v1379_v22, 1  ;;  %5666 = sst [smem:[#allocation16_spill]] %s4062_s15  ;;  %v4067_v38 = vmul.f32 %v4021_v48, %v1404_v39  ;;  %v5667_v50 = vrot.slane %v4024_v47, 1  ;;  %v1422_v22 = vrot.slane %v3705_v46, 1 }
 0x1c8   :  { %v1396_v10 = vrot.slane %v1392_v30, 1  ;;  %v1435_v51 = vrot.slane %v3710_v14, 1  ;;  %v5668_v30 = vrot.slane %v4028_v19, 1  ;;  %v1409_v39 = vrot.slane %v1405_v60, 1 }
 0x1c9   :  { %v4075_v54 = vsel %vm168_vm0, %v1344_v59, %v5667_v50  ;;  %v4981_v11 = vrot.slane %v4067_v38, 1  ;;  %v1448_v47 = vrot.slane %v3724_v57, 1  ;;  %v5669_v59 = vrot.slane %v4045_v26, 1 }
 0x1ca   :  { %v4084_v34 = vsel %vm168_vm0, %v1357_v4, %v5668_v30  ;;  %v5670_v14 = vrot.slane %v4049_v13, 1  ;;  %v1461_v60 = vrot.slane %v3739_v62, 1  ;;  %v1474_v57 = vrot.slane %v3747_v18, 1 }
 0x1cb   :  { %v4093_v46 = vsel %vm168_vm0, %v1370_v49, %v5669_v59  ;;  %v5671_v50 = vrot.slane %v4056_v35, 1  ;;  %v5672_v49 = vrot.slane %v3692_v58, 1  ;;  %v1487_v18 = vrot.slane %v3757_v40, 1  ;;  %5687 = sst [smem:[#allocation17_spill]] %s4186_s16 }
 0x1cc   :  { %v4098_v4 = vsel %vm168_vm0, %v1383_v28, %v5670_v14  ;;  %v5673_v28 = vrot.slane %v3697_v17, 1  ;;  %v4121_v14 = vsel %vm168_vm0, %v1409_v39, %v4981_v11  ;;  %v5683_v17 = vld [vmem:[#allocation57_spill] sm:$0xff]  ;;  %v5684_v11 = vld [vmem:[#allocation133_spill] sm:$0xff] }
 0x1cd   :  { %v4105_v30 = vsel %vm168_vm0, %v1396_v10, %v5671_v50  ;;  %v4110_v59 = vsel %vm168_vm0, %v1422_v22, %v5672_v49  ;;  %v5674_v10 = vrot.slane %v3715_v45, 1  ;;  %v5675_v22 = vrot.slane %v3729_v7, 1  ;;  %v5681_v45 = vld [vmem:[#allocation71_spill] sm:$0xff] }
 0x1ce   :  { %v4115_v62 = vsel %vm168_vm0, %v1435_v51, %v5673_v28  ;;  %v5676_v51 = vrot.slane %v3752_v2, 1  ;;  %v5677_v28 = vrot.slane %v3764_v1, 1  ;;  %v918_v2 = vadd.f32 %v3589_v16, %v3456_v3 }
 0x1cf   :  { %v4126_v50 = vsel %vm168_vm0, %v1448_v47, %v5674_v10  ;;  %v4131_v49 = vsel %vm168_vm0, %v1461_v60, %v5675_v22  ;;  %v5679_v47 = vld [vmem:[#allocation130_spill] sm:$0xff]  ;;  %v5680_v10 = vld [vmem:[#allocation125_spill] sm:$0xff]  ;;  %v5682_v60 = vld [vmem:[#allocation127_spill] sm:$0xff]  ;;  %v983_v1 = vadd.f32 %v5684_v11, %v5683_v17  ;;  %v4995_v3 = vstv %s4079_s21 }
 0x1d0   :  { %v4137_v40 = vsel %vm168_vm0, %v1474_v57, %v5676_v51  ;;  %v4142_v39 = vsel %vm168_vm0, %v1487_v18, %v5677_v28  ;;  %v931_v57 = vadd.f32 %v3622_v44, %v3460_v21  ;;  %v4156_v51 = vpop.permute.xlu0 %1226  ;;  %v5678_v18 = vld [vmem:[#allocation63_spill] sm:$0xff]  ;;  %v957_v7 = vadd.f32 %v5680_v10, %v5679_v47 }
 0x1d1   :  { %v944_v28 = vadd.f32 %v5678_v18, %v3462_v24  ;;  %v970_v22 = vadd.f32 %v5682_v60, %v5681_v45  ;;  %v4994_v16 = vstv %s4088_s2  ;;  %v996_v21 = vadd.f32 %v3804_v43, %v918_v2 }
 0x1d2   :  { %v1009_v44 = vadd.f32 %v3814_v36, %v931_v57  ;;  %v1035_v24 = vadd.f32 %v3833_v6, %v957_v7  ;;  %v1061_v10 = vadd.f32 %v3883_v56, %v983_v1  ;;  %v5685_v11 = vstv %s3789_s12 }
 0x1d3   :  { %v1022_v58 = vadd.f32 %v3819_v33, %v944_v28  ;;  %v1048_v47 = vadd.f32 %v3855_v37, %v970_v22  ;;  %v1074_v45 = vadd.f32 %v3826_v63, %v996_v21  ;;  %v1304_v60 = vmul.f32 %v5685_v11, %v4156_v51  ;;  %v5692_v21 = vld [vmem:[#allocation116_spill] sm:$0xff] }
 0x1d4   :  { %v1087_v17 = vadd.f32 %v3841_v31, %v1009_v44  ;;  %v5686_v43 = vstv %s3795_s28  ;;  %v1113_v7 = vadd.f32 %v3862_v12, %v1035_v24  ;;  %v1139_v1 = vadd.f32 %v3876_v0, %v1061_v10 }
 0x1d5   :  { %v1310_v2 = vmul.f32 %v5686_v43, %v4156_v51  ;;  %v1100_v33 = vadd.f32 %v3848_v52, %v1022_v58  ;;  %v1126_v36 = vadd.f32 %v3869_v23, %v1048_v47  ;;  %v1152_v63 = vadd.f32 %v3890_v8, %v1074_v45 }
 0x1d6   :  { %v1165_v6 = vadd.f32 %v3897_v20, %v1087_v17  ;;  %v5688_v31 = vstv %s3799_s13  ;;  %v5689_v56 = vstv %s3809_s7  ;;  %v1191_v12 = vadd.f32 %v3919_v25, %v1113_v7 }
 0x1d7   :  { %v1316_v37 = vmul.f32 %v5688_v31, %v4156_v51  ;;  %v1322_v58 = vmul.f32 %v5689_v56, %v4156_v51  ;;  %v1178_v52 = vadd.f32 %v3904_v29, %v1100_v33  ;;  %v1204_v23 = vadd.f32 %v3926_v61, %v1126_v36 }
 0x1d8   :  { %v1217_v0 = vadd.f32 %v3933_v42, %v1139_v1  ;;  %v1234_v8 = vadd.f32 %v3940_v9, %v1152_v63  ;;  %v1240_v20 = vadd.f32 %v3953_v53, %v1165_v6  ;;  %v5690_v22 = vstv %s3828_s14 }
 0x1d9   :  { %v1328_v57 = vmul.f32 %v5690_v22, %v4156_v51  ;;  %v5691_v18 = vstv %s3994_s20  ;;  %v1246_v29 = vadd.f32 %v3958_v15, %v1178_v52  ;;  %v1252_v25 = vadd.f32 %v3963_v32, %v1191_v12  ;;  %v5695_v15 = vld [vmem:[#allocation117_spill] sm:$0xff]  ;;  %v5696_v32 = vld [vmem:[#allocation118_spill] sm:$0xff] }
 0x1da   :  { %v1334_v28 = vmul.f32 %v5691_v18, %v4156_v51  ;;  %v1258_v61 = vadd.f32 %v3968_v41, %v1204_v23  ;;  %v1264_v42 = vadd.f32 %v3977_v5, %v1217_v0  ;;  %v1270_v9 = vadd.f32 %v3982_v27, %v1234_v8  ;;  %v5697_v41 = vld [vmem:[#allocation119_spill] sm:$0xff]  ;;  %v5698_v5 = vld [vmem:[#allocation100_spill] sm:$0xff] }
 0x1db   :  { %v1276_v53 = vadd.f32 %v5692_v21, %v1240_v20  ;;  %v5693_v44 = vstv %s4012_s0  ;;  %v5694_v47 = vstv %s4018_s3  ;;  %v1282_v45 = vadd.f32 %v5695_v15, %v1246_v29 }
 0x1dc   :  { %v4217_v24 = vmul.f32 %v5693_v44, %v4156_v51  ;;  %v4222_v10 = vmul.f32 %v5694_v47, %v4156_v51  ;;  %v1288_v17 = vadd.f32 %v5696_v32, %v1252_v25  ;;  %v1294_v11 = vadd.f32 %v5697_v41, %v1258_v61 }
 0x1dd   :  { %v1300_v43 = vadd.f32 %v5698_v5, %v1264_v42  ;;  %v1306_v27 = vadd.f32 %v1304_v60, %v1270_v9  ;;  %v1312_v33 = vadd.f32 %v1310_v2, %v1276_v53  ;;  %v5699_v7 = vstv %s4030_s19  ;;  %s4262_s19 = sld [smem:[#allocation3 + $0x4e]] }
 0x1de   :  { %v4231_v36 = vmul.f32 %v5699_v7, %v4156_v51  ;;  %v5700_v1 = vstv %s4036_s27  ;;  %v1318_v6 = vadd.f32 %v1316_v37, %v1282_v45  ;;  %v1324_v31 = vadd.f32 %v1322_v58, %v1288_v17  ;;  %s4248_s27 = sld [smem:[#allocation3 + $0x33]] }
 0x1df   :  { %v4236_v63 = vmul.f32 %v5700_v1, %v4156_v51  ;;  %v1330_v56 = vadd.f32 %v1328_v57, %v1294_v11  ;;  %v1336_v52 = vadd.f32 %v1334_v28, %v1300_v43  ;;  %v4993_v12 = vstv %s4186_s16  ;;  %s4342_s16 = sld [smem:[#allocation3 + $0x19]] }
 0x1e0   :  { %v1349_v23 = vadd.f32 %v4075_v54, %v1306_v27  ;;  %v1362_v60 = vadd.f32 %v4084_v34, %v1312_v33  ;;  %v1375_v0 = vadd.f32 %v4093_v46, %v1318_v6  ;;  %v1388_v8 = vadd.f32 %v4098_v4, %v1324_v31 }
 0x1e1   :  { %v1401_v37 = vadd.f32 %v4105_v30, %v1330_v56  ;;  %v1414_v54 = vadd.f32 %v4121_v14, %v1336_v52  ;;  %v5701_v20 = vstv %s4041_s26  ;;  %v5702_v4 = vstv %s4051_s6  ;;  %s4274_s26 = sld [smem:[#allocation3 + $0x69]]  ;;  %v5718_v52 = vld [vmem:[#allocation123_spill] sm:$0xff] }
 0x1e2   :  { %v4255_v46 = vmul.f32 %v5701_v20, %v4156_v51  ;;  %v4260_v30 = vmul.f32 %v5702_v4, %v4156_v51  ;;  %v4265_v22 = vadd.f32 %v4110_v59, %v1349_v23  ;;  %v4268_v14 = vadd.f32 %v4115_v62, %v1362_v60  ;;  %s4292_s6 = sld [smem:[#allocation3 + $0x84]] }
 0x1e3   :  { %v4271_v57 = vadd.f32 %v4126_v50, %v1375_v0  ;;  %v4277_v28 = vadd.f32 %v4131_v49, %v1388_v8  ;;  %v4280_v29 = vadd.f32 %v4137_v40, %v1401_v37  ;;  %v5703_v59 = vstv %s4058_s23 }
 0x1e4   :  { %v4285_v25 = vmul.f32 %v5703_v59, %v4156_v51  ;;  %v5705_v62 = vstv %s4062_s15  ;;  %v5707_v61 = vstv %s4069_s18  ;;  %v4302_v49 = vmul.f32 %v4995_v3, %v4156_v51  ;;  %s4314_s15 = sld [smem:[#allocation3 + $0x9f]] }
 0x1e5   :  { %v4290_v50 = vmul.f32 %v5705_v62, %v4156_v51  ;;  %v4297_v42 = vmul.f32 %v5707_v61, %v4156_v51  ;;  %v4307_v40 = vmul.f32 %v4994_v16, %v4156_v51  ;;  %v4312_v9 = vmul.f32 %v4993_v12, %v4156_v51 }
 0x1e6   :  { %5704 = vst [vmem:[#allocation103_spill] sm:$0xff] %v4285_v25  ;;  %5709 = vst [vmem:[#allocation108_spill] sm:$0xff] %v4302_v49  ;;  %v4317_v21 = vadd.f32 %v4142_v39, %v1414_v54  ;;  %v5712_v45 = vstv %s3633_s1  ;;  %v5713_v39 = vstv %s3647_s9  ;;  %v5714_v43 = vstv %s3663_s4  ;;  %s4364_s1 = sld [smem:[#allocation3 + $0x34]]  ;;  %v5745_v49 = vld [vmem:[#allocation126_spill] sm:$0xff]  ;;  %v5748_v25 = vld [vmem:[#allocation128_spill] sm:$0xff] }
 0x1e7   :  { %5706 = vst [vmem:[#allocation105_spill] sm:$0xff] %v4290_v50  ;;  %5708 = vst [vmem:[#allocation106_spill] sm:$0xff] %v4297_v42  ;;  %v4327_v32 = vmul.f32 %v4021_v48, %v5712_v45  ;;  %v4332_v17 = vmul.f32 %v4021_v48, %v5713_v39  ;;  %v4340_v27 = vmul.f32 %v4021_v48, %v5714_v43  ;;  %v5715_v33 = vstv %s3682_s17  ;;  %s4378_s9 = sld [smem:[#allocation3 + $0x4f]] }
 0x1e8   :  { %5710 = vst [vmem:[#allocation120_spill] sm:$0xff] %v4307_v40  ;;  %5711 = vst [vmem:[#allocation63_spill] sm:$0xff] %v4312_v9  ;;  %v4347_v7 = vmul.f32 %v4021_v48, %v5715_v33  ;;  %v5716_v1 = vstv %s3699_s22  ;;  %v5717_v31 = vstv %s3717_s24  ;;  %v5719_v23 = vstv %s3731_s8  ;;  %s4388_s4 = sld [smem:[#allocation3 + $0x6a]] }
 0x1e9   :  { %v4352_v6 = vmul.f32 %v4021_v48, %v5716_v1  ;;  %v4357_v56 = vmul.f32 %v4021_v48, %v5717_v31  ;;  %v4362_v60 = vmul.f32 %v5719_v23, %v5718_v52  ;;  %v5720_v0 = vstv %s3741_s25  ;;  %s4398_s17 = sld [smem:[#allocation3 + $0x85]] }
 0x1ea   :  { %v4369_v8 = vmul.f32 %v5720_v0, %v5718_v52  ;;  %v5721_v37 = vstv %s3759_s29  ;;  %v1573_v20 = vstv %s4242_s5  ;;  %v1586_v4 = vstv %s4248_s27  ;;  %s4415_s22 = sld [smem:[#allocation3 + $0xa0]] }
 0x1eb   :  { %v4374_v54 = vmul.f32 %v5721_v37, %v5718_v52  ;;  %v1574_v59 = vmul.f32 %v3935_v55, %v1573_v20  ;;  %v4382_v62 = vmul.f32 %v4021_v48, %v1573_v20  ;;  %v1587_v61 = vmul.f32 %v3935_v55, %v1586_v4  ;;  %s5792_s24 = sld [smem:[#allocation9_spill]] }
 0x1ec   :  { %v4386_v45 = vmul.f32 %v4021_v48, %v1586_v4  ;;  %v5722_v39 = vstv %s3773_s10  ;;  %v1599_v33 = vstv %s4262_s19  ;;  %v1612_v1 = vstv %s4274_s26  ;;  %s5794_s8 = sld [smem:[#allocation10_spill]] }
 0x1ed   :  { %v4393_v43 = vmul.f32 %v5722_v39, %v5718_v52  ;;  %v1625_v31 = vstv %s4292_s6  ;;  %v5723_v23 = vstv %s3779_s30  ;;  %v1578_v37 = vrot.slane %v1574_v59, 2  ;;  %s5796_s25 = sld [smem:[#allocation11_spill]] }
 0x1ee   :  { %v4403_v0 = vmul.f32 %v5723_v23, %v5718_v52  ;;  %v4996_v20 = vrot.slane %v4382_v62, 2  ;;  %v1638_v4 = vstv %s4314_s15  ;;  %v1600_v5 = vmul.f32 %v3935_v55, %v1599_v33  ;;  %s5798_s29 = sld [smem:[#allocation15_spill]] }
 0x1ef   :  { %v4409_v11 = vmul.f32 %v4021_v48, %v1599_v33  ;;  %v1613_v39 = vmul.f32 %v3935_v55, %v1612_v1  ;;  %v4413_v41 = vmul.f32 %v4021_v48, %v1612_v1  ;;  %v1591_v23 = vrot.slane %v1587_v61, 2  ;;  %s5839_s10 = sld [smem:[#allocation16_spill]] }
 0x1f0   :  { %v5000_v59 = vrot.slane %v4386_v45, 2  ;;  %v1626_v51 = vmul.f32 %v3935_v55, %v1625_v31  ;;  %v4420_v12 = vmul.f32 %v4021_v48, %v1625_v31  ;;  %v1604_v33 = vrot.slane %v1600_v5, 2  ;;  %s5852_s30 = sld [smem:[#allocation17_spill]] }
 0x1f1   :  { %5724 = vst [vmem:[#allocation130_spill] sm:$0xff] %v4413_v41  ;;  %v4999_v15 = vrot.slane %v4409_v11, 2  ;;  %v1617_v1 = vrot.slane %v1613_v39, 2  ;;  %v5001_v47 = vrot.slane %v4413_v41, 2  ;;  %v1639_v3 = vmul.f32 %v3935_v55, %v1638_v4 }
 0x1f2   :  { %5725 = vst [vmem:[#allocation125_spill] sm:$0xff] %v4420_v12  ;;  %v1630_v16 = vrot.slane %v1626_v51, 2  ;;  %v5003_v61 = vrot.slane %v4420_v12, 2  ;;  %v4427_v44 = vmul.f32 %v4021_v48, %v1638_v4  ;;  %v5727_v31 = vstv %s3784_s11 }
 0x1f3   :  { %v1299_v5 = vmul.f32 %v5727_v31, %v5718_v52  ;;  %v4435_v39 = vsel %vm403_vm1, %v1578_v37, %v4996_v20  ;;  %v4997_v53 = vstv %s4342_s16  ;;  %v4998_v18 = vstv %s4364_s1 }
 0x1f4   :  { %5726 = vst [vmem:[#allocation71_spill] sm:$0xff] %v4427_v44  ;;  %v4442_v51 = vsel %vm403_vm1, %v1591_v23, %v5000_v59  ;;  %v1643_v55 = vrot.slane %v1639_v3, 2  ;;  %v5004_v48 = vrot.slane %v4427_v44, 2  ;;  %v4448_v4 = vmul.f32 %v4997_v53, %v5718_v52 }
 0x1f5   :  { %v4453_v37 = vmul.f32 %v4998_v18, %v5718_v52  ;;  %v5002_v31 = vstv %s4378_s9  ;;  %v5008_v34 = vstv %s4388_s4  ;;  %v4461_v23 = vsel %vm403_vm1, %v1604_v33, %v4999_v15  ;;  %v5740_v15 = vld [vmem:[#allocation95_spill] sm:$0xff] }
 0x1f6   :  { %5728 = vst [vmem:[#allocation127_spill] sm:$0xff] %v4448_v4  ;;  %5730 = vst [vmem:[#allocation133_spill] sm:$0xff] %v4461_v23  ;;  %v4466_v3 = vsel %vm403_vm1, %v1617_v1, %v5001_v47  ;;  %v4471_v53 = vsel %vm403_vm1, %v1630_v16, %v5003_v61  ;;  %v4476_v18 = vmul.f32 %v5002_v31, %v5718_v52  ;;  %v5735_v1 = vld [vmem:[#allocation74_spill] sm:$0xff]  ;;  %v5736_v47 = vld [vmem:[#allocation121_spill] sm:$0xff]  ;;  %v5738_v31 = vstv %s4398_s17 }
 0x1f7   :  { %5729 = vst [vmem:[#allocation57_spill] sm:$0xff] %v4453_v37  ;;  %5731 = vst [vmem:[#allocation116_spill] sm:$0xff] %v4466_v3  ;;  %v4481_v33 = vsel %vm403_vm1, %v1643_v55, %v5004_v48  ;;  %v5737_v58 = vrot.slane %v5736_v47, 2  ;;  %v4492_v16 = vmul.f32 %v5008_v34, %v5718_v52  ;;  %v4497_v61 = vmul.f32 %v5738_v31, %v5718_v52  ;;  %v4499_v55 = vpop.permute.xlu1 %1228  ;;  %v5739_v48 = vld [vmem:[#allocation75_spill] sm:$0xff]  ;;  %v5742_v47 = vld [vmem:[#allocation124_spill] sm:$0xff] }
 0x1f8   :  { %5732 = vst [vmem:[#allocation117_spill] sm:$0xff] %v4471_v53  ;;  %5733 = vst [vmem:[#allocation118_spill] sm:$0xff] %v4476_v18  ;;  %v5741_v59 = vrot.slane %v5740_v15, 2  ;;  %v5746_v34 = vld [vmem:[#allocation97_spill] sm:$0xff]  ;;  %v5749_v31 = vld [vmem:[#allocation113_spill] sm:$0xff]  ;;  %v5751_v12 = vstv %s4415_s22  ;;  %v5765_v4 = vstv %s3789_s12 }
 0x1f9   :  { %5734 = vst [vmem:[#allocation119_spill] sm:$0xff] %v4481_v33  ;;  %v997_v2 = vadd.f32 %v5737_v58, %v5735_v1  ;;  %v5743_v1 = vld [vmem:[#allocation96_spill] sm:$0xff]  ;;  %v5747_v42 = vrot.slane %v5746_v34, 2  ;;  %v5750_v44 = vrot.slane %v5749_v31, 2  ;;  %v4517_v15 = vmul.f32 %v5751_v12, %v5718_v52  ;;  %v5755_v53 = vld [vmem:[#allocation131_spill] sm:$0xff] }
 0x1fa   :  { %v1010_v9 = vadd.f32 %v5741_v59, %v5739_v48  ;;  %v5744_v20 = vrot.slane %v5743_v1, 2  ;;  %v5752_v59 = vld [vmem:[#allocation87_spill] sm:$0xff]  ;;  %v5753_v48 = vld [vmem:[#allocation115_spill] sm:$0xff]  ;;  %v5756_v1 = vrot.slane %v5755_v53, 2 }
 0x1fb   :  { %v1036_v50 = vadd.f32 %v5747_v42, %v5745_v49  ;;  %v1049_v33 = vadd.f32 %v5750_v44, %v5748_v25  ;;  %v5754_v58 = vrot.slane %v5753_v48, 2  ;;  %v5759_v42 = vld [vmem:[#allocation129_spill] sm:$0xff]  ;;  %v5763_v23 = vld [vmem:[#allocation66_spill] sm:$0xff]  ;;  %v1305_v48 = vmul.f32 %v5765_v4, %v4499_v55 }
 0x1fc   :  { %v1023_v40 = vadd.f32 %v5744_v20, %v5742_v47  ;;  %v1075_v20 = vadd.f32 %v5756_v1, %v997_v2  ;;  %v5757_v47 = vld [vmem:[#allocation122_spill] sm:$0xff]  ;;  %v5760_v49 = vrot.slane %v5759_v42, 2  ;;  %v5761_v25 = vld [vmem:[#allocation55_spill] sm:$0xff]  ;;  %v5764_v12 = vrot.slane %v5763_v23, 2  ;;  %v5768_v53 = vld [vmem:[#allocation59_spill] sm:$0xff] }
 0x1fd   :  { %v1062_v18 = vadd.f32 %v5754_v58, %v5752_v59  ;;  %v5758_v37 = vrot.slane %v5757_v47, 2  ;;  %v5762_v44 = vrot.slane %v5761_v25, 2  ;;  %v5766_v58 = vld [vmem:[#allocation132_spill] sm:$0xff]  ;;  %v5769_v1 = vrot.slane %v5768_v53, 2 }
 0x1fe   :  { %v1101_v31 = vadd.f32 %v5760_v49, %v1023_v40  ;;  %v1127_v52 = vadd.f32 %v5764_v12, %v1049_v33  ;;  %v5767_v59 = vrot.slane %v5766_v58, 2  ;;  %v5772_v40 = vstv %s3795_s28  ;;  %v5775_v33 = vld [vmem:[#allocation65_spill] sm:$0xff]  ;;  %s5861_s28 = sld [smem:[#allocation135_spill]] }
 0x1ff   :  { %v1088_v34 = vadd.f32 %v5758_v37, %v1010_v9  ;;  %v1114_v3 = vadd.f32 %v5762_v44, %v1036_v50  ;;  %v1153_v9 = vadd.f32 %v5769_v1, %v1075_v20  ;;  %v5770_v37 = vld [vmem:[#allocation73_spill] sm:$0xff]  ;;  %v1311_v49 = vmul.f32 %v5772_v40, %v4499_v55  ;;  %v5773_v50 = vld [vmem:[#allocation61_spill] sm:$0xff]  ;;  %v5777_v12 = vld [vmem:[#allocation134_spill] sm:$0xff] }
 0x200   :  { %v1140_v2 = vadd.f32 %v5767_v59, %v1062_v18  ;;  %v5771_v47 = vrot.slane %v5770_v37, 2  ;;  %v5774_v25 = vrot.slane %v5773_v50, 2  ;;  %v5776_v44 = vrot.slane %v5775_v33, 2  ;;  %v5780_v20 = vld [vmem:[#allocation86_spill] sm:$0xff] }
 0x201   :  { %v5778_v58 = vrot.slane %v5777_v12, 2  ;;  %v5779_v18 = vstv %s3799_s13  ;;  %v5781_v53 = vrot.slane %v5780_v20, 2  ;;  %v1235_v1 = vadd.f32 %v4327_v32, %v1153_v9 }
 0x202   :  { %v1166_v42 = vadd.f32 %v5771_v47, %v1088_v34  ;;  %v1179_v23 = vadd.f32 %v5774_v25, %v1101_v31  ;;  %v1192_v4 = vadd.f32 %v5776_v44, %v1114_v3  ;;  %v1317_v59 = vmul.f32 %v5779_v18, %v4499_v55 }
 0x203   :  { %v1205_v41 = vadd.f32 %v5778_v58, %v1127_v52  ;;  %v1218_v34 = vadd.f32 %v5781_v53, %v1140_v2  ;;  %v5782_v47 = vstv %s3809_s7  ;;  %v5783_v50 = vstv %s3828_s14  ;;  %v5787_v53 = vld [vmem:[#allocation102_spill] sm:$0xff] }
 0x204   :  { %v1241_v37 = vadd.f32 %v4332_v17, %v1166_v42  ;;  %v1323_v31 = vmul.f32 %v5782_v47, %v4499_v55  ;;  %v1247_v3 = vadd.f32 %v4340_v27, %v1179_v23  ;;  %v1253_v40 = vadd.f32 %v4347_v7, %v1192_v4 }
 0x205   :  { %v1259_v52 = vadd.f32 %v4352_v6, %v1205_v41  ;;  %v1329_v25 = vmul.f32 %v5783_v50, %v4499_v55  ;;  %v1265_v33 = vadd.f32 %v4357_v56, %v1218_v34  ;;  %v1271_v2 = vadd.f32 %v4362_v60, %v1235_v1 }
 0x206   :  { %v1277_v32 = vadd.f32 %v4369_v8, %v1241_v37  ;;  %v5784_v17 = vstv %s3994_s20  ;;  %v1283_v42 = vadd.f32 %v4374_v54, %v1247_v3  ;;  %v1289_v27 = vadd.f32 %v4393_v43, %v1253_v40 }
 0x207   :  { %v1335_v9 = vmul.f32 %v5784_v17, %v4499_v55  ;;  %v1295_v7 = vadd.f32 %v4403_v0, %v1259_v52  ;;  %v5785_v41 = vstv %s4012_s0  ;;  %v1301_v23 = vadd.f32 %v1299_v5, %v1265_v33  ;;  %v5799_v52 = vld [vmem:[#allocation89_spill] sm:$0xff] }
 0x208   :  { %v1497_v6 = vmul.f32 %v5785_v41, %v4499_v55  ;;  %v1307_v44 = vadd.f32 %v1305_v48, %v1271_v2  ;;  %v1313_v4 = vadd.f32 %v1311_v49, %v1277_v32  ;;  %v5786_v56 = vstv %s4018_s3 }
 0x209   :  { %v1510_v60 = vmul.f32 %v5786_v56, %v4499_v55  ;;  %v1319_v12 = vadd.f32 %v1317_v59, %v1283_v42  ;;  %v1325_v8 = vadd.f32 %v1323_v31, %v1289_v27  ;;  %v1331_v58 = vadd.f32 %v1329_v25, %v1295_v7  ;;  %v5801_v25 = vld [vmem:[#allocation90_spill] sm:$0xff]  ;;  %v5806_v7 = vld [vmem:[#allocation92_spill] sm:$0xff] }
 0x20a   :  { %v1501_v18 = vrot.slane %v1497_v6, 1  ;;  %v1337_v20 = vadd.f32 %v1335_v9, %v1301_v23  ;;  %v5788_v54 = vrot.slane %v5787_v53, 1  ;;  %v5789_v43 = vrot.slane %v4028_v19, 1  ;;  %v5804_v9 = vld [vmem:[#allocation91_spill] sm:$0xff] }
 0x20b   :  { %v1514_v1 = vrot.slane %v1510_v60, 1  ;;  %v5790_v37 = vrot.slane %v4045_v26, 1  ;;  %v5791_v48 = vrot.slane %v4049_v13, 1  ;;  %v5793_v59 = vrot.slane %v4056_v35, 1 }
 0x20c   :  { %v1350_v34 = vadd.f32 %v5788_v54, %v1307_v44  ;;  %v1363_v0 = vadd.f32 %v5789_v43, %v1313_v4  ;;  %v5795_v31 = vrot.slane %v4217_v24, 1  ;;  %v5797_v19 = vrot.slane %v4067_v38, 1 }
 0x20d   :  { %v1376_v5 = vadd.f32 %v5790_v37, %v1319_v12  ;;  %v1389_v49 = vadd.f32 %v5791_v48, %v1325_v8  ;;  %v1402_v47 = vadd.f32 %v5793_v59, %v1331_v58  ;;  %v5800_v26 = vrot.slane %v5799_v52, 1  ;;  %v5818_v52 = vld [vmem:[#allocation88_spill] sm:$0xff] }
 0x20e   :  { %v1502_v3 = vsel %vm168_vm0, %v5795_v31, %v1501_v18  ;;  %v1415_v40 = vadd.f32 %v5797_v19, %v1337_v20  ;;  %v5802_v13 = vrot.slane %v5801_v25, 1  ;;  %v1696_v35 = vrot.slane %v4492_v16, 2  ;;  %v5812_v20 = vld [vmem:[#allocation93_spill] sm:$0xff] }
 0x20f   :  { %v1428_v50 = vadd.f32 %v5800_v26, %v1350_v34  ;;  %v1505_v2 = vadd.f32 %v1502_v3, %v4265_v22  ;;  %v1709_v32 = vrot.slane %v4497_v61, 2  ;;  %v1722_v24 = vrot.slane %v4517_v15, 2  ;;  %v5814_v34 = vld [vmem:[#allocation94_spill] sm:$0xff]  ;;  %v5864_v15 = vld [vmem:[#allocation108_spill] sm:$0xff] }
 0x210   :  { %v1441_v33 = vadd.f32 %v5802_v13, %v1363_v0  ;;  %v5803_v17 = vrot.slane %v4222_v10, 1  ;;  %v5805_v42 = vrot.slane %v5804_v9, 1  ;;  %v5807_v41 = vrot.slane %v5806_v7, 1 }
 0x211   :  { %v1506_v23 = vadd.f32 %v1501_v18, %v1428_v50  ;;  %v5808_v22 = vstv %s5792_s24  ;;  %v5809_v56 = vstv %s5794_s8  ;;  %v5810_v10 = vstv %s5796_s25 }
 0x212   :  { %v1515_v38 = vsel %vm168_vm0, %v5803_v17, %v1514_v1  ;;  %v1454_v27 = vadd.f32 %v5805_v42, %v1376_v5  ;;  %v1467_v6 = vadd.f32 %v5807_v41, %v1389_v49  ;;  %v1519_v44 = vadd.f32 %v1514_v1, %v1441_v33  ;;  %v5826_v41 = vld [vmem:[#allocation130_spill] sm:$0xff] }
 0x213   :  { %v1523_v4 = vmul.f32 %v5808_v22, %v4499_v55  ;;  %v1536_v60 = vmul.f32 %v5809_v56, %v4499_v55  ;;  %v1549_v12 = vmul.f32 %v5810_v10, %v4499_v55  ;;  %v5811_v8 = vstv %s5798_s29  ;;  %v5831_v56 = vld [vmem:[#allocation116_spill] sm:$0xff] }
 0x214   :  { %v1562_v58 = vmul.f32 %v5811_v8, %v4499_v55  ;;  %v5813_v53 = vrot.slane %v5812_v20, 1  ;;  %v5815_v18 = vrot.slane %v5814_v34, 1  ;;  %v1518_v0 = vadd.f32 %v1515_v38, %v4268_v14  ;;  %v5835_v20 = vld [vmem:[#allocation125_spill] sm:$0xff] }
 0x215   :  { %v1583_v1 = vadd.f32 %v4435_v39, %v1505_v2  ;;  %v1527_v37 = vrot.slane %v1523_v4, 1  ;;  %v1540_v5 = vrot.slane %v1536_v60, 1  ;;  %v1553_v48 = vrot.slane %v1549_v12, 1  ;;  %v5830_v4 = vld [vmem:[#allocation133_spill] sm:$0xff]  ;;  %v5832_v12 = vld [vmem:[#allocation57_spill] sm:$0xff] }
 0x216   :  { %v1480_v54 = vadd.f32 %v5813_v53, %v1402_v47  ;;  %v1493_v43 = vadd.f32 %v5815_v18, %v1415_v40  ;;  %v1566_v49 = vrot.slane %v1562_v58, 1  ;;  %v5816_v59 = vrot.slane %v4382_v62, 2  ;;  %v5834_v58 = vld [vmem:[#allocation117_spill] sm:$0xff] }
 0x217   :  { %v5817_v3 = vrot.slane %v4386_v45, 2  ;;  %v5819_v26 = vstv %s4342_s16  ;;  %v5820_v50 = vstv %s4364_s1  ;;  %v5821_v14 = vrot.slane %v4231_v36, 1 }
 0x218   :  { %v1584_v31 = vadd.f32 %v5816_v59, %v1506_v23  ;;  %v1652_v47 = vmul.f32 %v5819_v26, %v5818_v52  ;;  %v1665_v40 = vmul.f32 %v5820_v50, %v5818_v52  ;;  %v1532_v25 = vadd.f32 %v1527_v37, %v1454_v27  ;;  %v5845_v50 = vld [vmem:[#allocation118_spill] sm:$0xff] }
 0x219   :  { %v1597_v19 = vadd.f32 %v5817_v3, %v1519_v44  ;;  %v1528_v39 = vsel %vm168_vm0, %v5821_v14, %v1527_v37  ;;  %v5822_v13 = vrot.slane %v4236_v63, 1  ;;  %v1545_v62 = vadd.f32 %v1540_v5, %v1467_v6  ;;  %v5828_v44 = vld [vmem:[#allocation127_spill] sm:$0xff]  ;;  %v5840_v37 = vld [vmem:[#allocation71_spill] sm:$0xff] }
 0x21a   :  { %v1531_v2 = vadd.f32 %v1528_v39, %v4271_v57  ;;  %v5823_v17 = vrot.slane %v4255_v46, 1  ;;  %v1558_v9 = vadd.f32 %v1553_v48, %v1480_v54  ;;  %v5824_v42 = vrot.slane %v4260_v30, 1 }
 0x21b   :  { %v1541_v33 = vsel %vm168_vm0, %v5822_v13, %v1540_v5  ;;  %v1571_v63 = vadd.f32 %v1566_v49, %v1493_v43  ;;  %v1596_v7 = vadd.f32 %v4442_v51, %v1518_v0  ;;  %v5827_v6 = vrot.slane %v5826_v41, 2  ;;  %v5838_v43 = vld [vmem:[#allocation119_spill] sm:$0xff] }
 0x21c   :  { %v1544_v45 = vadd.f32 %v1541_v33, %v4277_v28  ;;  %v1554_v38 = vsel %vm168_vm0, %v5823_v17, %v1553_v48  ;;  %v1567_v27 = vsel %vm168_vm0, %v5824_v42, %v1566_v49  ;;  %v5825_v28 = vrot.slane %v4409_v11, 2 }
 0x21d   :  { %v1557_v36 = vadd.f32 %v1554_v38, %v4280_v29  ;;  %v1570_v57 = vadd.f32 %v1567_v27, %v4317_v21  ;;  %v1623_v23 = vadd.f32 %v5827_v6, %v1545_v62  ;;  %v5829_v22 = vrot.slane %v5828_v44, 2 }
 0x21e   :  { %v1610_v46 = vadd.f32 %v5825_v28, %v1532_v25  ;;  %v1609_v30 = vadd.f32 %v5830_v4, %v1531_v2  ;;  %v1622_v60 = vadd.f32 %v5831_v56, %v1544_v45  ;;  %v1656_v10 = vrot.slane %v1652_v47, 2 }
 0x21f   :  { %v1662_v29 = vadd.f32 %v5829_v22, %v1584_v31  ;;  %v5833_v8 = vrot.slane %v5832_v12, 2  ;;  %v1635_v21 = vadd.f32 %v5834_v58, %v1557_v36  ;;  %v5836_v11 = vrot.slane %v5835_v20, 2 }
 0x220   :  { %v1669_v54 = vrot.slane %v1665_v40, 2  ;;  %v5837_v34 = vstv %s4378_s9  ;;  %v1648_v0 = vadd.f32 %v5838_v43, %v1570_v57  ;;  %v5841_v5 = vrot.slane %v5840_v37, 2 }
 0x221   :  { %v1675_v51 = vadd.f32 %v5833_v8, %v1597_v19  ;;  %v1636_v53 = vadd.f32 %v5836_v11, %v1558_v9  ;;  %v1678_v18 = vmul.f32 %v5837_v34, %v5818_v52  ;;  %v5842_v49 = vstv %s4388_s4 }
 0x222   :  { %v1649_v48 = vadd.f32 %v5841_v5, %v1571_v63  ;;  %v1691_v59 = vmul.f32 %v5842_v49, %v5818_v52  ;;  %v5843_v31 = vstv %s4398_s17  ;;  %v5844_v19 = vmov %v5829_v22  ;;  %v5862_v49 = vld [vmem:[#allocation106_spill] sm:$0xff] }
 0x223   :  { %v1704_v3 = vmul.f32 %v5843_v31, %v5818_v52  ;;  %v1658_v26 = vsel %vm403_vm1, %v1656_v10, %v5844_v19  ;;  %v1682_v47 = vrot.slane %v1678_v18, 2  ;;  %v5846_v40 = vrot.slane %v5845_v50, 2  ;;  %v5856_v10 = vld [vmem:[#allocation103_spill] sm:$0xff] }
 0x224   :  { %v1701_v39 = vadd.f32 %v1696_v35, %v1623_v23  ;;  %v1661_v25 = vadd.f32 %v1658_v26, %v1583_v1  ;;  %v1695_v13 = vrot.slane %v1691_v59, 2  ;;  %v5847_v62 = vstv %s4415_s22 }
 0x225   :  { %v1688_v14 = vadd.f32 %v5846_v40, %v1610_v46  ;;  %v1708_v33 = vrot.slane %v1704_v3, 2  ;;  %v1717_v2 = vmul.f32 %v5847_v62, %v5818_v52  ;;  %v5848_v45 = vmov %v5833_v8  ;;  %v5858_v8 = vld [vmem:[#allocation105_spill] sm:$0xff]  ;;  %v5866_v3 = vld [vmem:[#allocation120_spill] sm:$0xff] }
 0x226   :  { %v1671_v17 = vsel %vm403_vm1, %v1669_v54, %v5848_v45  ;;  %v5849_v38 = vmov %v5846_v40  ;;  %v5850_v36 = vstv %s4058_s23  ;;  %v5851_v1 = vstv %s5839_s10 }
 0x227   :  { %v1684_v9 = vsel %vm403_vm1, %v1682_v47, %v5849_v38  ;;  %v1731_v42 = vmul.f32 %v5850_v36, %v4499_v55  ;;  %v1744_v27 = vmul.f32 %v5851_v1, %v4499_v55  ;;  %v1674_v63 = vadd.f32 %v1671_v17, %v1596_v7 }
 0x228   :  { %v1687_v57 = vadd.f32 %v1684_v9, %v1609_v30  ;;  %v1697_v52 = vsel %vm403_vm1, %v1695_v13, %v1696_v35  ;;  %v1714_v28 = vadd.f32 %v1709_v32, %v1636_v53  ;;  %v1710_v46 = vsel %vm403_vm1, %v1708_v33, %v1709_v32 }
 0x229   :  { %v1721_v41 = vrot.slane %v1717_v2, 2  ;;  %v1735_v6 = vrot.slane %v1731_v42, 2  ;;  %v1748_v23 = vrot.slane %v1744_v27, 2  ;;  %v1700_v44 = vadd.f32 %v1697_v52, %v1622_v60 }
 0x22a   :  { %v5853_v22 = vstv %s4069_s18  ;;  %v5854_v4 = vstv %s4079_s21  ;;  %v5855_v35 = vstv %s4088_s2  ;;  %v1713_v56 = vadd.f32 %v1710_v46, %v1635_v21 }
 0x22b   :  { %v1757_v7 = vmul.f32 %v5853_v22, %v4499_v55  ;;  %v1770_v16 = vmul.f32 %v5854_v4, %v4499_v55  ;;  %v1783_v30 = vmul.f32 %v5855_v35, %v4499_v55  ;;  %v5857_v12 = vrot.slane %v5856_v10, 2 }
 0x22c   :  { %v1740_v32 = vadd.f32 %v1735_v6, %v1662_v29  ;;  %v5859_v58 = vrot.slane %v5858_v8, 2  ;;  %v1753_v53 = vadd.f32 %v1748_v23, %v1675_v51  ;;  %v1723_v34 = vsel %vm403_vm1, %v1721_v41, %v1722_v24 }
 0x22d   :  { %v1736_v61 = vsel %vm403_vm1, %v5857_v12, %v1735_v6  ;;  %v1761_v54 = vrot.slane %v1757_v7, 2  ;;  %v1774_v18 = vrot.slane %v1770_v16, 2  ;;  %v1787_v43 = vrot.slane %v1783_v30, 2 }
 0x22e   :  { %v1749_v20 = vsel %vm403_vm1, %v5859_v58, %v1748_v23  ;;  %v1739_v60 = vadd.f32 %v1736_v61, %v1661_v25  ;;  %v5860_v21 = vstv %s5852_s30  ;;  %1807 = vst [vmem:[%s5861_s28 + $0x8] sm:$0x3f] %v1740_v32  ;;  %v1726_v29 = vadd.f32 %v1723_v34, %v1648_v0  ;;  %1995 = vst [vmem:[%s5861_s28 + $0x18] sm:$0x3f] %v1753_v53 }
 0x22f   :  { %v1752_v11 = vadd.f32 %v1749_v20, %v1674_v63  ;;  %v1796_v37 = vmul.f32 %v5860_v21, %v4499_v55  ;;  %v1727_v5 = vadd.f32 %v1722_v24, %v1649_v48  ;;  %v5863_v51 = vrot.slane %v5862_v49, 2 }
 0x230   :  { %v1766_v31 = vadd.f32 %v1761_v54, %v1688_v14  ;;  %1806 = vst [vmem:[%s5861_s28] sm:$0xff] %v1739_v60  ;;  %v5865_v24 = vrot.slane %v5864_v15, 2  ;;  %v1779_v48 = vadd.f32 %v1774_v18, %v1701_v39  ;;  %v5867_v19 = vrot.slane %v5866_v3, 2  ;;  %v5868_v39 = vld [vmem:[#allocation63_spill] sm:$0xff] }
 0x231   :  { %v1762_v59 = vsel %vm403_vm1, %v5863_v51, %v1761_v54  ;;  %1994 = vst [vmem:[%s5861_s28 + $0x10] sm:$0xff] %v1752_v11  ;;  %v1792_v40 = vadd.f32 %v1787_v43, %v1714_v28  ;;  %v1800_v14 = vrot.slane %v1796_v37, 2  ;;  %v5869_v25 = vrot.slane %v5868_v39, 2 }
 0x232   :  { %v1765_v55 = vadd.f32 %v1762_v59, %v1687_v57  ;;  %v1775_v0 = vsel %vm403_vm1, %v5865_v24, %v1774_v18  ;;  %v1788_v26 = vsel %vm403_vm1, %v5867_v19, %v1787_v43  ;;  %1997 = vst [vmem:[%s5861_s28 + $0x28] sm:$0x3f] %v1766_v31  ;;  %1999 = vst [vmem:[%s5861_s28 + $0x38] sm:$0x3f] %v1779_v48 }
 0x233   :  { %v1778_v47 = vadd.f32 %v1775_v0, %v1700_v44  ;;  %v1791_v50 = vadd.f32 %v1788_v26, %v1713_v56  ;;  %v1801_v13 = vsel %vm403_vm1, %v5869_v25, %v1800_v14  ;;  %v1805_v33 = vadd.f32 %v1800_v14, %v1727_v5  ;;  %2001 = vst [vmem:[%s5861_s28 + $0x48] sm:$0x3f] %v1792_v40 }
 0x234   :  { %1996 = vst [vmem:[%s5861_s28 + $0x20] sm:$0xff] %v1765_v55  ;;  %v1804_v62 = vadd.f32 %v1801_v13, %v1726_v29 }
 0x235   :  { %1998 = vst [vmem:[%s5861_s28 + $0x30] sm:$0xff] %v1778_v47  ;;  %2000 = vst [vmem:[%s5861_s28 + $0x40] sm:$0xff] %v1791_v50 }
 0x236   :  { %2003 = vst [vmem:[%s5861_s28 + $0x58] sm:$0x3f] %v1805_v33  ;;  %2002 = vst [vmem:[%s5861_s28 + $0x50] sm:$0xff] %v1804_v62 }
 0x237   :  { %1827 = vsyncpa [#allocation6], 1 }

</bundles_post_ra>
